<compile_context>
chip_gen: v6e
topology: v6e:2x2x1
jax: 0.10.0
libtpu: 0.0.40
codegen_flags: <defaults>
</compile_context>

<pallas_src>
import math
from functools import partial

import jax
import jax.numpy as jnp
from jax import lax
from jax.experimental import pallas as pl
from jax.experimental.pallas import tpu as pltpu

# ----------------------------- configuration ------------------------------
B = 2             # batch
T = 16            # number of frames (sequence length)
D_MOTION = 20     # dataset.motion_dim
D_CONTACT = 4     # len(config.contact_joints)
D_MASK = 4        # config.d_mask
D_ENC_H = 48      # config.d_encoder_h
D_MODEL = 32      # config.d_model
D_DEC_H = 48      # config.d_decoder_h
D_HEAD = 16       # config.d_head
N_HEAD = 4        # config.n_head
D_PFF = 64        # config.d_pff_inner
N_LAYER = 2       # config.n_layer
CONTEXT_FRAMES = 4
LN_EPS = 1e-5

D_IN = D_MOTION + D_MASK          # encoder input (d_phase = d_traj = 0)
D_QKV = N_HEAD * D_HEAD
D_OUT = D_MOTION + D_CONTACT
N_REL = 2 * T - 1
SHIFT_BITS = (T - 1).bit_length()
ATTN_SCALE = 1.0 / math.sqrt(D_HEAD)
BD_PAD_W = 128                    # lane-padded width for the stacked relative shift
assert N_HEAD * N_REL <= BD_PAD_W

# ------------------------- packed parameter layout --------------------------
VEC_W = 128
_VEC_NAMES = ["enc_b1", "enc_b2", "rel_w1", "rel_b1", "rel_b2",
              "final_ln_g", "final_ln_b", "dec_b1", "dec_b2",
              "alphas", "enc_w1_mask_sum"]
for _i in range(N_LAYER):
    _VEC_NAMES += [f"attn_ln_g_{_i}", f"attn_ln_b_{_i}",
                   f"pff_ln_g_{_i}", f"pff_ln_b_{_i}",
                   f"pff_b1_{_i}", f"pff_b2_{_i}"]
_VEC_ROW = {n: i for i, n in enumerate(_VEC_NAMES)}
VEC_ROWS = len(_VEC_NAMES)


def _round8(n):
    return -(-n // 8) * 8


MAT_W = 64
_MAT_SEG_DEFS = [("enc_w1m", D_MOTION, D_ENC_H),
                 ("enc_w2", D_ENC_H, D_MODEL),
                 ("rel_w2", D_HEAD, D_HEAD),
                 ("dec_w1", D_MODEL, D_DEC_H),
                 ("dec_w2", D_DEC_H, D_OUT)]
for _i in range(N_LAYER):
    _MAT_SEG_DEFS += [(f"wo_{_i}", D_QKV, D_MODEL),
                      (f"pff_w1_{_i}", D_MODEL, D_PFF),
                      (f"pff_w2_{_i}", D_PFF, D_MODEL)]
_MAT_INFO = {}
_off = 0
for _name, _r, _c in _MAT_SEG_DEFS:
    _MAT_INFO[_name] = (_off, _r, _c)
    _off += _round8(_r)
MAT_ROWS = _off


# ------------------------------- fused kernel -------------------------------
def _fused_kernel(mot_ref, vec_ref, wqkv_ref, mat_ref, out_ref, *, midway_targets):
    f32 = jnp.float32

    def vrow(name, width):
        r = _VEC_ROW[name]
        return vec_ref[r:r + 1, :width]                      # (1, width)

    def mseg(name):
        off, rows, cols = _MAT_INFO[name]
        return mat_ref[off:off + rows, :cols]

    def prelu(x, a):
        return jnp.where(x >= 0.0, x, a * x)

    def layer_norm(x, g, b):
        mu = jnp.mean(x, axis=-1, keepdims=True)
        var = jnp.mean(jnp.square(x - mu), axis=-1, keepdims=True)
        return (x - mu) * lax.rsqrt(var + LN_EPS) * g + b

    def dot(a, b):
        return jnp.dot(a, b, preferred_element_type=f32)

    def dot_nt(a, b):  # a (m,k) contracted with b (n,k) over k -> (m,n)
        return lax.dot_general(a, b, (((1,), (1,)), ((), ())),
                               preferred_element_type=f32)

    # PReLU alphas (torch default num_parameters=1 -> scalar per activation)
    arow = _VEC_ROW["alphas"]
    a_enc1 = vec_ref[arow:arow + 1, 0:1]
    a_enc2 = vec_ref[arow:arow + 1, 1:2]
    a_rel = vec_ref[arow:arow + 1, 2:3]
    a_dec = vec_ref[arow:arow + 1, 3:4]

    # ---------------- encoder MLP: Linear->PReLU->Linear->PReLU ----------------
    mot = mot_ref[...]                                        # (B*T, D_MOTION)
    # data mask (get_data_mask) rebuilt from a static iota; all D_MASK columns are
    # identical, so its contribution is mask_flag * sum(enc_w1 mask-rows).
    frame = lax.broadcasted_iota(jnp.int32, (T, 1), 0)
    keep = (frame < CONTEXT_FRAMES) | (frame == T - 1)
    for tgt in midway_targets:
        keep = keep | (frame == (tgt % T))
    mask_flag = keep.astype(f32)                              # (T, 1)
    mask_add = mask_flag * vrow("enc_w1_mask_sum", D_ENC_H) + vrow("enc_b1", D_ENC_H)
    mask_add = jnp.concatenate([mask_add] * B, axis=0)        # (B*T, D_ENC_H)

    h = prelu(dot(mot, mseg("enc_w1m")) + mask_add, a_enc1)
    x = prelu(dot(h, mseg("enc_w2")) + vrow("enc_b2", D_MODEL), a_enc2)   # (B*T, D_MODEL)

    # ---------------- relative-position MLP (shared by all heads/layers) -------
    pos = lax.broadcasted_iota(jnp.int32, (N_REL, 1), 0).astype(f32) - float(T - 1)
    r = prelu(pos * vrow("rel_w1", D_HEAD) + vrow("rel_b1", D_HEAD), a_rel)
    rel_emb = dot(r, mseg("rel_w2")) + vrow("rel_b2", D_HEAD)             # (N_REL, D_HEAD)

    # Transformer-XL relative shift, applied to all heads at once on a (T,128)
    # lane-packed row:  head h occupies lanes [h*N_REL, h*N_REL + N_REL).
    # Needed target: out[i, h*N_REL + j] = in[i, h*N_REL + (T-1) + j - i], j < T.
    # Per-row left-roll by (T-1-i) <= 15 never crosses a head block nor wraps.
    q_idx = lax.broadcasted_iota(jnp.int32, (T, 1), 0)
    shift_amt = (T - 1) - q_idx                                # (T, 1)

    def rel_shift_all_heads(bd_wide):                          # (T, 128) -> (T, 128)
        cur = bd_wide
        for bit in range(SHIFT_BITS):
            amt = 1 << bit
            # left-roll by amt == jnp.roll(cur, -amt) == pltpu.roll(cur, W - amt)
            rolled = pltpu.roll(cur, BD_PAD_W - amt, 1)
            cur = jnp.where((shift_amt & amt) != 0, rolled, cur)
        return cur

    zero_pad = jnp.zeros((T, BD_PAD_W - N_HEAD * N_REL), f32)

    # ---------------- transformer stack (pre-LN, residual) --------------------
    for i in range(N_LAYER):
        # --- relative multi-head attention ---
        xn = layer_norm(x, vrow(f"attn_ln_g_{i}", D_MODEL), vrow(f"attn_ln_b_{i}", D_MODEL))
        wqkv_i = wqkv_ref[i * D_MODEL:(i + 1) * D_MODEL, :]
        qkv = dot(xn, wqkv_i)                                  # (B*T, 3*D_QKV)

        o_batches = []
        for b in range(B):
            r0 = b * T
            # one fused score matmul per head: q @ [k ; rel_emb]^T
            s_fulls = []
            for hd in range(N_HEAD):
                lo = hd * D_HEAD
                qh = qkv[r0:r0 + T, lo:lo + D_HEAD]
                kh = qkv[r0:r0 + T, D_QKV + lo:D_QKV + lo + D_HEAD]
                kr = jnp.concatenate([kh, rel_emb], axis=0)    # (T + N_REL, D_HEAD)
                s_fulls.append(dot_nt(qh, kr))                 # (T, T + N_REL)
            # lane-pack all heads' bd columns and shift them together
            bd_wide = jnp.concatenate([s[:, T:] for s in s_fulls] + [zero_pad],
                                      axis=1)                  # (T, 128)
            bd_shift = rel_shift_all_heads(bd_wide)

            head_outs = []
            for hd in range(N_HEAD):
                lo = hd * D_HEAD
                content = s_fulls[hd][:, :T]
                bd = bd_shift[:, hd * N_REL:hd * N_REL + T]
                s = (content + bd) * ATTN_SCALE
                s = s - jnp.max(s, axis=-1, keepdims=True)
                p = jnp.exp(s)
                attn = p * pl.reciprocal(jnp.sum(p, axis=-1, keepdims=True), approx=True)
                vh = qkv[r0:r0 + T, 2 * D_QKV + lo:2 * D_QKV + lo + D_HEAD]
                head_outs.append(dot(attn, vh))                # (T, D_HEAD)
            o_batches.append(jnp.concatenate(head_outs, axis=1))   # (T, D_QKV)

        o_all = jnp.concatenate(o_batches, axis=0)             # (B*T, D_QKV)
        x = x + dot(o_all, mseg(f"wo_{i}"))

        # --- position-wise feed-forward ---
        hn = layer_norm(x, vrow(f"pff_ln_g_{i}", D_MODEL), vrow(f"pff_ln_b_{i}", D_MODEL))
        ph = jnp.maximum(dot(hn, mseg(f"pff_w1_{i}")) + vrow(f"pff_b1_{i}", D_PFF), 0.0)
        x = x + dot(ph, mseg(f"pff_w2_{i}")) + vrow(f"pff_b2_{i}", D_MODEL)

    # ---------------- final LayerNorm + decoder + residual/sigmoid ------------
    xn = layer_norm(x, vrow("final_ln_g", D_MODEL), vrow("final_ln_b", D_MODEL))
    hdec = prelu(dot(xn, mseg("dec_w1")) + vrow("dec_b1", D_DEC_H), a_dec)
    y = dot(hdec, mseg("dec_w2")) + vrow("dec_b2", D_OUT)      # (B*T, D_OUT)
    out_ref[:, :D_MOTION] = mot + y[:, :D_MOTION]              # residual motion
    out_ref[:, D_MOTION:] = jax.nn.sigmoid(y[:, D_MOTION:])    # contact


# ------------------------------- wrapper -------------------------------------
@partial(jax.jit, static_argnums=(2,))
def detail_transformer_forward(packed, motion, midway_targets):
    b, t, m = motion.shape
    assert (b, t, m) == (B, T, D_MOTION)
    motion2d = motion.reshape(B * T, D_MOTION)                 # free reshape
    out = pl.pallas_call(
        partial(_fused_kernel, midway_targets=tuple(midway_targets)),
        out_shape=jax.ShapeDtypeStruct((B * T, D_OUT), jnp.float32),
    )(motion2d, packed["vecs"], packed["wqkv"], packed["mats"])
    out = out.reshape(B, T, D_OUT)
    return {"motion": out[..., :D_MOTION], "contact": out[..., D_MOTION:]}


# ------------------------------ parameters ----------------------------------
def init_params(key):
    keys = iter(jax.random.split(key, 64))

    def lin(fan_in, fan_out):
        s = 1.0 / math.sqrt(fan_in)
        w = jax.random.uniform(next(keys), (fan_in, fan_out), jnp.float32, -s, s)
        bias = jax.random.uniform(next(keys), (1, fan_out), jnp.float32, -s, s)
        return w, bias

    p = {}
    p["enc_w1"], p["enc_b1"] = lin(D_IN, D_ENC_H)
    p["enc_w2"], p["enc_b2"] = lin(D_ENC_H, D_MODEL)
    p["rel_w1"], p["rel_b1"] = lin(1, D_HEAD)
    p["rel_w2"], p["rel_b2"] = lin(D_HEAD, D_HEAD)

    aln_g, aln_b, wqkv, wo = [], [], [], []
    pln_g, pln_b, pw1, pb1, pw2, pb2 = [], [], [], [], [], []
    for _ in range(N_LAYER):
        aln_g.append(jnp.ones((1, D_MODEL), jnp.float32))
        aln_b.append(jnp.zeros((1, D_MODEL), jnp.float32))
        wq, _ = lin(D_MODEL, D_QKV)          # atten_bias=False
        wk, _ = lin(D_MODEL, D_QKV)
        wv, _ = lin(D_MODEL, D_QKV)
        wqkv.append(jnp.concatenate([wq, wk, wv], axis=-1))
        w_o, _ = lin(D_QKV, D_MODEL)
        wo.append(w_o)
        pln_g.append(jnp.ones((1, D_MODEL), jnp.float32))
        pln_b.append(jnp.zeros((1, D_MODEL), jnp.float32))
        w1, b1 = lin(D_MODEL, D_PFF); pw1.append(w1); pb1.append(b1)
        w2, b2 = lin(D_PFF, D_MODEL); pw2.append(w2); pb2.append(b2)

    p["attn_ln_g"] = jnp.stack(aln_g); p["attn_ln_b"] = jnp.stack(aln_b)
    p["attn_wqkv"] = jnp.stack(wqkv);  p["attn_wo"] = jnp.stack(wo)
    p["pff_ln_g"] = jnp.stack(pln_g);  p["pff_ln_b"] = jnp.stack(pln_b)
    p["pff_w1"] = jnp.stack(pw1);      p["pff_b1"] = jnp.stack(pb1)
    p["pff_w2"] = jnp.stack(pw2);      p["pff_b2"] = jnp.stack(pb2)

    p["final_ln_g"] = jnp.ones((1, D_MODEL), jnp.float32)
    p["final_ln_b"] = jnp.zeros((1, D_MODEL), jnp.float32)
    p["dec_w1"], p["dec_b1"] = lin(D_MODEL, D_DEC_H)
    p["dec_w2"], p["dec_b2"] = lin(D_DEC_H, D_OUT)
    # PReLU alphas (torch default 0.25): [enc1, enc2, rel, dec]
    p["prelu_alphas"] = jnp.full((4,), 0.25, jnp.float32)
    return p


def pack_params(p):
    """One-time packing of all parameters into 3 lane-dense slabs (outside jit)."""
    def vrow_pack(v):
        v = jnp.asarray(v, jnp.float32).reshape(1, -1)
        return jnp.pad(v, ((0, 0), (0, VEC_W - v.shape[1])))

    vec_src = {
        "enc_b1": p["enc_b1"], "enc_b2": p["enc_b2"],
        "rel_w1": p["rel_w1"], "rel_b1": p["rel_b1"], "rel_b2": p["rel_b2"],
        "final_ln_g": p["final_ln_g"], "final_ln_b": p["final_ln_b"],
        "dec_b1": p["dec_b1"], "dec_b2": p["dec_b2"],
        "alphas": p["prelu_alphas"],
        # all D_MASK columns of the data mask carry the same value -> fold the
        # mask rows of enc_w1 into a single additive row
        "enc_w1_mask_sum": jnp.sum(p["enc_w1"][D_MOTION:], axis=0),
    }
    for i in range(N_LAYER):
        vec_src[f"attn_ln_g_{i}"] = p["attn_ln_g"][i]
        vec_src[f"attn_ln_b_{i}"] = p["attn_ln_b"][i]
        vec_src[f"pff_ln_g_{i}"] = p["pff_ln_g"][i]
        vec_src[f"pff_ln_b_{i}"] = p["pff_ln_b"][i]
        vec_src[f"pff_b1_{i}"] = p["pff_b1"][i]
        vec_src[f"pff_b2_{i}"] = p["pff_b2"][i]
    vecs = jnp.concatenate([vrow_pack(vec_src[n]) for n in _VEC_NAMES], axis=0)

    mat_src = {
        "enc_w1m": p["enc_w1"][:D_MOTION],
        "enc_w2": p["enc_w2"],
        "rel_w2": p["rel_w2"],
        "dec_w1": p["dec_w1"],
        "dec_w2": p["dec_w2"],
    }
    for i in range(N_LAYER):
        mat_src[f"wo_{i}"] = p["attn_wo"][i]
        mat_src[f"pff_w1_{i}"] = p["pff_w1"][i]
        mat_src[f"pff_w2_{i}"] = p["pff_w2"][i]
    segs = []
    for name, rows, cols in _MAT_SEG_DEFS:
        m = jnp.asarray(mat_src[name], jnp.float32)
        assert m.shape == (rows, cols), (name, m.shape, rows, cols)
        segs.append(jnp.pad(m, ((0, _round8(rows) - rows), (0, MAT_W - cols))))
    mats = jnp.concatenate(segs, axis=0)
    assert mats.shape == (MAT_ROWS, MAT_W)

    wqkv = jnp.asarray(p["attn_wqkv"], jnp.float32).reshape(N_LAYER * D_MODEL, 3 * D_QKV)
    return {"vecs": vecs, "wqkv": wqkv, "mats": mats}


# --------------------------------- main --------------------------------------
if __name__ == "__main__":
    root = jax.random.PRNGKey(0)
    k_param, k_motion = jax.random.split(root)
    params = init_params(k_param)
    packed = pack_params(params)          # one-time packing, outside the jitted forward
    motion = jax.random.normal(k_motion, (B, T, D_MOTION), jnp.float32)
    midway_targets = (7, 11)

    out = detail_transformer_forward(packed, motion, midway_targets)
    jax.block_until_ready(out["motion"])
    jax.block_until_ready(out["contact"])

    assert out["motion"].shape == (B, T, D_MOTION)
    assert out["contact"].shape == (B, T, D_CONTACT)
    assert bool(jnp.all(jnp.isfinite(out["motion"])))
    assert bool(jnp.all((out["contact"] >= 0.0) & (out["contact"] <= 1.0)))
    print("KERNEL_OK")
</pallas_src>

<mosaic_0001>
module attributes {stable_mosaic.version = 11 : i64} {
  func.func @_fused_kernel(%arg0: memref<32x20xf32, #tpu.memory_space<vmem>>, %arg1: memref<23x128xf32, #tpu.memory_space<vmem>>, %arg2: memref<64x192xf32, #tpu.memory_space<vmem>>, %arg3: memref<488x64xf32, #tpu.memory_space<vmem>>, %arg4: memref<32x24xf32, #tpu.memory_space<vmem>>) attributes {dimension_semantics = [], scalar_prefetch = 0 : i64, scratch_operands = 0 : i64, tpu.core_type = #tpu.core_type<tc>} {
    %c9 = arith.constant 9 : index
    %c0 = arith.constant 0 : index
    %0 = vector.load %arg1[%c9, %c0] : memref<23x128xf32, #tpu.memory_space<vmem>>, vector<1x1xf32>
    %c9_0 = arith.constant 9 : index
    %c1 = arith.constant 1 : index
    %1 = vector.load %arg1[%c9_0, %c1] : memref<23x128xf32, #tpu.memory_space<vmem>>, vector<1x1xf32>
    %c9_1 = arith.constant 9 : index
    %c2 = arith.constant 2 : index
    %2 = vector.load %arg1[%c9_1, %c2] : memref<23x128xf32, #tpu.memory_space<vmem>>, vector<1x1xf32>
    %c9_2 = arith.constant 9 : index
    %c3 = arith.constant 3 : index
    %3 = vector.load %arg1[%c9_2, %c3] : memref<23x128xf32, #tpu.memory_space<vmem>>, vector<1x1xf32>
    %c0_3 = arith.constant 0 : index
    %c0_4 = arith.constant 0 : index
    %4 = vector.load %arg0[%c0_3, %c0_4] : memref<32x20xf32, #tpu.memory_space<vmem>>, vector<32x20xf32>
    %5 = tpu.iota {dimensions = array<i32: 0>} : vector<16x1xi32>
    %c4_i32 = arith.constant 4 : i32
    %6 = vector.broadcast %c4_i32 : i32 to vector<16x1xi32>
    %7 = arith.cmpi slt, %5, %6 : vector<16x1xi32>
    %c15_i32 = arith.constant 15 : i32
    %8 = vector.broadcast %c15_i32 : i32 to vector<16x1xi32>
    %9 = arith.cmpi eq, %5, %8 : vector<16x1xi32>
    %10 = arith.ori %7, %9 : vector<16x1xi1>
    %c7_i32 = arith.constant 7 : i32
    %11 = vector.broadcast %c7_i32 : i32 to vector<16x1xi32>
    %12 = arith.cmpi eq, %5, %11 : vector<16x1xi32>
    %13 = arith.ori %10, %12 : vector<16x1xi1>
    %c11_i32 = arith.constant 11 : i32
    %14 = vector.broadcast %c11_i32 : i32 to vector<16x1xi32>
    %15 = arith.cmpi eq, %5, %14 : vector<16x1xi32>
    %16 = arith.ori %13, %15 : vector<16x1xi1>
    %17 = arith.extui %16 : vector<16x1xi1> to vector<16x1xi32>
    %18 = arith.sitofp %17 : vector<16x1xi32> to vector<16x1xf32>
    %c10 = arith.constant 10 : index
    %c0_5 = arith.constant 0 : index
    %19 = vector.load %arg1[%c10, %c0_5] : memref<23x128xf32, #tpu.memory_space<vmem>>, vector<1x48xf32>
    %20 = vector.broadcast %18 : vector<16x1xf32> to vector<16x48xf32>
    %21 = vector.broadcast %19 : vector<1x48xf32> to vector<16x48xf32>
    %22 = arith.mulf %20, %21 : vector<16x48xf32>
    %c0_6 = arith.constant 0 : index
    %c0_7 = arith.constant 0 : index
    %23 = vector.load %arg1[%c0_6, %c0_7] : memref<23x128xf32, #tpu.memory_space<vmem>>, vector<1x48xf32>
    %24 = vector.broadcast %23 : vector<1x48xf32> to vector<16x48xf32>
    %25 = arith.addf %22, %24 : vector<16x48xf32>
    %26 = tpu.concatenate %25, %25 in 0 : vector<16x48xf32>, vector<16x48xf32> -> vector<32x48xf32>
    %c0_8 = arith.constant 0 : index
    %c0_9 = arith.constant 0 : index
    %27 = vector.load %arg3[%c0_8, %c0_9] : memref<488x64xf32, #tpu.memory_space<vmem>>, vector<20x48xf32>
    %cst = arith.constant dense<0.000000e+00> : vector<32x48xf32>
    %28 = tpu.matmul %4, %27, %cst {dimension_numbers = #tpu.dot_dimension_numbers<[1], [0], [0], [1], [0, 0, 1, 1], [], []>} : vector<32x20xf32>, vector<20x48xf32>, vector<32x48xf32> -> vector<32x48xf32>
    %29 = arith.addf %28, %26 : vector<32x48xf32>
    %cst_10 = arith.constant 0.000000e+00 : f32
    %30 = vector.broadcast %cst_10 : f32 to vector<32x48xf32>
    %31 = arith.cmpf oge, %29, %30 : vector<32x48xf32>
    %32 = vector.broadcast %0 : vector<1x1xf32> to vector<32x48xf32>
    %33 = arith.mulf %32, %29 : vector<32x48xf32>
    %34 = arith.select %31, %29, %33 : vector<32x48xi1>, vector<32x48xf32>
    %c24 = arith.constant 24 : index
    %c0_11 = arith.constant 0 : index
    %35 = vector.load %arg3[%c24, %c0_11] : memref<488x64xf32, #tpu.memory_space<vmem>>, vector<48x32xf32>
    %cst_12 = arith.constant dense<0.000000e+00> : vector<32x32xf32>
    %36 = tpu.matmul %34, %35, %cst_12 {dimension_numbers = #tpu.dot_dimension_numbers<[1], [0], [0], [1], [0, 0, 1, 1], [], []>} : vector<32x48xf32>, vector<48x32xf32>, vector<32x32xf32> -> vector<32x32xf32>
    %c1_13 = arith.constant 1 : index
    %c0_14 = arith.constant 0 : index
    %37 = vector.load %arg1[%c1_13, %c0_14] : memref<23x128xf32, #tpu.memory_space<vmem>>, vector<1x32xf32>
    %38 = vector.broadcast %37 : vector<1x32xf32> to vector<32x32xf32>
    %39 = arith.addf %36, %38 : vector<32x32xf32>
    %cst_15 = arith.constant 0.000000e+00 : f32
    %40 = vector.broadcast %cst_15 : f32 to vector<32x32xf32>
    %41 = arith.cmpf oge, %39, %40 : vector<32x32xf32>
    %42 = vector.broadcast %1 : vector<1x1xf32> to vector<32x32xf32>
    %43 = arith.mulf %42, %39 : vector<32x32xf32>
    %44 = arith.select %41, %39, %43 : vector<32x32xi1>, vector<32x32xf32>
    %45 = tpu.iota {dimensions = array<i32: 0>} : vector<31x1xi32>
    %46 = arith.sitofp %45 : vector<31x1xi32> to vector<31x1xf32>
    %cst_16 = arith.constant 1.500000e+01 : f32
    %47 = vector.broadcast %cst_16 : f32 to vector<31x1xf32>
    %48 = arith.subf %46, %47 : vector<31x1xf32>
    %c2_17 = arith.constant 2 : index
    %c0_18 = arith.constant 0 : index
    %49 = vector.load %arg1[%c2_17, %c0_18] : memref<23x128xf32, #tpu.memory_space<vmem>>, vector<1x16xf32>
    %50 = vector.broadcast %48 : vector<31x1xf32> to vector<31x16xf32>
    %51 = vector.broadcast %49 : vector<1x16xf32> to vector<31x16xf32>
    %52 = arith.mulf %50, %51 : vector<31x16xf32>
    %c3_19 = arith.constant 3 : index
    %c0_20 = arith.constant 0 : index
    %53 = vector.load %arg1[%c3_19, %c0_20] : memref<23x128xf32, #tpu.memory_space<vmem>>, vector<1x16xf32>
    %54 = vector.broadcast %53 : vector<1x16xf32> to vector<31x16xf32>
    %55 = arith.addf %52, %54 : vector<31x16xf32>
    %cst_21 = arith.constant 0.000000e+00 : f32
    %56 = vector.broadcast %cst_21 : f32 to vector<31x16xf32>
    %57 = arith.cmpf oge, %55, %56 : vector<31x16xf32>
    %58 = vector.broadcast %2 : vector<1x1xf32> to vector<31x16xf32>
    %59 = arith.mulf %58, %55 : vector<31x16xf32>
    %60 = arith.select %57, %55, %59 : vector<31x16xi1>, vector<31x16xf32>
    %c72 = arith.constant 72 : index
    %c0_22 = arith.constant 0 : index
    %61 = vector.load %arg3[%c72, %c0_22] : memref<488x64xf32, #tpu.memory_space<vmem>>, vector<16x16xf32>
    %cst_23 = arith.constant dense<0.000000e+00> : vector<31x16xf32>
    %62 = tpu.matmul %60, %61, %cst_23 {dimension_numbers = #tpu.dot_dimension_numbers<[1], [0], [0], [1], [0, 0, 1, 1], [], []>} : vector<31x16xf32>, vector<16x16xf32>, vector<31x16xf32> -> vector<31x16xf32>
    %c4 = arith.constant 4 : index
    %c0_24 = arith.constant 0 : index
    %63 = vector.load %arg1[%c4, %c0_24] : memref<23x128xf32, #tpu.memory_space<vmem>>, vector<1x16xf32>
    %64 = vector.broadcast %63 : vector<1x16xf32> to vector<31x16xf32>
    %65 = arith.addf %62, %64 : vector<31x16xf32>
    %66 = tpu.iota {dimensions = array<i32: 0>} : vector<16x1xi32>
    %c15_i32_25 = arith.constant 15 : i32
    %67 = vector.broadcast %c15_i32_25 : i32 to vector<16x1xi32>
    %68 = arith.subi %67, %66 : vector<16x1xi32>
    %cst_26 = arith.constant 0.000000e+00 : f32
    %69 = vector.broadcast %cst_26 : f32 to vector<16x4xf32>
    %c11 = arith.constant 11 : index
    %c0_27 = arith.constant 0 : index
    %70 = vector.load %arg1[%c11, %c0_27] : memref<23x128xf32, #tpu.memory_space<vmem>>, vector<1x32xf32>
    %c12 = arith.constant 12 : index
    %c0_28 = arith.constant 0 : index
    %71 = vector.load %arg1[%c12, %c0_28] : memref<23x128xf32, #tpu.memory_space<vmem>>, vector<1x32xf32>
    %cst_29 = arith.constant dense<0.000000e+00> : vector<32xf32>
    %72 = vector.multi_reduction <add>, %44, %cst_29 [1] : vector<32x32xf32> to vector<32xf32>
    %73 = vector.shape_cast %72 : vector<32xf32> to vector<32x1xf32>
    %cst_30 = arith.constant 3.200000e+01 : f32
    %74 = vector.broadcast %cst_30 : f32 to vector<32x1xf32>
    %75 = arith.divf %73, %74 : vector<32x1xf32>
    %76 = vector.broadcast %75 : vector<32x1xf32> to vector<32x32xf32>
    %77 = arith.subf %44, %76 : vector<32x32xf32>
    %78 = arith.mulf %77, %77 : vector<32x32xf32>
    %cst_31 = arith.constant dense<0.000000e+00> : vector<32xf32>
    %79 = vector.multi_reduction <add>, %78, %cst_31 [1] : vector<32x32xf32> to vector<32xf32>
    %80 = vector.shape_cast %79 : vector<32xf32> to vector<32x1xf32>
    %cst_32 = arith.constant 3.200000e+01 : f32
    %81 = vector.broadcast %cst_32 : f32 to vector<32x1xf32>
    %82 = arith.divf %80, %81 : vector<32x1xf32>
    %83 = vector.broadcast %75 : vector<32x1xf32> to vector<32x32xf32>
    %84 = arith.subf %44, %83 : vector<32x32xf32>
    %cst_33 = arith.constant 9.99999974E-6 : f32
    %85 = vector.broadcast %cst_33 : f32 to vector<32x1xf32>
    %86 = arith.addf %82, %85 : vector<32x1xf32>
    %87 = math.rsqrt %86 : vector<32x1xf32>
    %88 = vector.broadcast %87 : vector<32x1xf32> to vector<32x32xf32>
    %89 = arith.mulf %84, %88 : vector<32x32xf32>
    %90 = vector.broadcast %70 : vector<1x32xf32> to vector<32x32xf32>
    %91 = arith.mulf %89, %90 : vector<32x32xf32>
    %92 = vector.broadcast %71 : vector<1x32xf32> to vector<32x32xf32>
    %93 = arith.addf %91, %92 : vector<32x32xf32>
    %c0_34 = arith.constant 0 : index
    %c0_35 = arith.constant 0 : index
    %94 = vector.load %arg2[%c0_34, %c0_35] : memref<64x192xf32, #tpu.memory_space<vmem>>, vector<32x192xf32>
    %cst_36 = arith.constant dense<0.000000e+00> : vector<32x192xf32>
    %95 = tpu.matmul %93, %94, %cst_36 {dimension_numbers = #tpu.dot_dimension_numbers<[1], [0], [0], [1], [0, 0, 1, 1], [], []>} : vector<32x32xf32>, vector<32x192xf32>, vector<32x192xf32> -> vector<32x192xf32>
    %96 = vector.extract_strided_slice %95 {offsets = [0, 0], sizes = [16, 16], strides = [1, 1]} : vector<32x192xf32> to vector<16x16xf32>
    %97 = vector.extract_strided_slice %95 {offsets = [0, 64], sizes = [16, 16], strides = [1, 1]} : vector<32x192xf32> to vector<16x16xf32>
    %98 = tpu.concatenate %97, %65 in 0 : vector<16x16xf32>, vector<31x16xf32> -> vector<47x16xf32>
    %cst_37 = arith.constant dense<0.000000e+00> : vector<16x47xf32>
    %99 = tpu.matmul %96, %98, %cst_37 {dimension_numbers = #tpu.dot_dimension_numbers<[1], [1], [0], [0], [0, 0, 1, 0], [], []>} : vector<16x16xf32>, vector<47x16xf32>, vector<16x47xf32> -> vector<16x47xf32>
    %100 = vector.extract_strided_slice %95 {offsets = [0, 16], sizes = [16, 16], strides = [1, 1]} : vector<32x192xf32> to vector<16x16xf32>
    %101 = vector.extract_strided_slice %95 {offsets = [0, 80], sizes = [16, 16], strides = [1, 1]} : vector<32x192xf32> to vector<16x16xf32>
    %102 = tpu.concatenate %101, %65 in 0 : vector<16x16xf32>, vector<31x16xf32> -> vector<47x16xf32>
    %cst_38 = arith.constant dense<0.000000e+00> : vector<16x47xf32>
    %103 = tpu.matmul %100, %102, %cst_38 {dimension_numbers = #tpu.dot_dimension_numbers<[1], [1], [0], [0], [0, 0, 1, 0], [], []>} : vector<16x16xf32>, vector<47x16xf32>, vector<16x47xf32> -> vector<16x47xf32>
    %104 = vector.extract_strided_slice %95 {offsets = [0, 32], sizes = [16, 16], strides = [1, 1]} : vector<32x192xf32> to vector<16x16xf32>
    %105 = vector.extract_strided_slice %95 {offsets = [0, 96], sizes = [16, 16], strides = [1, 1]} : vector<32x192xf32> to vector<16x16xf32>
    %106 = tpu.concatenate %105, %65 in 0 : vector<16x16xf32>, vector<31x16xf32> -> vector<47x16xf32>
    %cst_39 = arith.constant dense<0.000000e+00> : vector<16x47xf32>
    %107 = tpu.matmul %104, %106, %cst_39 {dimension_numbers = #tpu.dot_dimension_numbers<[1], [1], [0], [0], [0, 0, 1, 0], [], []>} : vector<16x16xf32>, vector<47x16xf32>, vector<16x47xf32> -> vector<16x47xf32>
    %108 = vector.extract_strided_slice %95 {offsets = [0, 48], sizes = [16, 16], strides = [1, 1]} : vector<32x192xf32> to vector<16x16xf32>
    %109 = vector.extract_strided_slice %95 {offsets = [0, 112], sizes = [16, 16], strides = [1, 1]} : vector<32x192xf32> to vector<16x16xf32>
    %110 = tpu.concatenate %109, %65 in 0 : vector<16x16xf32>, vector<31x16xf32> -> vector<47x16xf32>
    %cst_40 = arith.constant dense<0.000000e+00> : vector<16x47xf32>
    %111 = tpu.matmul %108, %110, %cst_40 {dimension_numbers = #tpu.dot_dimension_numbers<[1], [1], [0], [0], [0, 0, 1, 0], [], []>} : vector<16x16xf32>, vector<47x16xf32>, vector<16x47xf32> -> vector<16x47xf32>
    %112 = vector.extract_strided_slice %99 {offsets = [0, 16], sizes = [16, 31], strides = [1, 1]} : vector<16x47xf32> to vector<16x31xf32>
    %113 = vector.extract_strided_slice %103 {offsets = [0, 16], sizes = [16, 31], strides = [1, 1]} : vector<16x47xf32> to vector<16x31xf32>
    %114 = vector.extract_strided_slice %107 {offsets = [0, 16], sizes = [16, 31], strides = [1, 1]} : vector<16x47xf32> to vector<16x31xf32>
    %115 = vector.extract_strided_slice %111 {offsets = [0, 16], sizes = [16, 31], strides = [1, 1]} : vector<16x47xf32> to vector<16x31xf32>
    %116 = tpu.concatenate %112, %113, %114, %115, %69 in 1 : vector<16x31xf32>, vector<16x31xf32>, vector<16x31xf32>, vector<16x31xf32>, vector<16x4xf32> -> vector<16x128xf32>
    %c127_i32 = arith.constant 127 : i32
    %117 = tpu.dynamic_rotate %116 by %c127_i32 dim 1 : vector<16x128xf32>, i32 -> vector<16x128xf32>
    %c1_i32 = arith.constant 1 : i32
    %118 = vector.broadcast %c1_i32 : i32 to vector<16x1xi32>
    %119 = arith.andi %68, %118 : vector<16x1xi32>
    %c0_i32 = arith.constant 0 : i32
    %120 = vector.broadcast %c0_i32 : i32 to vector<16x1xi32>
    %121 = arith.cmpi ne, %119, %120 : vector<16x1xi32>
    %122 = vector.shape_cast %121 : vector<16x1xi1> to vector<16x1xi1>
    %123 = vector.broadcast %122 : vector<16x1xi1> to vector<16x128xi1>
    %124 = arith.select %123, %117, %116 : vector<16x128xi1>, vector<16x128xf32>
    %c126_i32 = arith.constant 126 : i32
    %125 = tpu.dynamic_rotate %124 by %c126_i32 dim 1 : vector<16x128xf32>, i32 -> vector<16x128xf32>
    %c2_i32 = arith.constant 2 : i32
    %126 = vector.broadcast %c2_i32 : i32 to vector<16x1xi32>
    %127 = arith.andi %68, %126 : vector<16x1xi32>
    %c0_i32_41 = arith.constant 0 : i32
    %128 = vector.broadcast %c0_i32_41 : i32 to vector<16x1xi32>
    %129 = arith.cmpi ne, %127, %128 : vector<16x1xi32>
    %130 = vector.shape_cast %129 : vector<16x1xi1> to vector<16x1xi1>
    %131 = vector.broadcast %130 : vector<16x1xi1> to vector<16x128xi1>
    %132 = arith.select %131, %125, %124 : vector<16x128xi1>, vector<16x128xf32>
    %c124_i32 = arith.constant 124 : i32
    %133 = tpu.dynamic_rotate %132 by %c124_i32 dim 1 : vector<16x128xf32>, i32 -> vector<16x128xf32>
    %c4_i32_42 = arith.constant 4 : i32
    %134 = vector.broadcast %c4_i32_42 : i32 to vector<16x1xi32>
    %135 = arith.andi %68, %134 : vector<16x1xi32>
    %c0_i32_43 = arith.constant 0 : i32
    %136 = vector.broadcast %c0_i32_43 : i32 to vector<16x1xi32>
    %137 = arith.cmpi ne, %135, %136 : vector<16x1xi32>
    %138 = vector.shape_cast %137 : vector<16x1xi1> to vector<16x1xi1>
    %139 = vector.broadcast %138 : vector<16x1xi1> to vector<16x128xi1>
    %140 = arith.select %139, %133, %132 : vector<16x128xi1>, vector<16x128xf32>
    %c120_i32 = arith.constant 120 : i32
    %141 = tpu.dynamic_rotate %140 by %c120_i32 dim 1 : vector<16x128xf32>, i32 -> vector<16x128xf32>
    %c8_i32 = arith.constant 8 : i32
    %142 = vector.broadcast %c8_i32 : i32 to vector<16x1xi32>
    %143 = arith.andi %68, %142 : vector<16x1xi32>
    %c0_i32_44 = arith.constant 0 : i32
    %144 = vector.broadcast %c0_i32_44 : i32 to vector<16x1xi32>
    %145 = arith.cmpi ne, %143, %144 : vector<16x1xi32>
    %146 = vector.shape_cast %145 : vector<16x1xi1> to vector<16x1xi1>
    %147 = vector.broadcast %146 : vector<16x1xi1> to vector<16x128xi1>
    %148 = arith.select %147, %141, %140 : vector<16x128xi1>, vector<16x128xf32>
    %149 = vector.extract_strided_slice %99 {offsets = [0, 0], sizes = [16, 16], strides = [1, 1]} : vector<16x47xf32> to vector<16x16xf32>
    %150 = vector.extract_strided_slice %148 {offsets = [0, 0], sizes = [16, 16], strides = [1, 1]} : vector<16x128xf32> to vector<16x16xf32>
    %151 = arith.addf %149, %150 : vector<16x16xf32>
    %cst_45 = arith.constant 2.500000e-01 : f32
    %152 = vector.broadcast %cst_45 : f32 to vector<16x16xf32>
    %153 = arith.mulf %151, %152 : vector<16x16xf32>
    %cst_46 = arith.constant dense<0xFF800000> : vector<16xf32>
    %154 = vector.multi_reduction <maximumf>, %153, %cst_46 [1] : vector<16x16xf32> to vector<16xf32>
    %155 = vector.shape_cast %154 : vector<16xf32> to vector<16x1xf32>
    %156 = vector.broadcast %155 : vector<16x1xf32> to vector<16x16xf32>
    %157 = arith.subf %153, %156 : vector<16x16xf32>
    %158 = math.exp %157 : vector<16x16xf32>
    %cst_47 = arith.constant dense<0.000000e+00> : vector<16xf32>
    %159 = vector.multi_reduction <add>, %158, %cst_47 [1] : vector<16x16xf32> to vector<16xf32>
    %160 = vector.shape_cast %159 : vector<16xf32> to vector<16x1xf32>
    %161 = tpu.reciprocal %160 {approx = true} : vector<16x1xf32> -> vector<16x1xf32>
    %162 = vector.broadcast %161 : vector<16x1xf32> to vector<16x16xf32>
    %163 = arith.mulf %158, %162 : vector<16x16xf32>
    %164 = vector.extract_strided_slice %95 {offsets = [0, 128], sizes = [16, 16], strides = [1, 1]} : vector<32x192xf32> to vector<16x16xf32>
    %cst_48 = arith.constant dense<0.000000e+00> : vector<16x16xf32>
    %165 = tpu.matmul %163, %164, %cst_48 {dimension_numbers = #tpu.dot_dimension_numbers<[1], [0], [0], [1], [0, 0, 1, 1], [], []>} : vector<16x16xf32>, vector<16x16xf32>, vector<16x16xf32> -> vector<16x16xf32>
    %166 = vector.extract_strided_slice %103 {offsets = [0, 0], sizes = [16, 16], strides = [1, 1]} : vector<16x47xf32> to vector<16x16xf32>
    %167 = vector.extract_strided_slice %148 {offsets = [0, 31], sizes = [16, 16], strides = [1, 1]} : vector<16x128xf32> to vector<16x16xf32>
    %168 = arith.addf %166, %167 : vector<16x16xf32>
    %cst_49 = arith.constant 2.500000e-01 : f32
    %169 = vector.broadcast %cst_49 : f32 to vector<16x16xf32>
    %170 = arith.mulf %168, %169 : vector<16x16xf32>
    %cst_50 = arith.constant dense<0xFF800000> : vector<16xf32>
    %171 = vector.multi_reduction <maximumf>, %170, %cst_50 [1] : vector<16x16xf32> to vector<16xf32>
    %172 = vector.shape_cast %171 : vector<16xf32> to vector<16x1xf32>
    %173 = vector.broadcast %172 : vector<16x1xf32> to vector<16x16xf32>
    %174 = arith.subf %170, %173 : vector<16x16xf32>
    %175 = math.exp %174 : vector<16x16xf32>
    %cst_51 = arith.constant dense<0.000000e+00> : vector<16xf32>
    %176 = vector.multi_reduction <add>, %175, %cst_51 [1] : vector<16x16xf32> to vector<16xf32>
    %177 = vector.shape_cast %176 : vector<16xf32> to vector<16x1xf32>
    %178 = tpu.reciprocal %177 {approx = true} : vector<16x1xf32> -> vector<16x1xf32>
    %179 = vector.broadcast %178 : vector<16x1xf32> to vector<16x16xf32>
    %180 = arith.mulf %175, %179 : vector<16x16xf32>
    %181 = vector.extract_strided_slice %95 {offsets = [0, 144], sizes = [16, 16], strides = [1, 1]} : vector<32x192xf32> to vector<16x16xf32>
    %cst_52 = arith.constant dense<0.000000e+00> : vector<16x16xf32>
    %182 = tpu.matmul %180, %181, %cst_52 {dimension_numbers = #tpu.dot_dimension_numbers<[1], [0], [0], [1], [0, 0, 1, 1], [], []>} : vector<16x16xf32>, vector<16x16xf32>, vector<16x16xf32> -> vector<16x16xf32>
    %183 = vector.extract_strided_slice %107 {offsets = [0, 0], sizes = [16, 16], strides = [1, 1]} : vector<16x47xf32> to vector<16x16xf32>
    %184 = vector.extract_strided_slice %148 {offsets = [0, 62], sizes = [16, 16], strides = [1, 1]} : vector<16x128xf32> to vector<16x16xf32>
    %185 = arith.addf %183, %184 : vector<16x16xf32>
    %cst_53 = arith.constant 2.500000e-01 : f32
    %186 = vector.broadcast %cst_53 : f32 to vector<16x16xf32>
    %187 = arith.mulf %185, %186 : vector<16x16xf32>
    %cst_54 = arith.constant dense<0xFF800000> : vector<16xf32>
    %188 = vector.multi_reduction <maximumf>, %187, %cst_54 [1] : vector<16x16xf32> to vector<16xf32>
    %189 = vector.shape_cast %188 : vector<16xf32> to vector<16x1xf32>
    %190 = vector.broadcast %189 : vector<16x1xf32> to vector<16x16xf32>
    %191 = arith.subf %187, %190 : vector<16x16xf32>
    %192 = math.exp %191 : vector<16x16xf32>
    %cst_55 = arith.constant dense<0.000000e+00> : vector<16xf32>
    %193 = vector.multi_reduction <add>, %192, %cst_55 [1] : vector<16x16xf32> to vector<16xf32>
    %194 = vector.shape_cast %193 : vector<16xf32> to vector<16x1xf32>
    %195 = tpu.reciprocal %194 {approx = true} : vector<16x1xf32> -> vector<16x1xf32>
    %196 = vector.broadcast %195 : vector<16x1xf32> to vector<16x16xf32>
    %197 = arith.mulf %192, %196 : vector<16x16xf32>
    %198 = vector.extract_strided_slice %95 {offsets = [0, 160], sizes = [16, 16], strides = [1, 1]} : vector<32x192xf32> to vector<16x16xf32>
    %cst_56 = arith.constant dense<0.000000e+00> : vector<16x16xf32>
    %199 = tpu.matmul %197, %198, %cst_56 {dimension_numbers = #tpu.dot_dimension_numbers<[1], [0], [0], [1], [0, 0, 1, 1], [], []>} : vector<16x16xf32>, vector<16x16xf32>, vector<16x16xf32> -> vector<16x16xf32>
    %200 = vector.extract_strided_slice %111 {offsets = [0, 0], sizes = [16, 16], strides = [1, 1]} : vector<16x47xf32> to vector<16x16xf32>
    %201 = vector.extract_strided_slice %148 {offsets = [0, 93], sizes = [16, 16], strides = [1, 1]} : vector<16x128xf32> to vector<16x16xf32>
    %202 = arith.addf %200, %201 : vector<16x16xf32>
    %cst_57 = arith.constant 2.500000e-01 : f32
    %203 = vector.broadcast %cst_57 : f32 to vector<16x16xf32>
    %204 = arith.mulf %202, %203 : vector<16x16xf32>
    %cst_58 = arith.constant dense<0xFF800000> : vector<16xf32>
    %205 = vector.multi_reduction <maximumf>, %204, %cst_58 [1] : vector<16x16xf32> to vector<16xf32>
    %206 = vector.shape_cast %205 : vector<16xf32> to vector<16x1xf32>
    %207 = vector.broadcast %206 : vector<16x1xf32> to vector<16x16xf32>
    %208 = arith.subf %204, %207 : vector<16x16xf32>
    %209 = math.exp %208 : vector<16x16xf32>
    %cst_59 = arith.constant dense<0.000000e+00> : vector<16xf32>
    %210 = vector.multi_reduction <add>, %209, %cst_59 [1] : vector<16x16xf32> to vector<16xf32>
    %211 = vector.shape_cast %210 : vector<16xf32> to vector<16x1xf32>
    %212 = tpu.reciprocal %211 {approx = true} : vector<16x1xf32> -> vector<16x1xf32>
    %213 = vector.broadcast %212 : vector<16x1xf32> to vector<16x16xf32>
    %214 = arith.mulf %209, %213 : vector<16x16xf32>
    %215 = vector.extract_strided_slice %95 {offsets = [0, 176], sizes = [16, 16], strides = [1, 1]} : vector<32x192xf32> to vector<16x16xf32>
    %cst_60 = arith.constant dense<0.000000e+00> : vector<16x16xf32>
    %216 = tpu.matmul %214, %215, %cst_60 {dimension_numbers = #tpu.dot_dimension_numbers<[1], [0], [0], [1], [0, 0, 1, 1], [], []>} : vector<16x16xf32>, vector<16x16xf32>, vector<16x16xf32> -> vector<16x16xf32>
    %217 = tpu.concatenate %165, %182, %199, %216 in 1 : vector<16x16xf32>, vector<16x16xf32>, vector<16x16xf32>, vector<16x16xf32> -> vector<16x64xf32>
    %218 = vector.extract_strided_slice %95 {offsets = [16, 0], sizes = [16, 16], strides = [1, 1]} : vector<32x192xf32> to vector<16x16xf32>
    %219 = vector.extract_strided_slice %95 {offsets = [16, 64], sizes = [16, 16], strides = [1, 1]} : vector<32x192xf32> to vector<16x16xf32>
    %220 = tpu.concatenate %219, %65 in 0 : vector<16x16xf32>, vector<31x16xf32> -> vector<47x16xf32>
    %cst_61 = arith.constant dense<0.000000e+00> : vector<16x47xf32>
    %221 = tpu.matmul %218, %220, %cst_61 {dimension_numbers = #tpu.dot_dimension_numbers<[1], [1], [0], [0], [0, 0, 1, 0], [], []>} : vector<16x16xf32>, vector<47x16xf32>, vector<16x47xf32> -> vector<16x47xf32>
    %222 = vector.extract_strided_slice %95 {offsets = [16, 16], sizes = [16, 16], strides = [1, 1]} : vector<32x192xf32> to vector<16x16xf32>
    %223 = vector.extract_strided_slice %95 {offsets = [16, 80], sizes = [16, 16], strides = [1, 1]} : vector<32x192xf32> to vector<16x16xf32>
    %224 = tpu.concatenate %223, %65 in 0 : vector<16x16xf32>, vector<31x16xf32> -> vector<47x16xf32>
    %cst_62 = arith.constant dense<0.000000e+00> : vector<16x47xf32>
    %225 = tpu.matmul %222, %224, %cst_62 {dimension_numbers = #tpu.dot_dimension_numbers<[1], [1], [0], [0], [0, 0, 1, 0], [], []>} : vector<16x16xf32>, vector<47x16xf32>, vector<16x47xf32> -> vector<16x47xf32>
    %226 = vector.extract_strided_slice %95 {offsets = [16, 32], sizes = [16, 16], strides = [1, 1]} : vector<32x192xf32> to vector<16x16xf32>
    %227 = vector.extract_strided_slice %95 {offsets = [16, 96], sizes = [16, 16], strides = [1, 1]} : vector<32x192xf32> to vector<16x16xf32>
    %228 = tpu.concatenate %227, %65 in 0 : vector<16x16xf32>, vector<31x16xf32> -> vector<47x16xf32>
    %cst_63 = arith.constant dense<0.000000e+00> : vector<16x47xf32>
    %229 = tpu.matmul %226, %228, %cst_63 {dimension_numbers = #tpu.dot_dimension_numbers<[1], [1], [0], [0], [0, 0, 1, 0], [], []>} : vector<16x16xf32>, vector<47x16xf32>, vector<16x47xf32> -> vector<16x47xf32>
    %230 = vector.extract_strided_slice %95 {offsets = [16, 48], sizes = [16, 16], strides = [1, 1]} : vector<32x192xf32> to vector<16x16xf32>
    %231 = vector.extract_strided_slice %95 {offsets = [16, 112], sizes = [16, 16], strides = [1, 1]} : vector<32x192xf32> to vector<16x16xf32>
    %232 = tpu.concatenate %231, %65 in 0 : vector<16x16xf32>, vector<31x16xf32> -> vector<47x16xf32>
    %cst_64 = arith.constant dense<0.000000e+00> : vector<16x47xf32>
    %233 = tpu.matmul %230, %232, %cst_64 {dimension_numbers = #tpu.dot_dimension_numbers<[1], [1], [0], [0], [0, 0, 1, 0], [], []>} : vector<16x16xf32>, vector<47x16xf32>, vector<16x47xf32> -> vector<16x47xf32>
    %234 = vector.extract_strided_slice %221 {offsets = [0, 16], sizes = [16, 31], strides = [1, 1]} : vector<16x47xf32> to vector<16x31xf32>
    %235 = vector.extract_strided_slice %225 {offsets = [0, 16], sizes = [16, 31], strides = [1, 1]} : vector<16x47xf32> to vector<16x31xf32>
    %236 = vector.extract_strided_slice %229 {offsets = [0, 16], sizes = [16, 31], strides = [1, 1]} : vector<16x47xf32> to vector<16x31xf32>
    %237 = vector.extract_strided_slice %233 {offsets = [0, 16], sizes = [16, 31], strides = [1, 1]} : vector<16x47xf32> to vector<16x31xf32>
    %238 = tpu.concatenate %234, %235, %236, %237, %69 in 1 : vector<16x31xf32>, vector<16x31xf32>, vector<16x31xf32>, vector<16x31xf32>, vector<16x4xf32> -> vector<16x128xf32>
    %c127_i32_65 = arith.constant 127 : i32
    %239 = tpu.dynamic_rotate %238 by %c127_i32_65 dim 1 : vector<16x128xf32>, i32 -> vector<16x128xf32>
    %c1_i32_66 = arith.constant 1 : i32
    %240 = vector.broadcast %c1_i32_66 : i32 to vector<16x1xi32>
    %241 = arith.andi %68, %240 : vector<16x1xi32>
    %c0_i32_67 = arith.constant 0 : i32
    %242 = vector.broadcast %c0_i32_67 : i32 to vector<16x1xi32>
    %243 = arith.cmpi ne, %241, %242 : vector<16x1xi32>
    %244 = vector.shape_cast %243 : vector<16x1xi1> to vector<16x1xi1>
    %245 = vector.broadcast %244 : vector<16x1xi1> to vector<16x128xi1>
    %246 = arith.select %245, %239, %238 : vector<16x128xi1>, vector<16x128xf32>
    %c126_i32_68 = arith.constant 126 : i32
    %247 = tpu.dynamic_rotate %246 by %c126_i32_68 dim 1 : vector<16x128xf32>, i32 -> vector<16x128xf32>
    %c2_i32_69 = arith.constant 2 : i32
    %248 = vector.broadcast %c2_i32_69 : i32 to vector<16x1xi32>
    %249 = arith.andi %68, %248 : vector<16x1xi32>
    %c0_i32_70 = arith.constant 0 : i32
    %250 = vector.broadcast %c0_i32_70 : i32 to vector<16x1xi32>
    %251 = arith.cmpi ne, %249, %250 : vector<16x1xi32>
    %252 = vector.shape_cast %251 : vector<16x1xi1> to vector<16x1xi1>
    %253 = vector.broadcast %252 : vector<16x1xi1> to vector<16x128xi1>
    %254 = arith.select %253, %247, %246 : vector<16x128xi1>, vector<16x128xf32>
    %c124_i32_71 = arith.constant 124 : i32
    %255 = tpu.dynamic_rotate %254 by %c124_i32_71 dim 1 : vector<16x128xf32>, i32 -> vector<16x128xf32>
    %c4_i32_72 = arith.constant 4 : i32
    %256 = vector.broadcast %c4_i32_72 : i32 to vector<16x1xi32>
    %257 = arith.andi %68, %256 : vector<16x1xi32>
    %c0_i32_73 = arith.constant 0 : i32
    %258 = vector.broadcast %c0_i32_73 : i32 to vector<16x1xi32>
    %259 = arith.cmpi ne, %257, %258 : vector<16x1xi32>
    %260 = vector.shape_cast %259 : vector<16x1xi1> to vector<16x1xi1>
    %261 = vector.broadcast %260 : vector<16x1xi1> to vector<16x128xi1>
    %262 = arith.select %261, %255, %254 : vector<16x128xi1>, vector<16x128xf32>
    %c120_i32_74 = arith.constant 120 : i32
    %263 = tpu.dynamic_rotate %262 by %c120_i32_74 dim 1 : vector<16x128xf32>, i32 -> vector<16x128xf32>
    %c8_i32_75 = arith.constant 8 : i32
    %264 = vector.broadcast %c8_i32_75 : i32 to vector<16x1xi32>
    %265 = arith.andi %68, %264 : vector<16x1xi32>
    %c0_i32_76 = arith.constant 0 : i32
    %266 = vector.broadcast %c0_i32_76 : i32 to vector<16x1xi32>
    %267 = arith.cmpi ne, %265, %266 : vector<16x1xi32>
    %268 = vector.shape_cast %267 : vector<16x1xi1> to vector<16x1xi1>
    %269 = vector.broadcast %268 : vector<16x1xi1> to vector<16x128xi1>
    %270 = arith.select %269, %263, %262 : vector<16x128xi1>, vector<16x128xf32>
    %271 = vector.extract_strided_slice %221 {offsets = [0, 0], sizes = [16, 16], strides = [1, 1]} : vector<16x47xf32> to vector<16x16xf32>
    %272 = vector.extract_strided_slice %270 {offsets = [0, 0], sizes = [16, 16], strides = [1, 1]} : vector<16x128xf32> to vector<16x16xf32>
    %273 = arith.addf %271, %272 : vector<16x16xf32>
    %cst_77 = arith.constant 2.500000e-01 : f32
    %274 = vector.broadcast %cst_77 : f32 to vector<16x16xf32>
    %275 = arith.mulf %273, %274 : vector<16x16xf32>
    %cst_78 = arith.constant dense<0xFF800000> : vector<16xf32>
    %276 = vector.multi_reduction <maximumf>, %275, %cst_78 [1] : vector<16x16xf32> to vector<16xf32>
    %277 = vector.shape_cast %276 : vector<16xf32> to vector<16x1xf32>
    %278 = vector.broadcast %277 : vector<16x1xf32> to vector<16x16xf32>
    %279 = arith.subf %275, %278 : vector<16x16xf32>
    %280 = math.exp %279 : vector<16x16xf32>
    %cst_79 = arith.constant dense<0.000000e+00> : vector<16xf32>
    %281 = vector.multi_reduction <add>, %280, %cst_79 [1] : vector<16x16xf32> to vector<16xf32>
    %282 = vector.shape_cast %281 : vector<16xf32> to vector<16x1xf32>
    %283 = tpu.reciprocal %282 {approx = true} : vector<16x1xf32> -> vector<16x1xf32>
    %284 = vector.broadcast %283 : vector<16x1xf32> to vector<16x16xf32>
    %285 = arith.mulf %280, %284 : vector<16x16xf32>
    %286 = vector.extract_strided_slice %95 {offsets = [16, 128], sizes = [16, 16], strides = [1, 1]} : vector<32x192xf32> to vector<16x16xf32>
    %cst_80 = arith.constant dense<0.000000e+00> : vector<16x16xf32>
    %287 = tpu.matmul %285, %286, %cst_80 {dimension_numbers = #tpu.dot_dimension_numbers<[1], [0], [0], [1], [0, 0, 1, 1], [], []>} : vector<16x16xf32>, vector<16x16xf32>, vector<16x16xf32> -> vector<16x16xf32>
    %288 = vector.extract_strided_slice %225 {offsets = [0, 0], sizes = [16, 16], strides = [1, 1]} : vector<16x47xf32> to vector<16x16xf32>
    %289 = vector.extract_strided_slice %270 {offsets = [0, 31], sizes = [16, 16], strides = [1, 1]} : vector<16x128xf32> to vector<16x16xf32>
    %290 = arith.addf %288, %289 : vector<16x16xf32>
    %cst_81 = arith.constant 2.500000e-01 : f32
    %291 = vector.broadcast %cst_81 : f32 to vector<16x16xf32>
    %292 = arith.mulf %290, %291 : vector<16x16xf32>
    %cst_82 = arith.constant dense<0xFF800000> : vector<16xf32>
    %293 = vector.multi_reduction <maximumf>, %292, %cst_82 [1] : vector<16x16xf32> to vector<16xf32>
    %294 = vector.shape_cast %293 : vector<16xf32> to vector<16x1xf32>
    %295 = vector.broadcast %294 : vector<16x1xf32> to vector<16x16xf32>
    %296 = arith.subf %292, %295 : vector<16x16xf32>
    %297 = math.exp %296 : vector<16x16xf32>
    %cst_83 = arith.constant dense<0.000000e+00> : vector<16xf32>
    %298 = vector.multi_reduction <add>, %297, %cst_83 [1] : vector<16x16xf32> to vector<16xf32>
    %299 = vector.shape_cast %298 : vector<16xf32> to vector<16x1xf32>
    %300 = tpu.reciprocal %299 {approx = true} : vector<16x1xf32> -> vector<16x1xf32>
    %301 = vector.broadcast %300 : vector<16x1xf32> to vector<16x16xf32>
    %302 = arith.mulf %297, %301 : vector<16x16xf32>
    %303 = vector.extract_strided_slice %95 {offsets = [16, 144], sizes = [16, 16], strides = [1, 1]} : vector<32x192xf32> to vector<16x16xf32>
    %cst_84 = arith.constant dense<0.000000e+00> : vector<16x16xf32>
    %304 = tpu.matmul %302, %303, %cst_84 {dimension_numbers = #tpu.dot_dimension_numbers<[1], [0], [0], [1], [0, 0, 1, 1], [], []>} : vector<16x16xf32>, vector<16x16xf32>, vector<16x16xf32> -> vector<16x16xf32>
    %305 = vector.extract_strided_slice %229 {offsets = [0, 0], sizes = [16, 16], strides = [1, 1]} : vector<16x47xf32> to vector<16x16xf32>
    %306 = vector.extract_strided_slice %270 {offsets = [0, 62], sizes = [16, 16], strides = [1, 1]} : vector<16x128xf32> to vector<16x16xf32>
    %307 = arith.addf %305, %306 : vector<16x16xf32>
    %cst_85 = arith.constant 2.500000e-01 : f32
    %308 = vector.broadcast %cst_85 : f32 to vector<16x16xf32>
    %309 = arith.mulf %307, %308 : vector<16x16xf32>
    %cst_86 = arith.constant dense<0xFF800000> : vector<16xf32>
    %310 = vector.multi_reduction <maximumf>, %309, %cst_86 [1] : vector<16x16xf32> to vector<16xf32>
    %311 = vector.shape_cast %310 : vector<16xf32> to vector<16x1xf32>
    %312 = vector.broadcast %311 : vector<16x1xf32> to vector<16x16xf32>
    %313 = arith.subf %309, %312 : vector<16x16xf32>
    %314 = math.exp %313 : vector<16x16xf32>
    %cst_87 = arith.constant dense<0.000000e+00> : vector<16xf32>
    %315 = vector.multi_reduction <add>, %314, %cst_87 [1] : vector<16x16xf32> to vector<16xf32>
    %316 = vector.shape_cast %315 : vector<16xf32> to vector<16x1xf32>
    %317 = tpu.reciprocal %316 {approx = true} : vector<16x1xf32> -> vector<16x1xf32>
    %318 = vector.broadcast %317 : vector<16x1xf32> to vector<16x16xf32>
    %319 = arith.mulf %314, %318 : vector<16x16xf32>
    %320 = vector.extract_strided_slice %95 {offsets = [16, 160], sizes = [16, 16], strides = [1, 1]} : vector<32x192xf32> to vector<16x16xf32>
    %cst_88 = arith.constant dense<0.000000e+00> : vector<16x16xf32>
    %321 = tpu.matmul %319, %320, %cst_88 {dimension_numbers = #tpu.dot_dimension_numbers<[1], [0], [0], [1], [0, 0, 1, 1], [], []>} : vector<16x16xf32>, vector<16x16xf32>, vector<16x16xf32> -> vector<16x16xf32>
    %322 = vector.extract_strided_slice %233 {offsets = [0, 0], sizes = [16, 16], strides = [1, 1]} : vector<16x47xf32> to vector<16x16xf32>
    %323 = vector.extract_strided_slice %270 {offsets = [0, 93], sizes = [16, 16], strides = [1, 1]} : vector<16x128xf32> to vector<16x16xf32>
    %324 = arith.addf %322, %323 : vector<16x16xf32>
    %cst_89 = arith.constant 2.500000e-01 : f32
    %325 = vector.broadcast %cst_89 : f32 to vector<16x16xf32>
    %326 = arith.mulf %324, %325 : vector<16x16xf32>
    %cst_90 = arith.constant dense<0xFF800000> : vector<16xf32>
    %327 = vector.multi_reduction <maximumf>, %326, %cst_90 [1] : vector<16x16xf32> to vector<16xf32>
    %328 = vector.shape_cast %327 : vector<16xf32> to vector<16x1xf32>
    %329 = vector.broadcast %328 : vector<16x1xf32> to vector<16x16xf32>
    %330 = arith.subf %326, %329 : vector<16x16xf32>
    %331 = math.exp %330 : vector<16x16xf32>
    %cst_91 = arith.constant dense<0.000000e+00> : vector<16xf32>
    %332 = vector.multi_reduction <add>, %331, %cst_91 [1] : vector<16x16xf32> to vector<16xf32>
    %333 = vector.shape_cast %332 : vector<16xf32> to vector<16x1xf32>
    %334 = tpu.reciprocal %333 {approx = true} : vector<16x1xf32> -> vector<16x1xf32>
    %335 = vector.broadcast %334 : vector<16x1xf32> to vector<16x16xf32>
    %336 = arith.mulf %331, %335 : vector<16x16xf32>
    %337 = vector.extract_strided_slice %95 {offsets = [16, 176], sizes = [16, 16], strides = [1, 1]} : vector<32x192xf32> to vector<16x16xf32>
    %cst_92 = arith.constant dense<0.000000e+00> : vector<16x16xf32>
    %338 = tpu.matmul %336, %337, %cst_92 {dimension_numbers = #tpu.dot_dimension_numbers<[1], [0], [0], [1], [0, 0, 1, 1], [], []>} : vector<16x16xf32>, vector<16x16xf32>, vector<16x16xf32> -> vector<16x16xf32>
    %339 = tpu.concatenate %287, %304, %321, %338 in 1 : vector<16x16xf32>, vector<16x16xf32>, vector<16x16xf32>, vector<16x16xf32> -> vector<16x64xf32>
    %340 = tpu.concatenate %217, %339 in 0 : vector<16x64xf32>, vector<16x64xf32> -> vector<32x64xf32>
    %c168 = arith.constant 168 : index
    %c0_93 = arith.constant 0 : index
    %341 = vector.load %arg3[%c168, %c0_93] : memref<488x64xf32, #tpu.memory_space<vmem>>, vector<64x32xf32>
    %cst_94 = arith.constant dense<0.000000e+00> : vector<32x32xf32>
    %342 = tpu.matmul %340, %341, %cst_94 {dimension_numbers = #tpu.dot_dimension_numbers<[1], [0], [0], [1], [0, 0, 1, 1], [], []>} : vector<32x64xf32>, vector<64x32xf32>, vector<32x32xf32> -> vector<32x32xf32>
    %343 = arith.addf %44, %342 : vector<32x32xf32>
    %c13 = arith.constant 13 : index
    %c0_95 = arith.constant 0 : index
    %344 = vector.load %arg1[%c13, %c0_95] : memref<23x128xf32, #tpu.memory_space<vmem>>, vector<1x32xf32>
    %c14 = arith.constant 14 : index
    %c0_96 = arith.constant 0 : index
    %345 = vector.load %arg1[%c14, %c0_96] : memref<23x128xf32, #tpu.memory_space<vmem>>, vector<1x32xf32>
    %cst_97 = arith.constant dense<0.000000e+00> : vector<32xf32>
    %346 = vector.multi_reduction <add>, %343, %cst_97 [1] : vector<32x32xf32> to vector<32xf32>
    %347 = vector.shape_cast %346 : vector<32xf32> to vector<32x1xf32>
    %cst_98 = arith.constant 3.200000e+01 : f32
    %348 = vector.broadcast %cst_98 : f32 to vector<32x1xf32>
    %349 = arith.divf %347, %348 : vector<32x1xf32>
    %350 = vector.broadcast %349 : vector<32x1xf32> to vector<32x32xf32>
    %351 = arith.subf %343, %350 : vector<32x32xf32>
    %352 = arith.mulf %351, %351 : vector<32x32xf32>
    %cst_99 = arith.constant dense<0.000000e+00> : vector<32xf32>
    %353 = vector.multi_reduction <add>, %352, %cst_99 [1] : vector<32x32xf32> to vector<32xf32>
    %354 = vector.shape_cast %353 : vector<32xf32> to vector<32x1xf32>
    %cst_100 = arith.constant 3.200000e+01 : f32
    %355 = vector.broadcast %cst_100 : f32 to vector<32x1xf32>
    %356 = arith.divf %354, %355 : vector<32x1xf32>
    %357 = vector.broadcast %349 : vector<32x1xf32> to vector<32x32xf32>
    %358 = arith.subf %343, %357 : vector<32x32xf32>
    %cst_101 = arith.constant 9.99999974E-6 : f32
    %359 = vector.broadcast %cst_101 : f32 to vector<32x1xf32>
    %360 = arith.addf %356, %359 : vector<32x1xf32>
    %361 = math.rsqrt %360 : vector<32x1xf32>
    %362 = vector.broadcast %361 : vector<32x1xf32> to vector<32x32xf32>
    %363 = arith.mulf %358, %362 : vector<32x32xf32>
    %364 = vector.broadcast %344 : vector<1x32xf32> to vector<32x32xf32>
    %365 = arith.mulf %363, %364 : vector<32x32xf32>
    %366 = vector.broadcast %345 : vector<1x32xf32> to vector<32x32xf32>
    %367 = arith.addf %365, %366 : vector<32x32xf32>
    %c232 = arith.constant 232 : index
    %c0_102 = arith.constant 0 : index
    %368 = vector.load %arg3[%c232, %c0_102] : memref<488x64xf32, #tpu.memory_space<vmem>>, vector<32x64xf32>
    %cst_103 = arith.constant dense<0.000000e+00> : vector<32x64xf32>
    %369 = tpu.matmul %367, %368, %cst_103 {dimension_numbers = #tpu.dot_dimension_numbers<[1], [0], [0], [1], [0, 0, 1, 1], [], []>} : vector<32x32xf32>, vector<32x64xf32>, vector<32x64xf32> -> vector<32x64xf32>
    %c15 = arith.constant 15 : index
    %c0_104 = arith.constant 0 : index
    %370 = vector.load %arg1[%c15, %c0_104] : memref<23x128xf32, #tpu.memory_space<vmem>>, vector<1x64xf32>
    %371 = vector.broadcast %370 : vector<1x64xf32> to vector<32x64xf32>
    %372 = arith.addf %369, %371 : vector<32x64xf32>
    %cst_105 = arith.constant 0.000000e+00 : f32
    %373 = vector.broadcast %cst_105 : f32 to vector<32x64xf32>
    %374 = arith.maximumf %372, %373 : vector<32x64xf32>
    %c264 = arith.constant 264 : index
    %c0_106 = arith.constant 0 : index
    %375 = vector.load %arg3[%c264, %c0_106] : memref<488x64xf32, #tpu.memory_space<vmem>>, vector<64x32xf32>
    %cst_107 = arith.constant dense<0.000000e+00> : vector<32x32xf32>
    %376 = tpu.matmul %374, %375, %cst_107 {dimension_numbers = #tpu.dot_dimension_numbers<[1], [0], [0], [1], [0, 0, 1, 1], [], []>} : vector<32x64xf32>, vector<64x32xf32>, vector<32x32xf32> -> vector<32x32xf32>
    %377 = arith.addf %343, %376 : vector<32x32xf32>
    %c16 = arith.constant 16 : index
    %c0_108 = arith.constant 0 : index
    %378 = vector.load %arg1[%c16, %c0_108] : memref<23x128xf32, #tpu.memory_space<vmem>>, vector<1x32xf32>
    %379 = vector.broadcast %378 : vector<1x32xf32> to vector<32x32xf32>
    %380 = arith.addf %377, %379 : vector<32x32xf32>
    %c17 = arith.constant 17 : index
    %c0_109 = arith.constant 0 : index
    %381 = vector.load %arg1[%c17, %c0_109] : memref<23x128xf32, #tpu.memory_space<vmem>>, vector<1x32xf32>
    %c18 = arith.constant 18 : index
    %c0_110 = arith.constant 0 : index
    %382 = vector.load %arg1[%c18, %c0_110] : memref<23x128xf32, #tpu.memory_space<vmem>>, vector<1x32xf32>
    %cst_111 = arith.constant dense<0.000000e+00> : vector<32xf32>
    %383 = vector.multi_reduction <add>, %380, %cst_111 [1] : vector<32x32xf32> to vector<32xf32>
    %384 = vector.shape_cast %383 : vector<32xf32> to vector<32x1xf32>
    %cst_112 = arith.constant 3.200000e+01 : f32
    %385 = vector.broadcast %cst_112 : f32 to vector<32x1xf32>
    %386 = arith.divf %384, %385 : vector<32x1xf32>
    %387 = vector.broadcast %386 : vector<32x1xf32> to vector<32x32xf32>
    %388 = arith.subf %380, %387 : vector<32x32xf32>
    %389 = arith.mulf %388, %388 : vector<32x32xf32>
    %cst_113 = arith.constant dense<0.000000e+00> : vector<32xf32>
    %390 = vector.multi_reduction <add>, %389, %cst_113 [1] : vector<32x32xf32> to vector<32xf32>
    %391 = vector.shape_cast %390 : vector<32xf32> to vector<32x1xf32>
    %cst_114 = arith.constant 3.200000e+01 : f32
    %392 = vector.broadcast %cst_114 : f32 to vector<32x1xf32>
    %393 = arith.divf %391, %392 : vector<32x1xf32>
    %394 = vector.broadcast %386 : vector<32x1xf32> to vector<32x32xf32>
    %395 = arith.subf %380, %394 : vector<32x32xf32>
    %cst_115 = arith.constant 9.99999974E-6 : f32
    %396 = vector.broadcast %cst_115 : f32 to vector<32x1xf32>
    %397 = arith.addf %393, %396 : vector<32x1xf32>
    %398 = math.rsqrt %397 : vector<32x1xf32>
    %399 = vector.broadcast %398 : vector<32x1xf32> to vector<32x32xf32>
    %400 = arith.mulf %395, %399 : vector<32x32xf32>
    %401 = vector.broadcast %381 : vector<1x32xf32> to vector<32x32xf32>
    %402 = arith.mulf %400, %401 : vector<32x32xf32>
    %403 = vector.broadcast %382 : vector<1x32xf32> to vector<32x32xf32>
    %404 = arith.addf %402, %403 : vector<32x32xf32>
    %c32 = arith.constant 32 : index
    %c0_116 = arith.constant 0 : index
    %405 = vector.load %arg2[%c32, %c0_116] : memref<64x192xf32, #tpu.memory_space<vmem>>, vector<32x192xf32>
    %cst_117 = arith.constant dense<0.000000e+00> : vector<32x192xf32>
    %406 = tpu.matmul %404, %405, %cst_117 {dimension_numbers = #tpu.dot_dimension_numbers<[1], [0], [0], [1], [0, 0, 1, 1], [], []>} : vector<32x32xf32>, vector<32x192xf32>, vector<32x192xf32> -> vector<32x192xf32>
    %407 = vector.extract_strided_slice %406 {offsets = [0, 0], sizes = [16, 16], strides = [1, 1]} : vector<32x192xf32> to vector<16x16xf32>
    %408 = vector.extract_strided_slice %406 {offsets = [0, 64], sizes = [16, 16], strides = [1, 1]} : vector<32x192xf32> to vector<16x16xf32>
    %409 = tpu.concatenate %408, %65 in 0 : vector<16x16xf32>, vector<31x16xf32> -> vector<47x16xf32>
    %cst_118 = arith.constant dense<0.000000e+00> : vector<16x47xf32>
    %410 = tpu.matmul %407, %409, %cst_118 {dimension_numbers = #tpu.dot_dimension_numbers<[1], [1], [0], [0], [0, 0, 1, 0], [], []>} : vector<16x16xf32>, vector<47x16xf32>, vector<16x47xf32> -> vector<16x47xf32>
    %411 = vector.extract_strided_slice %406 {offsets = [0, 16], sizes = [16, 16], strides = [1, 1]} : vector<32x192xf32> to vector<16x16xf32>
    %412 = vector.extract_strided_slice %406 {offsets = [0, 80], sizes = [16, 16], strides = [1, 1]} : vector<32x192xf32> to vector<16x16xf32>
    %413 = tpu.concatenate %412, %65 in 0 : vector<16x16xf32>, vector<31x16xf32> -> vector<47x16xf32>
    %cst_119 = arith.constant dense<0.000000e+00> : vector<16x47xf32>
    %414 = tpu.matmul %411, %413, %cst_119 {dimension_numbers = #tpu.dot_dimension_numbers<[1], [1], [0], [0], [0, 0, 1, 0], [], []>} : vector<16x16xf32>, vector<47x16xf32>, vector<16x47xf32> -> vector<16x47xf32>
    %415 = vector.extract_strided_slice %406 {offsets = [0, 32], sizes = [16, 16], strides = [1, 1]} : vector<32x192xf32> to vector<16x16xf32>
    %416 = vector.extract_strided_slice %406 {offsets = [0, 96], sizes = [16, 16], strides = [1, 1]} : vector<32x192xf32> to vector<16x16xf32>
    %417 = tpu.concatenate %416, %65 in 0 : vector<16x16xf32>, vector<31x16xf32> -> vector<47x16xf32>
    %cst_120 = arith.constant dense<0.000000e+00> : vector<16x47xf32>
    %418 = tpu.matmul %415, %417, %cst_120 {dimension_numbers = #tpu.dot_dimension_numbers<[1], [1], [0], [0], [0, 0, 1, 0], [], []>} : vector<16x16xf32>, vector<47x16xf32>, vector<16x47xf32> -> vector<16x47xf32>
    %419 = vector.extract_strided_slice %406 {offsets = [0, 48], sizes = [16, 16], strides = [1, 1]} : vector<32x192xf32> to vector<16x16xf32>
    %420 = vector.extract_strided_slice %406 {offsets = [0, 112], sizes = [16, 16], strides = [1, 1]} : vector<32x192xf32> to vector<16x16xf32>
    %421 = tpu.concatenate %420, %65 in 0 : vector<16x16xf32>, vector<31x16xf32> -> vector<47x16xf32>
    %cst_121 = arith.constant dense<0.000000e+00> : vector<16x47xf32>
    %422 = tpu.matmul %419, %421, %cst_121 {dimension_numbers = #tpu.dot_dimension_numbers<[1], [1], [0], [0], [0, 0, 1, 0], [], []>} : vector<16x16xf32>, vector<47x16xf32>, vector<16x47xf32> -> vector<16x47xf32>
    %423 = vector.extract_strided_slice %410 {offsets = [0, 16], sizes = [16, 31], strides = [1, 1]} : vector<16x47xf32> to vector<16x31xf32>
    %424 = vector.extract_strided_slice %414 {offsets = [0, 16], sizes = [16, 31], strides = [1, 1]} : vector<16x47xf32> to vector<16x31xf32>
    %425 = vector.extract_strided_slice %418 {offsets = [0, 16], sizes = [16, 31], strides = [1, 1]} : vector<16x47xf32> to vector<16x31xf32>
    %426 = vector.extract_strided_slice %422 {offsets = [0, 16], sizes = [16, 31], strides = [1, 1]} : vector<16x47xf32> to vector<16x31xf32>
    %427 = tpu.concatenate %423, %424, %425, %426, %69 in 1 : vector<16x31xf32>, vector<16x31xf32>, vector<16x31xf32>, vector<16x31xf32>, vector<16x4xf32> -> vector<16x128xf32>
    %c127_i32_122 = arith.constant 127 : i32
    %428 = tpu.dynamic_rotate %427 by %c127_i32_122 dim 1 : vector<16x128xf32>, i32 -> vector<16x128xf32>
    %c1_i32_123 = arith.constant 1 : i32
    %429 = vector.broadcast %c1_i32_123 : i32 to vector<16x1xi32>
    %430 = arith.andi %68, %429 : vector<16x1xi32>
    %c0_i32_124 = arith.constant 0 : i32
    %431 = vector.broadcast %c0_i32_124 : i32 to vector<16x1xi32>
    %432 = arith.cmpi ne, %430, %431 : vector<16x1xi32>
    %433 = vector.shape_cast %432 : vector<16x1xi1> to vector<16x1xi1>
    %434 = vector.broadcast %433 : vector<16x1xi1> to vector<16x128xi1>
    %435 = arith.select %434, %428, %427 : vector<16x128xi1>, vector<16x128xf32>
    %c126_i32_125 = arith.constant 126 : i32
    %436 = tpu.dynamic_rotate %435 by %c126_i32_125 dim 1 : vector<16x128xf32>, i32 -> vector<16x128xf32>
    %c2_i32_126 = arith.constant 2 : i32
    %437 = vector.broadcast %c2_i32_126 : i32 to vector<16x1xi32>
    %438 = arith.andi %68, %437 : vector<16x1xi32>
    %c0_i32_127 = arith.constant 0 : i32
    %439 = vector.broadcast %c0_i32_127 : i32 to vector<16x1xi32>
    %440 = arith.cmpi ne, %438, %439 : vector<16x1xi32>
    %441 = vector.shape_cast %440 : vector<16x1xi1> to vector<16x1xi1>
    %442 = vector.broadcast %441 : vector<16x1xi1> to vector<16x128xi1>
    %443 = arith.select %442, %436, %435 : vector<16x128xi1>, vector<16x128xf32>
    %c124_i32_128 = arith.constant 124 : i32
    %444 = tpu.dynamic_rotate %443 by %c124_i32_128 dim 1 : vector<16x128xf32>, i32 -> vector<16x128xf32>
    %c4_i32_129 = arith.constant 4 : i32
    %445 = vector.broadcast %c4_i32_129 : i32 to vector<16x1xi32>
    %446 = arith.andi %68, %445 : vector<16x1xi32>
    %c0_i32_130 = arith.constant 0 : i32
    %447 = vector.broadcast %c0_i32_130 : i32 to vector<16x1xi32>
    %448 = arith.cmpi ne, %446, %447 : vector<16x1xi32>
    %449 = vector.shape_cast %448 : vector<16x1xi1> to vector<16x1xi1>
    %450 = vector.broadcast %449 : vector<16x1xi1> to vector<16x128xi1>
    %451 = arith.select %450, %444, %443 : vector<16x128xi1>, vector<16x128xf32>
    %c120_i32_131 = arith.constant 120 : i32
    %452 = tpu.dynamic_rotate %451 by %c120_i32_131 dim 1 : vector<16x128xf32>, i32 -> vector<16x128xf32>
    %c8_i32_132 = arith.constant 8 : i32
    %453 = vector.broadcast %c8_i32_132 : i32 to vector<16x1xi32>
    %454 = arith.andi %68, %453 : vector<16x1xi32>
    %c0_i32_133 = arith.constant 0 : i32
    %455 = vector.broadcast %c0_i32_133 : i32 to vector<16x1xi32>
    %456 = arith.cmpi ne, %454, %455 : vector<16x1xi32>
    %457 = vector.shape_cast %456 : vector<16x1xi1> to vector<16x1xi1>
    %458 = vector.broadcast %457 : vector<16x1xi1> to vector<16x128xi1>
    %459 = arith.select %458, %452, %451 : vector<16x128xi1>, vector<16x128xf32>
    %460 = vector.extract_strided_slice %410 {offsets = [0, 0], sizes = [16, 16], strides = [1, 1]} : vector<16x47xf32> to vector<16x16xf32>
    %461 = vector.extract_strided_slice %459 {offsets = [0, 0], sizes = [16, 16], strides = [1, 1]} : vector<16x128xf32> to vector<16x16xf32>
    %462 = arith.addf %460, %461 : vector<16x16xf32>
    %cst_134 = arith.constant 2.500000e-01 : f32
    %463 = vector.broadcast %cst_134 : f32 to vector<16x16xf32>
    %464 = arith.mulf %462, %463 : vector<16x16xf32>
    %cst_135 = arith.constant dense<0xFF800000> : vector<16xf32>
    %465 = vector.multi_reduction <maximumf>, %464, %cst_135 [1] : vector<16x16xf32> to vector<16xf32>
    %466 = vector.shape_cast %465 : vector<16xf32> to vector<16x1xf32>
    %467 = vector.broadcast %466 : vector<16x1xf32> to vector<16x16xf32>
    %468 = arith.subf %464, %467 : vector<16x16xf32>
    %469 = math.exp %468 : vector<16x16xf32>
    %cst_136 = arith.constant dense<0.000000e+00> : vector<16xf32>
    %470 = vector.multi_reduction <add>, %469, %cst_136 [1] : vector<16x16xf32> to vector<16xf32>
    %471 = vector.shape_cast %470 : vector<16xf32> to vector<16x1xf32>
    %472 = tpu.reciprocal %471 {approx = true} : vector<16x1xf32> -> vector<16x1xf32>
    %473 = vector.broadcast %472 : vector<16x1xf32> to vector<16x16xf32>
    %474 = arith.mulf %469, %473 : vector<16x16xf32>
    %475 = vector.extract_strided_slice %406 {offsets = [0, 128], sizes = [16, 16], strides = [1, 1]} : vector<32x192xf32> to vector<16x16xf32>
    %cst_137 = arith.constant dense<0.000000e+00> : vector<16x16xf32>
    %476 = tpu.matmul %474, %475, %cst_137 {dimension_numbers = #tpu.dot_dimension_numbers<[1], [0], [0], [1], [0, 0, 1, 1], [], []>} : vector<16x16xf32>, vector<16x16xf32>, vector<16x16xf32> -> vector<16x16xf32>
    %477 = vector.extract_strided_slice %414 {offsets = [0, 0], sizes = [16, 16], strides = [1, 1]} : vector<16x47xf32> to vector<16x16xf32>
    %478 = vector.extract_strided_slice %459 {offsets = [0, 31], sizes = [16, 16], strides = [1, 1]} : vector<16x128xf32> to vector<16x16xf32>
    %479 = arith.addf %477, %478 : vector<16x16xf32>
    %cst_138 = arith.constant 2.500000e-01 : f32
    %480 = vector.broadcast %cst_138 : f32 to vector<16x16xf32>
    %481 = arith.mulf %479, %480 : vector<16x16xf32>
    %cst_139 = arith.constant dense<0xFF800000> : vector<16xf32>
    %482 = vector.multi_reduction <maximumf>, %481, %cst_139 [1] : vector<16x16xf32> to vector<16xf32>
    %483 = vector.shape_cast %482 : vector<16xf32> to vector<16x1xf32>
    %484 = vector.broadcast %483 : vector<16x1xf32> to vector<16x16xf32>
    %485 = arith.subf %481, %484 : vector<16x16xf32>
    %486 = math.exp %485 : vector<16x16xf32>
    %cst_140 = arith.constant dense<0.000000e+00> : vector<16xf32>
    %487 = vector.multi_reduction <add>, %486, %cst_140 [1] : vector<16x16xf32> to vector<16xf32>
    %488 = vector.shape_cast %487 : vector<16xf32> to vector<16x1xf32>
    %489 = tpu.reciprocal %488 {approx = true} : vector<16x1xf32> -> vector<16x1xf32>
    %490 = vector.broadcast %489 : vector<16x1xf32> to vector<16x16xf32>
    %491 = arith.mulf %486, %490 : vector<16x16xf32>
    %492 = vector.extract_strided_slice %406 {offsets = [0, 144], sizes = [16, 16], strides = [1, 1]} : vector<32x192xf32> to vector<16x16xf32>
    %cst_141 = arith.constant dense<0.000000e+00> : vector<16x16xf32>
    %493 = tpu.matmul %491, %492, %cst_141 {dimension_numbers = #tpu.dot_dimension_numbers<[1], [0], [0], [1], [0, 0, 1, 1], [], []>} : vector<16x16xf32>, vector<16x16xf32>, vector<16x16xf32> -> vector<16x16xf32>
    %494 = vector.extract_strided_slice %418 {offsets = [0, 0], sizes = [16, 16], strides = [1, 1]} : vector<16x47xf32> to vector<16x16xf32>
    %495 = vector.extract_strided_slice %459 {offsets = [0, 62], sizes = [16, 16], strides = [1, 1]} : vector<16x128xf32> to vector<16x16xf32>
    %496 = arith.addf %494, %495 : vector<16x16xf32>
    %cst_142 = arith.constant 2.500000e-01 : f32
    %497 = vector.broadcast %cst_142 : f32 to vector<16x16xf32>
    %498 = arith.mulf %496, %497 : vector<16x16xf32>
    %cst_143 = arith.constant dense<0xFF800000> : vector<16xf32>
    %499 = vector.multi_reduction <maximumf>, %498, %cst_143 [1] : vector<16x16xf32> to vector<16xf32>
    %500 = vector.shape_cast %499 : vector<16xf32> to vector<16x1xf32>
    %501 = vector.broadcast %500 : vector<16x1xf32> to vector<16x16xf32>
    %502 = arith.subf %498, %501 : vector<16x16xf32>
    %503 = math.exp %502 : vector<16x16xf32>
    %cst_144 = arith.constant dense<0.000000e+00> : vector<16xf32>
    %504 = vector.multi_reduction <add>, %503, %cst_144 [1] : vector<16x16xf32> to vector<16xf32>
    %505 = vector.shape_cast %504 : vector<16xf32> to vector<16x1xf32>
    %506 = tpu.reciprocal %505 {approx = true} : vector<16x1xf32> -> vector<16x1xf32>
    %507 = vector.broadcast %506 : vector<16x1xf32> to vector<16x16xf32>
    %508 = arith.mulf %503, %507 : vector<16x16xf32>
    %509 = vector.extract_strided_slice %406 {offsets = [0, 160], sizes = [16, 16], strides = [1, 1]} : vector<32x192xf32> to vector<16x16xf32>
    %cst_145 = arith.constant dense<0.000000e+00> : vector<16x16xf32>
    %510 = tpu.matmul %508, %509, %cst_145 {dimension_numbers = #tpu.dot_dimension_numbers<[1], [0], [0], [1], [0, 0, 1, 1], [], []>} : vector<16x16xf32>, vector<16x16xf32>, vector<16x16xf32> -> vector<16x16xf32>
    %511 = vector.extract_strided_slice %422 {offsets = [0, 0], sizes = [16, 16], strides = [1, 1]} : vector<16x47xf32> to vector<16x16xf32>
    %512 = vector.extract_strided_slice %459 {offsets = [0, 93], sizes = [16, 16], strides = [1, 1]} : vector<16x128xf32> to vector<16x16xf32>
    %513 = arith.addf %511, %512 : vector<16x16xf32>
    %cst_146 = arith.constant 2.500000e-01 : f32
    %514 = vector.broadcast %cst_146 : f32 to vector<16x16xf32>
    %515 = arith.mulf %513, %514 : vector<16x16xf32>
    %cst_147 = arith.constant dense<0xFF800000> : vector<16xf32>
    %516 = vector.multi_reduction <maximumf>, %515, %cst_147 [1] : vector<16x16xf32> to vector<16xf32>
    %517 = vector.shape_cast %516 : vector<16xf32> to vector<16x1xf32>
    %518 = vector.broadcast %517 : vector<16x1xf32> to vector<16x16xf32>
    %519 = arith.subf %515, %518 : vector<16x16xf32>
    %520 = math.exp %519 : vector<16x16xf32>
    %cst_148 = arith.constant dense<0.000000e+00> : vector<16xf32>
    %521 = vector.multi_reduction <add>, %520, %cst_148 [1] : vector<16x16xf32> to vector<16xf32>
    %522 = vector.shape_cast %521 : vector<16xf32> to vector<16x1xf32>
    %523 = tpu.reciprocal %522 {approx = true} : vector<16x1xf32> -> vector<16x1xf32>
    %524 = vector.broadcast %523 : vector<16x1xf32> to vector<16x16xf32>
    %525 = arith.mulf %520, %524 : vector<16x16xf32>
    %526 = vector.extract_strided_slice %406 {offsets = [0, 176], sizes = [16, 16], strides = [1, 1]} : vector<32x192xf32> to vector<16x16xf32>
    %cst_149 = arith.constant dense<0.000000e+00> : vector<16x16xf32>
    %527 = tpu.matmul %525, %526, %cst_149 {dimension_numbers = #tpu.dot_dimension_numbers<[1], [0], [0], [1], [0, 0, 1, 1], [], []>} : vector<16x16xf32>, vector<16x16xf32>, vector<16x16xf32> -> vector<16x16xf32>
    %528 = tpu.concatenate %476, %493, %510, %527 in 1 : vector<16x16xf32>, vector<16x16xf32>, vector<16x16xf32>, vector<16x16xf32> -> vector<16x64xf32>
    %529 = vector.extract_strided_slice %406 {offsets = [16, 0], sizes = [16, 16], strides = [1, 1]} : vector<32x192xf32> to vector<16x16xf32>
    %530 = vector.extract_strided_slice %406 {offsets = [16, 64], sizes = [16, 16], strides = [1, 1]} : vector<32x192xf32> to vector<16x16xf32>
    %531 = tpu.concatenate %530, %65 in 0 : vector<16x16xf32>, vector<31x16xf32> -> vector<47x16xf32>
    %cst_150 = arith.constant dense<0.000000e+00> : vector<16x47xf32>
    %532 = tpu.matmul %529, %531, %cst_150 {dimension_numbers = #tpu.dot_dimension_numbers<[1], [1], [0], [0], [0, 0, 1, 0], [], []>} : vector<16x16xf32>, vector<47x16xf32>, vector<16x47xf32> -> vector<16x47xf32>
    %533 = vector.extract_strided_slice %406 {offsets = [16, 16], sizes = [16, 16], strides = [1, 1]} : vector<32x192xf32> to vector<16x16xf32>
    %534 = vector.extract_strided_slice %406 {offsets = [16, 80], sizes = [16, 16], strides = [1, 1]} : vector<32x192xf32> to vector<16x16xf32>
    %535 = tpu.concatenate %534, %65 in 0 : vector<16x16xf32>, vector<31x16xf32> -> vector<47x16xf32>
    %cst_151 = arith.constant dense<0.000000e+00> : vector<16x47xf32>
    %536 = tpu.matmul %533, %535, %cst_151 {dimension_numbers = #tpu.dot_dimension_numbers<[1], [1], [0], [0], [0, 0, 1, 0], [], []>} : vector<16x16xf32>, vector<47x16xf32>, vector<16x47xf32> -> vector<16x47xf32>
    %537 = vector.extract_strided_slice %406 {offsets = [16, 32], sizes = [16, 16], strides = [1, 1]} : vector<32x192xf32> to vector<16x16xf32>
    %538 = vector.extract_strided_slice %406 {offsets = [16, 96], sizes = [16, 16], strides = [1, 1]} : vector<32x192xf32> to vector<16x16xf32>
    %539 = tpu.concatenate %538, %65 in 0 : vector<16x16xf32>, vector<31x16xf32> -> vector<47x16xf32>
    %cst_152 = arith.constant dense<0.000000e+00> : vector<16x47xf32>
    %540 = tpu.matmul %537, %539, %cst_152 {dimension_numbers = #tpu.dot_dimension_numbers<[1], [1], [0], [0], [0, 0, 1, 0], [], []>} : vector<16x16xf32>, vector<47x16xf32>, vector<16x47xf32> -> vector<16x47xf32>
    %541 = vector.extract_strided_slice %406 {offsets = [16, 48], sizes = [16, 16], strides = [1, 1]} : vector<32x192xf32> to vector<16x16xf32>
    %542 = vector.extract_strided_slice %406 {offsets = [16, 112], sizes = [16, 16], strides = [1, 1]} : vector<32x192xf32> to vector<16x16xf32>
    %543 = tpu.concatenate %542, %65 in 0 : vector<16x16xf32>, vector<31x16xf32> -> vector<47x16xf32>
    %cst_153 = arith.constant dense<0.000000e+00> : vector<16x47xf32>
    %544 = tpu.matmul %541, %543, %cst_153 {dimension_numbers = #tpu.dot_dimension_numbers<[1], [1], [0], [0], [0, 0, 1, 0], [], []>} : vector<16x16xf32>, vector<47x16xf32>, vector<16x47xf32> -> vector<16x47xf32>
    %545 = vector.extract_strided_slice %532 {offsets = [0, 16], sizes = [16, 31], strides = [1, 1]} : vector<16x47xf32> to vector<16x31xf32>
    %546 = vector.extract_strided_slice %536 {offsets = [0, 16], sizes = [16, 31], strides = [1, 1]} : vector<16x47xf32> to vector<16x31xf32>
    %547 = vector.extract_strided_slice %540 {offsets = [0, 16], sizes = [16, 31], strides = [1, 1]} : vector<16x47xf32> to vector<16x31xf32>
    %548 = vector.extract_strided_slice %544 {offsets = [0, 16], sizes = [16, 31], strides = [1, 1]} : vector<16x47xf32> to vector<16x31xf32>
    %549 = tpu.concatenate %545, %546, %547, %548, %69 in 1 : vector<16x31xf32>, vector<16x31xf32>, vector<16x31xf32>, vector<16x31xf32>, vector<16x4xf32> -> vector<16x128xf32>
    %c127_i32_154 = arith.constant 127 : i32
    %550 = tpu.dynamic_rotate %549 by %c127_i32_154 dim 1 : vector<16x128xf32>, i32 -> vector<16x128xf32>
    %c1_i32_155 = arith.constant 1 : i32
    %551 = vector.broadcast %c1_i32_155 : i32 to vector<16x1xi32>
    %552 = arith.andi %68, %551 : vector<16x1xi32>
    %c0_i32_156 = arith.constant 0 : i32
    %553 = vector.broadcast %c0_i32_156 : i32 to vector<16x1xi32>
    %554 = arith.cmpi ne, %552, %553 : vector<16x1xi32>
    %555 = vector.shape_cast %554 : vector<16x1xi1> to vector<16x1xi1>
    %556 = vector.broadcast %555 : vector<16x1xi1> to vector<16x128xi1>
    %557 = arith.select %556, %550, %549 : vector<16x128xi1>, vector<16x128xf32>
    %c126_i32_157 = arith.constant 126 : i32
    %558 = tpu.dynamic_rotate %557 by %c126_i32_157 dim 1 : vector<16x128xf32>, i32 -> vector<16x128xf32>
    %c2_i32_158 = arith.constant 2 : i32
    %559 = vector.broadcast %c2_i32_158 : i32 to vector<16x1xi32>
    %560 = arith.andi %68, %559 : vector<16x1xi32>
    %c0_i32_159 = arith.constant 0 : i32
    %561 = vector.broadcast %c0_i32_159 : i32 to vector<16x1xi32>
    %562 = arith.cmpi ne, %560, %561 : vector<16x1xi32>
    %563 = vector.shape_cast %562 : vector<16x1xi1> to vector<16x1xi1>
    %564 = vector.broadcast %563 : vector<16x1xi1> to vector<16x128xi1>
    %565 = arith.select %564, %558, %557 : vector<16x128xi1>, vector<16x128xf32>
    %c124_i32_160 = arith.constant 124 : i32
    %566 = tpu.dynamic_rotate %565 by %c124_i32_160 dim 1 : vector<16x128xf32>, i32 -> vector<16x128xf32>
    %c4_i32_161 = arith.constant 4 : i32
    %567 = vector.broadcast %c4_i32_161 : i32 to vector<16x1xi32>
    %568 = arith.andi %68, %567 : vector<16x1xi32>
    %c0_i32_162 = arith.constant 0 : i32
    %569 = vector.broadcast %c0_i32_162 : i32 to vector<16x1xi32>
    %570 = arith.cmpi ne, %568, %569 : vector<16x1xi32>
    %571 = vector.shape_cast %570 : vector<16x1xi1> to vector<16x1xi1>
    %572 = vector.broadcast %571 : vector<16x1xi1> to vector<16x128xi1>
    %573 = arith.select %572, %566, %565 : vector<16x128xi1>, vector<16x128xf32>
    %c120_i32_163 = arith.constant 120 : i32
    %574 = tpu.dynamic_rotate %573 by %c120_i32_163 dim 1 : vector<16x128xf32>, i32 -> vector<16x128xf32>
    %c8_i32_164 = arith.constant 8 : i32
    %575 = vector.broadcast %c8_i32_164 : i32 to vector<16x1xi32>
    %576 = arith.andi %68, %575 : vector<16x1xi32>
    %c0_i32_165 = arith.constant 0 : i32
    %577 = vector.broadcast %c0_i32_165 : i32 to vector<16x1xi32>
    %578 = arith.cmpi ne, %576, %577 : vector<16x1xi32>
    %579 = vector.shape_cast %578 : vector<16x1xi1> to vector<16x1xi1>
    %580 = vector.broadcast %579 : vector<16x1xi1> to vector<16x128xi1>
    %581 = arith.select %580, %574, %573 : vector<16x128xi1>, vector<16x128xf32>
    %582 = vector.extract_strided_slice %532 {offsets = [0, 0], sizes = [16, 16], strides = [1, 1]} : vector<16x47xf32> to vector<16x16xf32>
    %583 = vector.extract_strided_slice %581 {offsets = [0, 0], sizes = [16, 16], strides = [1, 1]} : vector<16x128xf32> to vector<16x16xf32>
    %584 = arith.addf %582, %583 : vector<16x16xf32>
    %cst_166 = arith.constant 2.500000e-01 : f32
    %585 = vector.broadcast %cst_166 : f32 to vector<16x16xf32>
    %586 = arith.mulf %584, %585 : vector<16x16xf32>
    %cst_167 = arith.constant dense<0xFF800000> : vector<16xf32>
    %587 = vector.multi_reduction <maximumf>, %586, %cst_167 [1] : vector<16x16xf32> to vector<16xf32>
    %588 = vector.shape_cast %587 : vector<16xf32> to vector<16x1xf32>
    %589 = vector.broadcast %588 : vector<16x1xf32> to vector<16x16xf32>
    %590 = arith.subf %586, %589 : vector<16x16xf32>
    %591 = math.exp %590 : vector<16x16xf32>
    %cst_168 = arith.constant dense<0.000000e+00> : vector<16xf32>
    %592 = vector.multi_reduction <add>, %591, %cst_168 [1] : vector<16x16xf32> to vector<16xf32>
    %593 = vector.shape_cast %592 : vector<16xf32> to vector<16x1xf32>
    %594 = tpu.reciprocal %593 {approx = true} : vector<16x1xf32> -> vector<16x1xf32>
    %595 = vector.broadcast %594 : vector<16x1xf32> to vector<16x16xf32>
    %596 = arith.mulf %591, %595 : vector<16x16xf32>
    %597 = vector.extract_strided_slice %406 {offsets = [16, 128], sizes = [16, 16], strides = [1, 1]} : vector<32x192xf32> to vector<16x16xf32>
    %cst_169 = arith.constant dense<0.000000e+00> : vector<16x16xf32>
    %598 = tpu.matmul %596, %597, %cst_169 {dimension_numbers = #tpu.dot_dimension_numbers<[1], [0], [0], [1], [0, 0, 1, 1], [], []>} : vector<16x16xf32>, vector<16x16xf32>, vector<16x16xf32> -> vector<16x16xf32>
    %599 = vector.extract_strided_slice %536 {offsets = [0, 0], sizes = [16, 16], strides = [1, 1]} : vector<16x47xf32> to vector<16x16xf32>
    %600 = vector.extract_strided_slice %581 {offsets = [0, 31], sizes = [16, 16], strides = [1, 1]} : vector<16x128xf32> to vector<16x16xf32>
    %601 = arith.addf %599, %600 : vector<16x16xf32>
    %cst_170 = arith.constant 2.500000e-01 : f32
    %602 = vector.broadcast %cst_170 : f32 to vector<16x16xf32>
    %603 = arith.mulf %601, %602 : vector<16x16xf32>
    %cst_171 = arith.constant dense<0xFF800000> : vector<16xf32>
    %604 = vector.multi_reduction <maximumf>, %603, %cst_171 [1] : vector<16x16xf32> to vector<16xf32>
    %605 = vector.shape_cast %604 : vector<16xf32> to vector<16x1xf32>
    %606 = vector.broadcast %605 : vector<16x1xf32> to vector<16x16xf32>
    %607 = arith.subf %603, %606 : vector<16x16xf32>
    %608 = math.exp %607 : vector<16x16xf32>
    %cst_172 = arith.constant dense<0.000000e+00> : vector<16xf32>
    %609 = vector.multi_reduction <add>, %608, %cst_172 [1] : vector<16x16xf32> to vector<16xf32>
    %610 = vector.shape_cast %609 : vector<16xf32> to vector<16x1xf32>
    %611 = tpu.reciprocal %610 {approx = true} : vector<16x1xf32> -> vector<16x1xf32>
    %612 = vector.broadcast %611 : vector<16x1xf32> to vector<16x16xf32>
    %613 = arith.mulf %608, %612 : vector<16x16xf32>
    %614 = vector.extract_strided_slice %406 {offsets = [16, 144], sizes = [16, 16], strides = [1, 1]} : vector<32x192xf32> to vector<16x16xf32>
    %cst_173 = arith.constant dense<0.000000e+00> : vector<16x16xf32>
    %615 = tpu.matmul %613, %614, %cst_173 {dimension_numbers = #tpu.dot_dimension_numbers<[1], [0], [0], [1], [0, 0, 1, 1], [], []>} : vector<16x16xf32>, vector<16x16xf32>, vector<16x16xf32> -> vector<16x16xf32>
    %616 = vector.extract_strided_slice %540 {offsets = [0, 0], sizes = [16, 16], strides = [1, 1]} : vector<16x47xf32> to vector<16x16xf32>
    %617 = vector.extract_strided_slice %581 {offsets = [0, 62], sizes = [16, 16], strides = [1, 1]} : vector<16x128xf32> to vector<16x16xf32>
    %618 = arith.addf %616, %617 : vector<16x16xf32>
    %cst_174 = arith.constant 2.500000e-01 : f32
    %619 = vector.broadcast %cst_174 : f32 to vector<16x16xf32>
    %620 = arith.mulf %618, %619 : vector<16x16xf32>
    %cst_175 = arith.constant dense<0xFF800000> : vector<16xf32>
    %621 = vector.multi_reduction <maximumf>, %620, %cst_175 [1] : vector<16x16xf32> to vector<16xf32>
    %622 = vector.shape_cast %621 : vector<16xf32> to vector<16x1xf32>
    %623 = vector.broadcast %622 : vector<16x1xf32> to vector<16x16xf32>
    %624 = arith.subf %620, %623 : vector<16x16xf32>
    %625 = math.exp %624 : vector<16x16xf32>
    %cst_176 = arith.constant dense<0.000000e+00> : vector<16xf32>
    %626 = vector.multi_reduction <add>, %625, %cst_176 [1] : vector<16x16xf32> to vector<16xf32>
    %627 = vector.shape_cast %626 : vector<16xf32> to vector<16x1xf32>
    %628 = tpu.reciprocal %627 {approx = true} : vector<16x1xf32> -> vector<16x1xf32>
    %629 = vector.broadcast %628 : vector<16x1xf32> to vector<16x16xf32>
    %630 = arith.mulf %625, %629 : vector<16x16xf32>
    %631 = vector.extract_strided_slice %406 {offsets = [16, 160], sizes = [16, 16], strides = [1, 1]} : vector<32x192xf32> to vector<16x16xf32>
    %cst_177 = arith.constant dense<0.000000e+00> : vector<16x16xf32>
    %632 = tpu.matmul %630, %631, %cst_177 {dimension_numbers = #tpu.dot_dimension_numbers<[1], [0], [0], [1], [0, 0, 1, 1], [], []>} : vector<16x16xf32>, vector<16x16xf32>, vector<16x16xf32> -> vector<16x16xf32>
    %633 = vector.extract_strided_slice %544 {offsets = [0, 0], sizes = [16, 16], strides = [1, 1]} : vector<16x47xf32> to vector<16x16xf32>
    %634 = vector.extract_strided_slice %581 {offsets = [0, 93], sizes = [16, 16], strides = [1, 1]} : vector<16x128xf32> to vector<16x16xf32>
    %635 = arith.addf %633, %634 : vector<16x16xf32>
    %cst_178 = arith.constant 2.500000e-01 : f32
    %636 = vector.broadcast %cst_178 : f32 to vector<16x16xf32>
    %637 = arith.mulf %635, %636 : vector<16x16xf32>
    %cst_179 = arith.constant dense<0xFF800000> : vector<16xf32>
    %638 = vector.multi_reduction <maximumf>, %637, %cst_179 [1] : vector<16x16xf32> to vector<16xf32>
    %639 = vector.shape_cast %638 : vector<16xf32> to vector<16x1xf32>
    %640 = vector.broadcast %639 : vector<16x1xf32> to vector<16x16xf32>
    %641 = arith.subf %637, %640 : vector<16x16xf32>
    %642 = math.exp %641 : vector<16x16xf32>
    %cst_180 = arith.constant dense<0.000000e+00> : vector<16xf32>
    %643 = vector.multi_reduction <add>, %642, %cst_180 [1] : vector<16x16xf32> to vector<16xf32>
    %644 = vector.shape_cast %643 : vector<16xf32> to vector<16x1xf32>
    %645 = tpu.reciprocal %644 {approx = true} : vector<16x1xf32> -> vector<16x1xf32>
    %646 = vector.broadcast %645 : vector<16x1xf32> to vector<16x16xf32>
    %647 = arith.mulf %642, %646 : vector<16x16xf32>
    %648 = vector.extract_strided_slice %406 {offsets = [16, 176], sizes = [16, 16], strides = [1, 1]} : vector<32x192xf32> to vector<16x16xf32>
    %cst_181 = arith.constant dense<0.000000e+00> : vector<16x16xf32>
    %649 = tpu.matmul %647, %648, %cst_181 {dimension_numbers = #tpu.dot_dimension_numbers<[1], [0], [0], [1], [0, 0, 1, 1], [], []>} : vector<16x16xf32>, vector<16x16xf32>, vector<16x16xf32> -> vector<16x16xf32>
    %650 = tpu.concatenate %598, %615, %632, %649 in 1 : vector<16x16xf32>, vector<16x16xf32>, vector<16x16xf32>, vector<16x16xf32> -> vector<16x64xf32>
    %651 = tpu.concatenate %528, %650 in 0 : vector<16x64xf32>, vector<16x64xf32> -> vector<32x64xf32>
    %c328 = arith.constant 328 : index
    %c0_182 = arith.constant 0 : index
    %652 = vector.load %arg3[%c328, %c0_182] : memref<488x64xf32, #tpu.memory_space<vmem>>, vector<64x32xf32>
    %cst_183 = arith.constant dense<0.000000e+00> : vector<32x32xf32>
    %653 = tpu.matmul %651, %652, %cst_183 {dimension_numbers = #tpu.dot_dimension_numbers<[1], [0], [0], [1], [0, 0, 1, 1], [], []>} : vector<32x64xf32>, vector<64x32xf32>, vector<32x32xf32> -> vector<32x32xf32>
    %654 = arith.addf %380, %653 : vector<32x32xf32>
    %c19 = arith.constant 19 : index
    %c0_184 = arith.constant 0 : index
    %655 = vector.load %arg1[%c19, %c0_184] : memref<23x128xf32, #tpu.memory_space<vmem>>, vector<1x32xf32>
    %c20 = arith.constant 20 : index
    %c0_185 = arith.constant 0 : index
    %656 = vector.load %arg1[%c20, %c0_185] : memref<23x128xf32, #tpu.memory_space<vmem>>, vector<1x32xf32>
    %cst_186 = arith.constant dense<0.000000e+00> : vector<32xf32>
    %657 = vector.multi_reduction <add>, %654, %cst_186 [1] : vector<32x32xf32> to vector<32xf32>
    %658 = vector.shape_cast %657 : vector<32xf32> to vector<32x1xf32>
    %cst_187 = arith.constant 3.200000e+01 : f32
    %659 = vector.broadcast %cst_187 : f32 to vector<32x1xf32>
    %660 = arith.divf %658, %659 : vector<32x1xf32>
    %661 = vector.broadcast %660 : vector<32x1xf32> to vector<32x32xf32>
    %662 = arith.subf %654, %661 : vector<32x32xf32>
    %663 = arith.mulf %662, %662 : vector<32x32xf32>
    %cst_188 = arith.constant dense<0.000000e+00> : vector<32xf32>
    %664 = vector.multi_reduction <add>, %663, %cst_188 [1] : vector<32x32xf32> to vector<32xf32>
    %665 = vector.shape_cast %664 : vector<32xf32> to vector<32x1xf32>
    %cst_189 = arith.constant 3.200000e+01 : f32
    %666 = vector.broadcast %cst_189 : f32 to vector<32x1xf32>
    %667 = arith.divf %665, %666 : vector<32x1xf32>
    %668 = vector.broadcast %660 : vector<32x1xf32> to vector<32x32xf32>
    %669 = arith.subf %654, %668 : vector<32x32xf32>
    %cst_190 = arith.constant 9.99999974E-6 : f32
    %670 = vector.broadcast %cst_190 : f32 to vector<32x1xf32>
    %671 = arith.addf %667, %670 : vector<32x1xf32>
    %672 = math.rsqrt %671 : vector<32x1xf32>
    %673 = vector.broadcast %672 : vector<32x1xf32> to vector<32x32xf32>
    %674 = arith.mulf %669, %673 : vector<32x32xf32>
    %675 = vector.broadcast %655 : vector<1x32xf32> to vector<32x32xf32>
    %676 = arith.mulf %674, %675 : vector<32x32xf32>
    %677 = vector.broadcast %656 : vector<1x32xf32> to vector<32x32xf32>
    %678 = arith.addf %676, %677 : vector<32x32xf32>
    %c392 = arith.constant 392 : index
    %c0_191 = arith.constant 0 : index
    %679 = vector.load %arg3[%c392, %c0_191] : memref<488x64xf32, #tpu.memory_space<vmem>>, vector<32x64xf32>
    %cst_192 = arith.constant dense<0.000000e+00> : vector<32x64xf32>
    %680 = tpu.matmul %678, %679, %cst_192 {dimension_numbers = #tpu.dot_dimension_numbers<[1], [0], [0], [1], [0, 0, 1, 1], [], []>} : vector<32x32xf32>, vector<32x64xf32>, vector<32x64xf32> -> vector<32x64xf32>
    %c21 = arith.constant 21 : index
    %c0_193 = arith.constant 0 : index
    %681 = vector.load %arg1[%c21, %c0_193] : memref<23x128xf32, #tpu.memory_space<vmem>>, vector<1x64xf32>
    %682 = vector.broadcast %681 : vector<1x64xf32> to vector<32x64xf32>
    %683 = arith.addf %680, %682 : vector<32x64xf32>
    %cst_194 = arith.constant 0.000000e+00 : f32
    %684 = vector.broadcast %cst_194 : f32 to vector<32x64xf32>
    %685 = arith.maximumf %683, %684 : vector<32x64xf32>
    %c424 = arith.constant 424 : index
    %c0_195 = arith.constant 0 : index
    %686 = vector.load %arg3[%c424, %c0_195] : memref<488x64xf32, #tpu.memory_space<vmem>>, vector<64x32xf32>
    %cst_196 = arith.constant dense<0.000000e+00> : vector<32x32xf32>
    %687 = tpu.matmul %685, %686, %cst_196 {dimension_numbers = #tpu.dot_dimension_numbers<[1], [0], [0], [1], [0, 0, 1, 1], [], []>} : vector<32x64xf32>, vector<64x32xf32>, vector<32x32xf32> -> vector<32x32xf32>
    %688 = arith.addf %654, %687 : vector<32x32xf32>
    %c22 = arith.constant 22 : index
    %c0_197 = arith.constant 0 : index
    %689 = vector.load %arg1[%c22, %c0_197] : memref<23x128xf32, #tpu.memory_space<vmem>>, vector<1x32xf32>
    %690 = vector.broadcast %689 : vector<1x32xf32> to vector<32x32xf32>
    %691 = arith.addf %688, %690 : vector<32x32xf32>
    %c5 = arith.constant 5 : index
    %c0_198 = arith.constant 0 : index
    %692 = vector.load %arg1[%c5, %c0_198] : memref<23x128xf32, #tpu.memory_space<vmem>>, vector<1x32xf32>
    %c6 = arith.constant 6 : index
    %c0_199 = arith.constant 0 : index
    %693 = vector.load %arg1[%c6, %c0_199] : memref<23x128xf32, #tpu.memory_space<vmem>>, vector<1x32xf32>
    %cst_200 = arith.constant dense<0.000000e+00> : vector<32xf32>
    %694 = vector.multi_reduction <add>, %691, %cst_200 [1] : vector<32x32xf32> to vector<32xf32>
    %695 = vector.shape_cast %694 : vector<32xf32> to vector<32x1xf32>
    %cst_201 = arith.constant 3.200000e+01 : f32
    %696 = vector.broadcast %cst_201 : f32 to vector<32x1xf32>
    %697 = arith.divf %695, %696 : vector<32x1xf32>
    %698 = vector.broadcast %697 : vector<32x1xf32> to vector<32x32xf32>
    %699 = arith.subf %691, %698 : vector<32x32xf32>
    %700 = arith.mulf %699, %699 : vector<32x32xf32>
    %cst_202 = arith.constant dense<0.000000e+00> : vector<32xf32>
    %701 = vector.multi_reduction <add>, %700, %cst_202 [1] : vector<32x32xf32> to vector<32xf32>
    %702 = vector.shape_cast %701 : vector<32xf32> to vector<32x1xf32>
    %cst_203 = arith.constant 3.200000e+01 : f32
    %703 = vector.broadcast %cst_203 : f32 to vector<32x1xf32>
    %704 = arith.divf %702, %703 : vector<32x1xf32>
    %705 = vector.broadcast %697 : vector<32x1xf32> to vector<32x32xf32>
    %706 = arith.subf %691, %705 : vector<32x32xf32>
    %cst_204 = arith.constant 9.99999974E-6 : f32
    %707 = vector.broadcast %cst_204 : f32 to vector<32x1xf32>
    %708 = arith.addf %704, %707 : vector<32x1xf32>
    %709 = math.rsqrt %708 : vector<32x1xf32>
    %710 = vector.broadcast %709 : vector<32x1xf32> to vector<32x32xf32>
    %711 = arith.mulf %706, %710 : vector<32x32xf32>
    %712 = vector.broadcast %692 : vector<1x32xf32> to vector<32x32xf32>
    %713 = arith.mulf %711, %712 : vector<32x32xf32>
    %714 = vector.broadcast %693 : vector<1x32xf32> to vector<32x32xf32>
    %715 = arith.addf %713, %714 : vector<32x32xf32>
    %c88 = arith.constant 88 : index
    %c0_205 = arith.constant 0 : index
    %716 = vector.load %arg3[%c88, %c0_205] : memref<488x64xf32, #tpu.memory_space<vmem>>, vector<32x48xf32>
    %cst_206 = arith.constant dense<0.000000e+00> : vector<32x48xf32>
    %717 = tpu.matmul %715, %716, %cst_206 {dimension_numbers = #tpu.dot_dimension_numbers<[1], [0], [0], [1], [0, 0, 1, 1], [], []>} : vector<32x32xf32>, vector<32x48xf32>, vector<32x48xf32> -> vector<32x48xf32>
    %c7 = arith.constant 7 : index
    %c0_207 = arith.constant 0 : index
    %718 = vector.load %arg1[%c7, %c0_207] : memref<23x128xf32, #tpu.memory_space<vmem>>, vector<1x48xf32>
    %719 = vector.broadcast %718 : vector<1x48xf32> to vector<32x48xf32>
    %720 = arith.addf %717, %719 : vector<32x48xf32>
    %cst_208 = arith.constant 0.000000e+00 : f32
    %721 = vector.broadcast %cst_208 : f32 to vector<32x48xf32>
    %722 = arith.cmpf oge, %720, %721 : vector<32x48xf32>
    %723 = vector.broadcast %3 : vector<1x1xf32> to vector<32x48xf32>
    %724 = arith.mulf %723, %720 : vector<32x48xf32>
    %725 = arith.select %722, %720, %724 : vector<32x48xi1>, vector<32x48xf32>
    %c120 = arith.constant 120 : index
    %c0_209 = arith.constant 0 : index
    %726 = vector.load %arg3[%c120, %c0_209] : memref<488x64xf32, #tpu.memory_space<vmem>>, vector<48x24xf32>
    %cst_210 = arith.constant dense<0.000000e+00> : vector<32x24xf32>
    %727 = tpu.matmul %725, %726, %cst_210 {dimension_numbers = #tpu.dot_dimension_numbers<[1], [0], [0], [1], [0, 0, 1, 1], [], []>} : vector<32x48xf32>, vector<48x24xf32>, vector<32x24xf32> -> vector<32x24xf32>
    %c8 = arith.constant 8 : index
    %c0_211 = arith.constant 0 : index
    %728 = vector.load %arg1[%c8, %c0_211] : memref<23x128xf32, #tpu.memory_space<vmem>>, vector<1x24xf32>
    %729 = vector.broadcast %728 : vector<1x24xf32> to vector<32x24xf32>
    %730 = arith.addf %727, %729 : vector<32x24xf32>
    %731 = vector.extract_strided_slice %730 {offsets = [0, 0], sizes = [32, 20], strides = [1, 1]} : vector<32x24xf32> to vector<32x20xf32>
    %732 = arith.addf %4, %731 : vector<32x20xf32>
    %c0_212 = arith.constant 0 : index
    %c0_213 = arith.constant 0 : index
    %733 = vector.load %arg4[%c0_212, %c0_213] : memref<32x24xf32, #tpu.memory_space<vmem>>, vector<32x20xf32>
    tpu.vector_store %arg4[%c0_212, %c0_213], %732 {strides = array<i32>} : memref<32x24xf32, #tpu.memory_space<vmem>>, vector<32x20xf32>,
    %734 = vector.extract_strided_slice %730 {offsets = [0, 20], sizes = [32, 4], strides = [1, 1]} : vector<32x24xf32> to vector<32x4xf32>
    %735 = arith.negf %734 : vector<32x4xf32>
    %736 = math.exp %735 : vector<32x4xf32>
    %cst_214 = arith.constant 1.000000e+00 : f32
    %737 = vector.broadcast %cst_214 : f32 to vector<32x4xf32>
    %738 = arith.addf %737, %736 : vector<32x4xf32>
    %739 = arith.divf %737, %738 : vector<32x4xf32>
    %c0_215 = arith.constant 0 : index
    %c20_216 = arith.constant 20 : index
    %740 = vector.load %arg4[%c0_215, %c20_216] : memref<32x24xf32, #tpu.memory_space<vmem>>, vector<32x4xf32>
    tpu.vector_store %arg4[%c0_215, %c20_216], %739 {strides = array<i32>} : memref<32x24xf32, #tpu.memory_space<vmem>>, vector<32x4xf32>,
    return
  }
}

</mosaic_0001>

<bundles_post_ra>
// kernel: detail_transformer_forward.1
= control target key start
LH: loop header
LB: loop body
LE: loop exit
PB: predicated region body
PF: predicated region fallthrough
CT: control target
= control target key end

     0   :  { %vm73_vm0 = vcmask 1043456   ;;  %vm60_vm1 = vcmask 162816   ;;  %s7103_s17 = smov 127   ;;  %s7104_s18 = smov 126   ;;  %v22_v16 = vlaneseq  ;;  %v7105_v19 = vmov 0.0   ;;  %s8920_s3 = inlined_call_operand.vmem [shape: f32[488,64], index: 3, kind: input, shape index: {}]   ;;  %s8921_s0 = inlined_call_operand.vmem [shape: f32[32,20], index: 0, kind: input, shape index: {}]   ;;  %s8922_s1 = inlined_call_operand.vmem [shape: f32[23,128], index: 1, kind: input, shape index: {}]   ;;  %s8923_s2 = inlined_call_operand.vmem [shape: f32[64,192], index: 2, kind: input, shape index: {}]   ;;  %s8924_s4 = inlined_call_operand.vmem [shape: f32[32,24], index: 4, kind: output, shape index: {}]  }
   0x1   :  { %v59_v0 = vld [vmem:[%s8920_s3 + $0x10] sm:$0xf]  ;;  %v58_v1 = vld [vmem:[%s8920_s3 + $0x8] sm:$0xff]  ;;  %v18_v2 = vld [vmem:[%s8921_s0] sm:$0xff]  ;;  %vm189_vm8 = vcmask 392192   ;;  %s7106_s12 = smov 64  }
   0x2   :  { %6347 = vmatprep.subr.msk.mxu0 %vm73_vm0, %v59_v0  ;;  %v57_v3 = vld [vmem:[%s8920_s3] sm:$0xff]  ;;  %6353 = vmatprep.mubr.msk.f32.mxu0 %vm60_vm1, %v18_v2  ;;  %v17_v4 = vld [vmem:[%s8922_s1 + $0x9] sm:$0x1]  ;;  %v182_v6 = vld [vmem:[%s8920_s3 + $0x38] sm:$0xff]  ;;  %v7201_v17 = vshrl.u32 %v22_v16, 7  ;;  %s7107_s15 = smov 96  }
   0x3   :  { %6348 = vmatpush3.msk.msra.mxu0 %vm73_vm0, %v59_v0  ;;  %v183_v5 = vld [vmem:[%s8920_s3 + $0x40] sm:$0xff]  ;;  %6887 = vpush %v17_v4  ;;  %v19_v7 = vld [vmem:[%s8921_s0 + $0x8] sm:$0xff]  ;;  %v20_v8 = vld [vmem:[%s8921_s0 + $0x10] sm:$0xff]  ;;  %291 = vrot.lane.b32.xlu0 %v17_v4, %s7103_s17  ;;  %vm356_vm0 = vcmask 130048   ;;  %s7110_s13 = smov 48   ;;  %s7111_s14 = smov 32  }
   0x4   :  { %6349 = vmatprep.subr.mxu0 %v58_v1  ;;  %6359 = vmatprep.subr.mxu1 %v183_v5  ;;  %v21_v9 = vld [vmem:[%s8921_s0 + $0x18] sm:$0xff]  ;;  %v181_v10 = vld [vmem:[%s8920_s3 + $0x30] sm:$0xff]  ;;  %v180_v11 = vld [vmem:[%s8920_s3 + $0x28] sm:$0xff]  ;;  %v7204_v18 = vadd.s32 8, %v7201_v17  ;;  %vm25_vm4 = vcmp.lt.s32.totalorder %v7201_v17, 4  ;;  %vm31_vm5 = vcmp.eq.s32.totalorder %v7201_v17, 7  ;;  %v306_v49 = vcvt.s32.f32 %v7201_v17 }
   0x5   :  { %6350 = vmatpush3.msra.mxu0 %v58_v1  ;;  %6360 = vmatpush3.msra.mxu1 %v183_v5  ;;  %v179_v12 = vld [vmem:[%s8920_s3 + $0x20] sm:$0xff]  ;;  %v178_v13 = vld [vmem:[%s8920_s3 + $0x18] sm:$0xff]  ;;  %v350_v14 = vld [vmem:[%s8920_s3 + $0x50] sm:$0xff]  ;;  %v304_v47 = vadd.s32 16, %v7201_v17  ;;  %v305_v48 = vadd.s32 24, %v7201_v17  ;;  %s7112_s16 = smov 16  }
   0x6   :  { %6351 = vmatprep.subr.mxu0 %v57_v3  ;;  %6361 = vmatprep.subr.mxu1 %v182_v6  ;;  %v349_v15 = vld [vmem:[%s8920_s3 + $0x48] sm:$0xff]  ;;  %vm28_vm2 = vcmp.eq.s32.totalorder %v7204_v18, 15  ;;  %vm36_vm3 = vcmp.eq.s32.totalorder %v7204_v18, 11  ;;  %vm33_vm7 = vmor %vm25_vm4, %vm31_vm5  ;;  %v5808_v24 = vld [vmem:[%s8922_s1] ss:$0 sm:$0xff]  ;;  %v307_v50 = vcvt.s32.f32 %v7204_v18  ;;  %v5819_v53 = vadd.f32 -15.0, %v306_v49 }
   0x7   :  { %6352 = vmatpush3.msra.mxu0 %v57_v3  ;;  %6362 = vmatpush3.msra.mxu1 %v182_v6  ;;  %vm38_vm6 = vmor %vm28_vm2, %vm36_vm3  ;;  %v5807_v21 = vld [vmem:[%s8922_s1 + $0xa] ss:$0 sm:$0xff]  ;;  %v5805_v22 = vsel %vm33_vm7, 1.0, %v7105_v19  ;;  %v308_v51 = vcvt.s32.f32 %v304_v47  ;;  %v309_v52 = vcvt.s32.f32 %v305_v48  ;;  %v5823_v56 = vld [vmem:[%s8922_s1 + $0x2] ss:$0 sm:$0xff]  ;;  %vm458_vm4 = vcmask 261120  }
   0x8   :  { %6354 = vmatmul.mubr.msk.f32.vlgmr.msra.gmra.mxu0 %vm60_vm1, %v19_v7  ;;  %6363 = vmatprep.subr.mxu1 %v181_v10  ;;  %v5806_v20 = vsel %vm38_vm6, 1.0, %v7105_v19  ;;  %v48_v25 = vmul.f32 %v5807_v21, %v5805_v22  ;;  %v5820_v54 = vadd.f32 -15.0, %v307_v50  ;;  %v319_v58 = vmul.f32 %v5823_v56, %v5819_v53  ;;  %v5824_v61 = vld [vmem:[%s8922_s1 + $0x3] ss:$0 sm:$0xff]  ;;  %s7113_s19 = smov 15   ;;  %s7114_s20 = smov 46  }
   0x9   :  { %6356 = vmatprep.mubr.msk.f32.mxu0 %vm60_vm1, %v20_v8  ;;  %6364 = vmatpush3.msra.mxu1 %v181_v10  ;;  %v49_v23 = vmul.f32 %v5807_v21, %v5806_v20  ;;  %v5821_v55 = vadd.f32 -15.0, %v308_v51  ;;  %v5822_v57 = vadd.f32 -15.0, %v309_v52  ;;  %v5825_v51 = vld [vmem:[%s8922_s1 + $0x4] ss:$0 sm:$0xff]  ;;  %s7115_s21 = smov 77   ;;  %s7116_s22 = smov 124  }
   0xa   :  { %6365 = vmatprep.subr.mxu1 %v180_v11  ;;  %336 = vrot.lane.b32.xlu0 %v17_v4, %s7104_s18  ;;  %v55_v27 = vadd.f32 %v5808_v24, %v48_v25  ;;  %v320_v59 = vmul.f32 %v5823_v56, %v5820_v54  ;;  %v328_v63 = vadd.f32 %v5824_v61, %v319_v58  ;;  %v535_v54 = vld [vmem:[%s8923_s2 + $0x38] sm:$0xff]  ;;  %s7117_s23 = smov 120   ;;  %s7118_s24 = smov 97  }
   0xb   :  { %6366 = vmatpush3.msra.mxu1 %v180_v11  ;;  %6377 = vmatprep.subr.mxu0 %v350_v14  ;;  %v56_v26 = vadd.f32 %v5808_v24, %v49_v23  ;;  %v321_v60 = vmul.f32 %v5823_v56, %v5821_v55  ;;  %v322_v62 = vmul.f32 %v5823_v56, %v5822_v57  ;;  %v534_v55 = vld [vmem:[%s8923_s2 + $0x30] sm:$0xff]  ;;  %v533_v56 = vld [vmem:[%s8923_s2 + $0x28] sm:$0xff]  ;;  %v532_v57 = vld [vmem:[%s8923_s2 + $0x20] sm:$0xff]  ;;  %s7119_s25 = smov 66   ;;  %s8925_s26 = smov 35  }
   0xc   :  { %6357 = vmatmul.mubr.msk.f32.gmra.mxu0 %vm60_vm1, %v21_v9  ;;  %6367 = vmatprep.subr.mxu1 %v179_v12  ;;  %v329_v0 = vadd.f32 %v5824_v61, %v320_v59  ;;  %vm332_vm13 = vcmp.ge.f32.partialorder %v328_v63, 0.0  ;;  %v531_v58 = vld [vmem:[%s8923_s2 + $0x18] sm:$0xff]  ;;  %v530_v59 = vld [vmem:[%s8923_s2 + $0x10] sm:$0xff]  ;;  %s8939_s8 = smov 35  }
   0xd   :  { %6368 = vmatpush3.msra.mxu1 %v179_v12  ;;  %6378 = vmatpush3.msra.mxu0 %v350_v14  ;;  %v330_v1 = vadd.f32 %v5824_v61, %v321_v60  ;;  %v331_v2 = vadd.f32 %v5824_v61, %v322_v62  ;;  %v5814_v12 = vld [vmem:[%s8922_s1 + $0x1] ss:$0 sm:$0xff]  ;;  %v529_v60 = vld [vmem:[%s8923_s2 + $0x8] sm:$0xff] }
   0xe   :  { %6369 = vmatprep.subr.mxu1 %v178_v13  ;;  %6379 = vmatprep.subr.mxu0 %v349_v15  ;;  %vm333_vm14 = vcmp.ge.f32.partialorder %v329_v0, 0.0  ;;  %v528_v61 = vld [vmem:[%s8923_s2] sm:$0xff] }
   0xf   :  { %6370 = vmatpush3.msra.mxu1 %v178_v13  ;;  %6380 = vmatpush3.msra.mxu0 %v349_v15  ;;  %vm334_vm15 = vcmp.ge.f32.partialorder %v330_v1, 0.0  ;;  %vm335_vm2 = vcmp.ge.f32.partialorder %v331_v2, 0.0 }
  0x10   :  { %572 = vmatprep.subr.mxu1 %v535_v54 }
  0x34   :  { %s6888_s27 = spop %6887 }
  0x35   :  { %v168_v31 = vstv %s6888_s27 }
  0x75   :  { %v292_v29 = vpop.permute.xlu0 %291 }
  0x76   :  { %6889 = vpush %v292_v29 }
  0x7c   :  { %v337_v36 = vpop.permute.xlu0 %336 }
  0x7d   :  { %6891 = vpush %v337_v36 }
  0xa7   :  { %s6890_s6 = spop %6889 }
  0xa8   :  { %v294_v15 = vstv %s6890_s6  ;;  %s7108_s6 = smov 80  }
  0xae   :  { %s6892_s7 = spop %6891 }
  0xaf   :  { %v339_v3 = vstv %s6892_s7  ;;  %s7109_s7 = smov 112  }
  0xb0   :  { %v341_v4 = vmul.f32 %v339_v3, %v328_v63  ;;  %v342_v5 = vmul.f32 %v339_v3, %v329_v0  ;;  %v343_v6 = vmul.f32 %v339_v3, %v330_v1  ;;  %v344_v7 = vmul.f32 %v339_v3, %v331_v2 }
  0xb2   :  { %v345_v8 = vsel %vm332_vm13, %v328_v63, %v341_v4  ;;  %v346_v9 = vsel %vm333_vm14, %v329_v0, %v342_v5  ;;  %v347_v10 = vsel %vm334_vm15, %v330_v1, %v343_v6  ;;  %v348_v11 = vsel %vm335_vm2, %v331_v2, %v344_v7 }
  0xb3   :  { %6381 = vmatprep.mubr.msk.f32.mxu0 %vm356_vm0, %v345_v8 }
  0xb4   :  { %6382 = vmatmul.mubr.msk.f32.vlgmr.msra.gmra.mxu0 %vm356_vm0, %v346_v9 }
  0xb5   :  { %6384 = vmatprep.mubr.msk.f32.mxu0 %vm356_vm0, %v347_v10  ;;  %v7315_v10 = vld [vmem:[%s8922_s1 + $0xb] ss:$0 sm:$0xff] }
  0xb8   :  { %6385 = vmatmul.mubr.msk.f32.gmra.mxu0 %vm356_vm0, %v348_v11 }
  0xc8   :  { %v6355_v28 = vpop.f32.mrf.mxu0 }
  0xc9   :  { %v149_v30 = vadd.f32 %v6355_v28, %v56_v26 }
  0xca   :  { %v143_v32 = vpop.f32.mrf.mxu0 }
  0xcb   :  { %v144_v33 = vadd.f32 %v143_v32, %v55_v27  ;;  %v171_v34 = vmul.f32 %v168_v31, %v149_v30  ;;  %vm163_vm9 = vcmp.ge.f32.partialorder %v149_v30, 0.0 }
  0xcc   :  { %v6358_v35 = vpop.f32.mrf.mxu0 }
  0xcd   :  { %v159_v37 = vadd.f32 %v6358_v35, %v56_v26  ;;  %vm162_vm10 = vcmp.ge.f32.partialorder %v144_v33, 0.0  ;;  %v170_v38 = vmul.f32 %v168_v31, %v144_v33  ;;  %v175_v43 = vsel %vm163_vm9, %v149_v30, %v171_v34 }
  0xce   :  { %v153_v39 = vpop.f32.mrf.mxu0  ;;  %vm1131_vm9 = vcmask 252928  }
  0xcf   :  { %v154_v40 = vadd.f32 %v153_v39, %v55_v27  ;;  %v174_v41 = vsel %vm162_vm10, %v144_v33, %v170_v38  ;;  %v173_v42 = vmul.f32 %v168_v31, %v159_v37  ;;  %vm165_vm11 = vcmp.ge.f32.partialorder %v159_v37, 0.0 }
  0xd0   :  { %6371 = vmatprep.mubr.msk.f32.mxu1 %vm189_vm8, %v174_v41  ;;  %vm1134_vm10 = vcmask 506880  }
  0xd1   :  { %vm164_vm12 = vcmp.ge.f32.partialorder %v154_v40, 0.0  ;;  %v172_v44 = vmul.f32 %v168_v31, %v154_v40  ;;  %6372 = vmatmul.mubr.msk.f32.vlgmr.msra.gmra.mxu1 %vm189_vm8, %v175_v43  ;;  %v177_v46 = vsel %vm165_vm11, %v159_v37, %v173_v42  ;;  %vm1137_vm11 = vcmask 760832  }
  0xd2   :  { %573 = vmatpush1.msra.mxu1 %v534_v55 }
  0xd3   :  { %v176_v45 = vsel %vm164_vm12, %v154_v40, %v172_v44  ;;  %574 = vmatprep.subr.mxu1 %v533_v56  ;;  %vm1140_vm12 = vcmask 1014784  }
  0xd4   :  { %6374 = vmatprep.mubr.msk.f32.mxu1 %vm189_vm8, %v176_v45  ;;  %575 = vmatpush1.msra.mxu1 %v532_v57 }
  0xd5   :  { %6375 = vmatmul.mubr.msk.f32.gmra.mxu1 %vm189_vm8, %v177_v46  ;;  %576 = vmatprep.subr.mxu1 %v531_v58 }
  0xd6   :  { %612 = vmatprep.mubr.f32.mxu1 %v7105_v19  ;;  %577 = vmatpush1.msra.mxu1 %v530_v59 }
  0xd7   :  { %578 = vmatprep.subr.mxu1 %v529_v60 }
  0xd8   :  { %579 = vmatpush1.msra.mxu1 %v528_v61 }
 0x174   :  { %v6383_v46 = vpop.f32.mrf.mxu0 }
 0x175   :  { %v441_v62 = vadd.f32 %v6383_v46, %v5825_v51 }
 0x176   :  { %v435_v48 = vpop.f32.mrf.mxu0 }
 0x177   :  { %v436_v63 = vadd.f32 %v5825_v51, %v435_v48 }
 0x178   :  { %v6386_v49 = vpop.f32.mrf.mxu0 }
 0x179   :  { %v451_v53 = vadd.f32 %v6386_v49, %v5825_v51 }
 0x17a   :  { %v445_v50 = vpop.f32.mrf.mxu0 }
 0x17b   :  { %v446_v52 = vadd.f32 %v5825_v51, %v445_v50 }
 0x191   :  { %v6373_v13 = vpop.f32.mrf.mxu1 }
 0x192   :  { %v274_v14 = vadd.f32 %v6373_v13, %v5814_v12 }
 0x193   :  { %v268_v16 = vpop.f32.mrf.mxu1 }
 0x194   :  { %v269_v20 = vadd.f32 %v5814_v12, %v268_v16  ;;  %v297_v22 = vmul.f32 %v294_v15, %v274_v14  ;;  %vm288_vm5 = vcmp.ge.f32.partialorder %v274_v14, 0.0 }
 0x195   :  { %v6376_v21 = vpop.f32.mrf.mxu1 }
 0x196   :  { %v296_v23 = vmul.f32 %v294_v15, %v269_v20  ;;  %v284_v24 = vadd.f32 %v6376_v21, %v5814_v12  ;;  %vm287_vm3 = vcmp.ge.f32.partialorder %v269_v20, 0.0  ;;  %v7244_v31 = vsel %vm288_vm5, %v274_v14, %v297_v22  ;;  %v7321_v14 = vld [vmem:[%s8922_s1 + $0xc] ss:$0 sm:$0xff] }
 0x197   :  { %v278_v25 = vpop.f32.mrf.mxu1  ;;  %v462_v34 = vsel %vm458_vm4, %v7244_v31, 0.0 }
 0x198   :  { %v299_v26 = vmul.f32 %v294_v15, %v284_v24  ;;  %v279_v27 = vadd.f32 %v5814_v12, %v278_v25  ;;  %v7240_v28 = vsel %vm287_vm3, %v269_v20, %v296_v23  ;;  %vm290_vm6 = vcmp.ge.f32.partialorder %v284_v24, 0.0 }
 0x199   :  { %v459_v29 = vsel %vm458_vm4, %v7240_v28, 0.0 }
 0x19a   :  { %v298_v30 = vmul.f32 %v294_v15, %v279_v27  ;;  %460 = vadd.xlane.f32.xlu1 %v459_v29  ;;  %vm289_vm7 = vcmp.ge.f32.partialorder %v279_v27, 0.0  ;;  %v7246_v32 = vsel %vm290_vm6, %v284_v24, %v299_v26  ;;  %vm2629_vm6 = vcmask 523264  }
 0x19b   :  { %v468_v47 = vsel %vm458_vm4, %v7246_v32, 0.0 }
 0x19c   :  { %v7248_v33 = vsel %vm289_vm7, %v279_v27, %v298_v30 }
 0x19d   :  { %v465_v45 = vsel %vm458_vm4, %v7248_v33, 0.0 }
 0x19e   :  { %463 = vadd.xlane.f32.xlu1 %v462_v34 }
 0x223   :  { %v461_v35 = vpop.xlane.xlu1 %460 }
 0x224   :  { %v472_v36 = vmul.f32 0.03125, %v461_v35 }
 0x226   :  { %v7253_v37 = vsub.f32 %v7240_v28, %v472_v36 }
 0x227   :  { %v464_v38 = vpop.xlane.xlu1 %463 }
 0x228   :  { %v473_v39 = vmul.f32 0.03125, %v464_v38  ;;  %v480_v40 = vmul.f32 %v7253_v37, %v7253_v37 }
 0x22a   :  { %v7258_v41 = vsub.f32 %v7244_v31, %v473_v39  ;;  %v484_v42 = vsel %vm458_vm4, %v480_v40, 0.0 }
 0x22b   :  { %485 = vadd.xlane.f32.xlu0 %v484_v42 }
 0x22c   :  { %v481_v43 = vmul.f32 %v7258_v41, %v7258_v41 }
 0x22e   :  { %v487_v44 = vsel %vm458_vm4, %v481_v43, 0.0 }
 0x22f   :  { %488 = vadd.xlane.f32.xlu1 %v487_v44 }
 0x233   :  { %466 = vadd.xlane.f32.xlu1 %v465_v45 }
 0x237   :  { %469 = vadd.xlane.f32.xlu1 %v468_v47 }
 0x241   :  { %645 = vrot.lane.b32.xlu0 %v446_v52, %s7106_s12 }
 0x245   :  { %875 = vrot.lane.b32.xlu0 %v451_v53, %s7107_s15 }
 0x248   :  { %647 = vrot.lane.b32.xlu1 %v451_v53, %s7106_s12 }
 0x249   :  { %873 = vrot.lane.b32.xlu0 %v446_v52, %s7107_s15 }
 0x24c   :  { %760 = vrot.lane.b32.xlu1 %v451_v53, %s7108_s6 }
 0x24d   :  { %871 = vrot.lane.b32.xlu0 %v441_v62, %s7107_s15 }
 0x250   :  { %758 = vrot.lane.b32.xlu1 %v446_v52, %s7108_s6 }
 0x251   :  { %869 = vrot.lane.b32.xlu0 %v436_v63, %s7107_s15 }
 0x254   :  { %643 = vrot.lane.b32.xlu1 %v441_v62, %s7106_s12 }
 0x258   :  { %756 = vrot.lane.b32.xlu1 %v441_v62, %s7108_s6 }
 0x25c   :  { %641 = vrot.lane.b32.xlu1 %v436_v63, %s7106_s12 }
 0x260   :  { %754 = vrot.lane.b32.xlu1 %v436_v63, %s7108_s6 }
 0x264   :  { %990 = vrot.lane.b32.xlu1 %v451_v53, %s7109_s7 }
 0x268   :  { %988 = vrot.lane.b32.xlu1 %v446_v52, %s7109_s7 }
 0x26c   :  { %986 = vrot.lane.b32.xlu1 %v441_v62, %s7109_s7 }
 0x270   :  { %984 = vrot.lane.b32.xlu1 %v436_v63, %s7109_s7 }
 0x2b4   :  { %v486_v0 = vpop.xlane.xlu0 %485 }
 0x2b5   :  { %v496_v1 = vmul.f32 0.03125, %v486_v0 }
 0x2b7   :  { %v500_v2 = vadd.f32 1e-05, %v496_v1 }
 0x2b8   :  { %v489_v3 = vpop.xlane.xlu1 %488  ;;  %v646_v11 = vpop.permute.xlu0 %645 }
 0x2b9   :  { %6914 = vrsqrt.f32 %v500_v2  ;;  %v497_v4 = vmul.f32 0.03125, %v489_v3 }
 0x2bb   :  { %v501_v5 = vadd.f32 1e-05, %v497_v4 }
 0x2bc   :  { %v467_v6 = vpop.xlane.xlu1 %466  ;;  %v876_v29 = vpop.permute.xlu0 %875 }
 0x2bd   :  { %6916 = vrsqrt.f32 %v501_v5  ;;  %v474_v34 = vmul.f32 0.03125, %v467_v6 }
 0x2bf   :  { %v478_v35 = vsub.f32 %v7248_v33, %v474_v34 }
 0x2c0   :  { %v470_v7 = vpop.xlane.xlu1 %469  ;;  %v874_v43 = vpop.permute.xlu0 %873 }
 0x2c1   :  { %v475_v36 = vmul.f32 0.03125, %v470_v7 }
 0x2c3   :  { %v7342_v38 = vsub.f32 %v7246_v32, %v475_v36 }
 0x2c4   :  { %v648_v8 = vpop.permute.xlu1 %647  ;;  %v872_v45 = vpop.permute.xlu0 %871 }
 0x2c5   :  { %661 = vrot.lane.b32.xlu0 %v648_v8, %s7106_s12  ;;  %v483_v40 = vmul.f32 %v7342_v38, %v7342_v38 }
 0x2c6   :  { %v6915_v9 = vpop.eup %6914 }
 0x2c7   :  { %v508_v12 = vmul.f32 %v6915_v9, %v7253_v37  ;;  %v482_v37 = vmul.f32 %v478_v35, %v478_v35 }
 0x2c8   :  { %v761_v13 = vpop.permute.xlu1 %760  ;;  %v870_v47 = vpop.permute.xlu0 %869 }
 0x2c9   :  { %v516_v15 = vmul.f32 %v7315_v10, %v508_v12  ;;  %659 = vrot.lane.b32.xlu0 %v646_v11, %s7106_s12  ;;  %776 = vrot.lane.b32.xlu1 %v761_v13, %s7110_s13  ;;  %v490_v39 = vsel %vm458_vm4, %v482_v37, 0.0 }
 0x2ca   :  { %v6917_v16 = vpop.eup %6916 }
 0x2cb   :  { %v524_v20 = vadd.f32 %v7321_v14, %v516_v15  ;;  %v509_v21 = vmul.f32 %v6917_v16, %v7258_v41  ;;  %v493_v41 = vsel %vm458_vm4, %v483_v40, 0.0 }
 0x2cc   :  { %v759_v22 = vpop.permute.xlu1 %758 }
 0x2cd   :  { %5832 = vmatmul.mubr.msk.f32.vlgmr.msra.gmra.mxu1 %vm458_vm4, %v524_v20  ;;  %v517_v23 = vmul.f32 %v7315_v10, %v509_v21  ;;  %774 = vrot.lane.b32.xlu1 %v759_v22, %s7110_s13 }
 0x2ce   :  { %618 = vmatprep.mubr.f32.mxu1 %v7105_v19 }
 0x2cf   :  { %v525_v24 = vadd.f32 %v7321_v14, %v517_v23 }
 0x2d0   :  { %v644_v25 = vpop.permute.xlu1 %643 }
 0x2d1   :  { %5833 = vmatmul.mubr.msk.f32.gmra.mxu1 %vm458_vm4, %v525_v24  ;;  %657 = vrot.lane.b32.xlu0 %v644_v25, %s7106_s12 }
 0x2d2   :  { %624 = vmatprep.mubr.f32.mxu1 %v7105_v19 }
 0x2d4   :  { %v757_v26 = vpop.permute.xlu1 %756 }
 0x2d5   :  { %772 = vrot.lane.b32.xlu1 %v757_v26, %s7110_s13 }
 0x2d8   :  { %v642_v27 = vpop.permute.xlu1 %641 }
 0x2d9   :  { %655 = vrot.lane.b32.xlu0 %v642_v27, %s7106_s12 }
 0x2dc   :  { %v755_v30 = vpop.permute.xlu1 %754 }
 0x2dd   :  { %891 = vrot.lane.b32.xlu0 %v876_v29, %s7111_s14  ;;  %770 = vrot.lane.b32.xlu1 %v755_v30, %s7110_s13 }
 0x2e0   :  { %v991_v42 = vpop.permute.xlu1 %990 }
 0x2e4   :  { %v989_v44 = vpop.permute.xlu1 %988 }
 0x2e8   :  { %v987_v46 = vpop.permute.xlu1 %986 }
 0x2ec   :  { %v985_v48 = vpop.permute.xlu1 %984 }
 0x2fc   :  { %491 = vadd.xlane.f32.xlu0 %v490_v39 }
 0x301   :  { %494 = vadd.xlane.f32.xlu1 %v493_v41 }
 0x337   :  { %v7348_v49 = vpop.permute.xlu0 %661 }
 0x338   :  { %6387 = vmatprep.subr.msk.mxu0 %vm356_vm0, %v7348_v49 }
 0x339   :  { %6388 = vmatpush3.xpose.msk.msra.mxu0 %vm356_vm0, %v7348_v49 }
 0x33b   :  { %v7354_v50 = vpop.permute.xlu0 %659  ;;  %v7356_v51 = vpop.permute.xlu1 %776 }
 0x33c   :  { %6402 = vmatprep.subr.msk.mxu1 %vm356_vm0, %v7356_v51  ;;  %6389 = vmatprep.subr.msk.mxu0 %vm356_vm0, %v7354_v50 }
 0x33d   :  { %6403 = vmatpush3.xpose.msk.msra.mxu1 %vm356_vm0, %v7356_v51  ;;  %6390 = vmatpush3.xpose.msk.msra.mxu0 %vm356_vm0, %v7354_v50 }
 0x33f   :  { %v7366_v52 = vpop.permute.xlu1 %774 }
 0x340   :  { %6404 = vmatprep.subr.msk.mxu1 %vm356_vm0, %v7366_v52 }
 0x341   :  { %6405 = vmatpush3.xpose.msk.msra.mxu1 %vm356_vm0, %v7366_v52 }
 0x343   :  { %v7372_v53 = vpop.permute.xlu0 %657 }
 0x344   :  { %6391 = vmatprep.subr.msk.mxu0 %vm356_vm0, %v7372_v53 }
 0x345   :  { %6392 = vmatpush3.xpose.msk.msra.mxu0 %vm356_vm0, %v7372_v53 }
 0x347   :  { %v7378_v54 = vpop.permute.xlu1 %772 }
 0x348   :  { %6406 = vmatprep.subr.msk.mxu1 %vm356_vm0, %v7378_v54 }
 0x349   :  { %6407 = vmatpush3.xpose.msk.msra.mxu1 %vm356_vm0, %v7378_v54 }
 0x34b   :  { %v7384_v55 = vpop.permute.xlu0 %655 }
 0x34c   :  { %6393 = vmatprep.subr.msk.mxu0 %vm356_vm0, %v7384_v55 }
 0x34d   :  { %6394 = vmatpush3.xpose.msk.msra.mxu0 %vm356_vm0, %v7384_v55 }
 0x34f   :  { %v7390_v56 = vpop.permute.xlu1 %770  ;;  %v7396_v57 = vpop.permute.xlu0 %891 }
 0x350   :  { %6408 = vmatprep.subr.msk.mxu1 %vm356_vm0, %v7390_v56 }
 0x351   :  { %6409 = vmatpush3.xpose.msk.msra.mxu1 %vm356_vm0, %v7390_v56 }
 0x385   :  { %v492_v58 = vpop.xlane.xlu0 %491 }
 0x386   :  { %v498_v59 = vmul.f32 0.03125, %v492_v58 }
 0x388   :  { %v502_v60 = vadd.f32 1e-05, %v498_v59 }
 0x38a   :  { %6918 = vrsqrt.f32 %v502_v60  ;;  %v495_v61 = vpop.xlane.xlu1 %494 }
 0x38b   :  { %v499_v62 = vmul.f32 0.03125, %v495_v61 }
 0x38d   :  { %v503_v63 = vadd.f32 1e-05, %v499_v62  ;;  %v614_v0 = vpop.f32.mrf.mxu1 }
 0x38e   :  { %6399 = vmatprep.mubr.msk.f32.mxu0 %vm356_vm0, %v614_v0  ;;  %651 = vrot.lane.b32.xlu0 %v614_v0, %s7106_s12 }
 0x38f   :  { %6920 = vrsqrt.f32 %v503_v63  ;;  %766 = vrot.lane.b32.xlu1 %v614_v0, %s7110_s13  ;;  %v7401_v1 = vpop.f32.mrf.mxu1 }
 0x391   :  { %v620_v2 = vpop.f32.mrf.mxu1 }
 0x392   :  { %653 = vrot.lane.b32.xlu0 %v620_v2, %s7106_s12 }
 0x393   :  { %762 = vrot.lane.b32.xlu1 %v614_v0, %s7109_s7  ;;  %v7491_v36 = vpop.f32.mrf.mxu1 }
 0x396   :  { %1006 = vrot.lane.b32.xlu0 %v991_v42, %s7112_s16 }
 0x397   :  { %v6919_v3 = vpop.eup %6918  ;;  %768 = vrot.lane.b32.xlu1 %v620_v2, %s7110_s13 }
 0x398   :  { %v510_v4 = vmul.f32 %v6919_v3, %v478_v35 }
 0x39a   :  { %889 = vrot.lane.b32.xlu0 %v874_v43, %s7111_s14  ;;  %v518_v5 = vmul.f32 %v7315_v10, %v510_v4 }
 0x39b   :  { %1004 = vrot.lane.b32.xlu1 %v989_v44, %s7112_s16 }
 0x39c   :  { %v6921_v6 = vpop.eup %6920  ;;  %v526_v7 = vadd.f32 %v7321_v14, %v518_v5 }
 0x39d   :  { %v511_v8 = vmul.f32 %v6921_v6, %v7342_v38 }
 0x39e   :  { %5834 = vmatmul.mubr.msk.f32.gmra.mxu1 %vm458_vm4, %v526_v7  ;;  %887 = vrot.lane.b32.xlu0 %v872_v45, %s7111_s14 }
 0x39f   :  { %764 = vrot.lane.b32.xlu1 %v620_v2, %s7109_s7  ;;  %630 = vmatprep.mubr.f32.mxu1 %v7105_v19  ;;  %v519_v9 = vmul.f32 %v7315_v10, %v511_v8 }
 0x3a1   :  { %v527_v11 = vadd.f32 %v7321_v14, %v519_v9 }
 0x3a2   :  { %885 = vrot.lane.b32.xlu0 %v870_v47, %s7111_s14 }
 0x3a3   :  { %1002 = vrot.lane.b32.xlu1 %v987_v46, %s7112_s16  ;;  %5835 = vmatmul.mubr.msk.f32.gmra.mxu1 %vm458_vm4, %v527_v11 }
 0x3a6   :  { %881 = vrot.lane.b32.xlu0 %v614_v0, %s7111_s14 }
 0x3a7   :  { %1000 = vrot.lane.b32.xlu1 %v985_v48, %s7112_s16 }
 0x3aa   :  { %883 = vrot.lane.b32.xlu0 %v620_v2, %s7111_s14 }
 0x3ab   :  { %996 = vrot.lane.b32.xlu1 %v614_v0, %s7112_s16 }
 0x3ae   :  { %877 = vrot.lane.b32.xlu0 %v614_v0, %s7107_s15 }
 0x3af   :  { %998 = vrot.lane.b32.xlu1 %v620_v2, %s7112_s16 }
 0x3b2   :  { %992 = vrot.lane.b32.xlu0 %v614_v0, %s7108_s6 }
 0x3b3   :  { %879 = vrot.lane.b32.xlu1 %v620_v2, %s7107_s15 }
 0x3b7   :  { %994 = vrot.lane.b32.xlu1 %v620_v2, %s7108_s6 }
 0x400   :  { %v652_v10 = vpop.permute.xlu0 %651 }
 0x401   :  { %v767_v12 = vpop.permute.xlu1 %766 }
 0x404   :  { %v654_v13 = vpop.permute.xlu0 %653 }
 0x405   :  { %v763_v14 = vpop.permute.xlu1 %762  ;;  %6395 = vmatprep.subr.msk.mxu0 %vm356_vm0, %v654_v13 }
 0x406   :  { %6414 = vmatprep.mubr.msk.f32.mxu1 %vm356_vm0, %v763_v14  ;;  %6396 = vmatpush3.xpose.msk.msra.mxu0 %vm356_vm0, %v654_v13  ;;  %v454_v14 = vsub.s32 15, %v7201_v17 }
 0x407   :  { %6397 = vmatprep.subr.msk.mxu0 %vm356_vm0, %v652_v10 }
 0x408   :  { %v7434_v15 = vpop.permute.xlu0 %1006 }
 0x409   :  { %v769_v16 = vpop.permute.xlu1 %768 }
 0x40a   :  { %6410 = vmatprep.subr.msk.mxu1 %vm356_vm0, %v769_v16  ;;  %6398 = vmatpush3.xpose.msk.msra.mxu0 %vm356_vm0, %v652_v10 }
 0x40b   :  { %6411 = vmatpush3.xpose.msk.msra.mxu1 %vm356_vm0, %v769_v16  ;;  %6417 = vmatprep.subr.msk.mxu0 %vm356_vm0, %v7396_v57  ;;  %v1147_v16 = vand.u32 1, %v454_v14 }
 0x40c   :  { %6412 = vmatprep.subr.msk.mxu1 %vm356_vm0, %v767_v12  ;;  %v7442_v20 = vpop.permute.xlu0 %889 }
 0x40d   :  { %v7444_v21 = vpop.permute.xlu1 %1004  ;;  %6400 = vmatmul.mubr.msk.f32.vlgmr.msra.gmra.mxu0 %vm356_vm0, %v620_v2  ;;  %vm7574_vm13 = vcmp.ne.s32.totalorder %v1147_v16, 0 }
 0x40e   :  { %6418 = vmatpush3.xpose.msk.msra.mxu0 %vm356_vm0, %v7396_v57 }
 0x40f   :  { %6413 = vmatpush3.xpose.msk.msra.mxu1 %vm356_vm0, %v767_v12  ;;  %6419 = vmatprep.subr.msk.mxu0 %vm356_vm0, %v7442_v20 }
 0x410   :  { %6432 = vmatprep.subr.msk.mxu1 %vm356_vm0, %v7434_v15  ;;  %v7454_v22 = vpop.permute.xlu0 %887 }
 0x411   :  { %v765_v23 = vpop.permute.xlu1 %764 }
 0x412   :  { %6415 = vmatmul.mubr.msk.f32.vlgmr.msra.gmra.mxu1 %vm356_vm0, %v765_v23  ;;  %6420 = vmatpush3.xpose.msk.msra.mxu0 %vm356_vm0, %v7442_v20 }
 0x413   :  { %6433 = vmatpush3.xpose.msk.msra.mxu1 %vm356_vm0, %v7434_v15  ;;  %6421 = vmatprep.subr.msk.mxu0 %vm356_vm0, %v7454_v22 }
 0x414   :  { %6434 = vmatprep.subr.msk.mxu1 %vm356_vm0, %v7444_v21  ;;  %v7465_v24 = vpop.permute.xlu0 %885 }
 0x415   :  { %v7467_v25 = vpop.permute.xlu1 %1002 }
 0x416   :  { %6422 = vmatpush3.xpose.msk.msra.mxu0 %vm356_vm0, %v7454_v22 }
 0x417   :  { %6435 = vmatpush3.xpose.msk.msra.mxu1 %vm356_vm0, %v7444_v21  ;;  %6423 = vmatprep.subr.msk.mxu0 %vm356_vm0, %v7465_v24 }
 0x418   :  { %6436 = vmatprep.subr.msk.mxu1 %vm356_vm0, %v7467_v25  ;;  %v882_v26 = vpop.permute.xlu0 %881 }
 0x419   :  { %v7477_v27 = vpop.permute.xlu1 %1000 }
 0x41a   :  { %6424 = vmatpush3.xpose.msk.msra.mxu0 %vm356_vm0, %v7465_v24 }
 0x41b   :  { %6437 = vmatpush3.xpose.msk.msra.mxu1 %vm356_vm0, %v7467_v25 }
 0x41c   :  { %6438 = vmatprep.subr.msk.mxu1 %vm356_vm0, %v7477_v27  ;;  %v884_v29 = vpop.permute.xlu0 %883 }
 0x41d   :  { %v997_v30 = vpop.permute.xlu1 %996  ;;  %6425 = vmatprep.subr.msk.mxu0 %vm356_vm0, %v884_v29 }
 0x41e   :  { %6426 = vmatpush3.xpose.msk.msra.mxu0 %vm356_vm0, %v884_v29 }
 0x41f   :  { %6439 = vmatpush3.xpose.msk.msra.mxu1 %vm356_vm0, %v7477_v27  ;;  %6427 = vmatprep.subr.msk.mxu0 %vm356_vm0, %v882_v26 }
 0x420   :  { %v878_v34 = vpop.permute.xlu0 %877 }
 0x421   :  { %v999_v35 = vpop.permute.xlu1 %998  ;;  %6429 = vmatprep.mubr.msk.f32.mxu0 %vm356_vm0, %v878_v34 }
 0x422   :  { %6440 = vmatprep.subr.msk.mxu1 %vm356_vm0, %v999_v35  ;;  %6428 = vmatpush3.xpose.msk.msra.mxu0 %vm356_vm0, %v882_v26  ;;  %v455_v26 = vsub.s32 15, %v7204_v18 }
 0x423   :  { %6441 = vmatpush3.xpose.msk.msra.mxu1 %vm356_vm0, %v999_v35  ;;  %6447 = vmatprep.subr.mxu0 %v7491_v36 }
 0x424   :  { %6442 = vmatprep.subr.msk.mxu1 %vm356_vm0, %v997_v30  ;;  %v993_v37 = vpop.permute.xlu0 %992  ;;  %v1148_v34 = vand.u32 1, %v455_v26 }
 0x425   :  { %v880_v38 = vpop.permute.xlu1 %879  ;;  %6444 = vmatprep.mubr.msk.f32.mxu1 %vm356_vm0, %v993_v37 }
 0x426   :  { %6430 = vmatmul.mubr.msk.f32.vlgmr.msra.gmra.mxu0 %vm356_vm0, %v880_v38  ;;  %vm7582_vm14 = vcmp.ne.s32.totalorder %v1148_v34, 0  ;;  %v1161_v38 = vand.u32 2, %v454_v14 }
 0x427   :  { %6443 = vmatpush3.xpose.msk.msra.mxu1 %vm356_vm0, %v997_v30  ;;  %6448 = vmatpush3.msra.mxu0 %v7491_v36 }
 0x428   :  { %6449 = vmatprep.subr.mxu0 %v7401_v1  ;;  %6475 = vmatprep.subr.msk.mxu1 %vm356_vm0, %v7348_v49  ;;  %vm7589_vm15 = vcmp.ne.s32.totalorder %v1161_v38, 0 }
 0x429   :  { %6450 = vmatpush3.msra.mxu0 %v7401_v1  ;;  %v995_v39 = vpop.permute.xlu1 %994 }
 0x42a   :  { %6445 = vmatmul.mubr.msk.f32.vlgmr.msra.gmra.mxu1 %vm356_vm0, %v995_v39 }
 0x42b   :  { %6476 = vmatpush3.xpose.msk.msra.mxu1 %vm356_vm0, %v7348_v49 }
 0x42c   :  { %6477 = vmatprep.subr.msk.mxu1 %vm356_vm0, %v7354_v50 }
 0x42f   :  { %6478 = vmatpush3.xpose.msk.msra.mxu1 %vm356_vm0, %v7354_v50 }
 0x430   :  { %6479 = vmatprep.subr.msk.mxu1 %vm356_vm0, %v7372_v53 }
 0x433   :  { %6480 = vmatpush3.xpose.msk.msra.mxu1 %vm356_vm0, %v7372_v53 }
 0x434   :  { %6481 = vmatprep.subr.msk.mxu1 %vm356_vm0, %v7384_v55 }
 0x437   :  { %6482 = vmatpush3.xpose.msk.msra.mxu1 %vm356_vm0, %v7384_v55 }
 0x45e   :  { %v7521_v40 = vpop.f32.mrf.mxu1 }
 0x45f   :  { %6487 = vmatprep.mubr.msk.f32.mxu1 %vm356_vm0, %v7521_v40 }
 0x460   :  { %v7525_v41 = vpop.f32.mrf.mxu1 }
 0x463   :  { %v7527_v42 = vpop.f32.mrf.mxu1 }
 0x465   :  { %v7533_v45 = vpop.f32.mrf.mxu1 }
 0x4cd   :  { %v7529_v43 = vpop.f32.mrf.mxu0 }
 0x4cf   :  { %v7531_v44 = vpop.f32.mrf.mxu0 }
 0x4d0   :  { %1101 = vrot.lane.b32.xlu0 %v7531_v44, %s7109_s7 }
 0x4d2   :  { %v7537_v46 = vpop.f32.mrf.mxu1 }
 0x4d4   :  { %v7539_v47 = vpop.f32.mrf.mxu1 }
 0x4d5   :  { %1109 = vrot.lane.b32.xlu1 %v7539_v47, %s7113_s19 }
 0x4e6   :  { %v7543_v48 = vpop.f32.mrf.mxu0 }
 0x4e8   :  { %v7545_v58 = vpop.f32.mrf.mxu0 }
 0x4e9   :  { %1117 = vrot.lane.b32.xlu0 %v7545_v58, %s7114_s20 }
 0x4ea   :  { %v7549_v59 = vpop.f32.mrf.mxu1 }
 0x4ec   :  { %v7551_v60 = vpop.f32.mrf.mxu1 }
 0x4ed   :  { %1103 = vrot.lane.b32.xlu0 %v7529_v43, %s7109_s7  ;;  %1125 = vrot.lane.b32.xlu1 %v7551_v60, %s7115_s21 }
 0x4f1   :  { %1119 = vrot.lane.b32.xlu0 %v7543_v48, %s7114_s20  ;;  %1111 = vrot.lane.b32.xlu1 %v7537_v46, %s7113_s19 }
 0x4f5   :  { %1127 = vrot.lane.b32.xlu1 %v7549_v59, %s7115_s21 }
 0x542   :  { %v1102_v61 = vpop.permute.xlu0 %1101 }
 0x547   :  { %v1110_v62 = vpop.permute.xlu1 %1109 }
 0x548   :  { %v1132_v0 = vsel %vm1131_vm9, %v1102_v61, %v1110_v62  ;;  %v1162_v62 = vand.u32 2, %v455_v26 }
 0x54a   :  { %vm7596_vm2 = vcmp.ne.s32.totalorder %v1162_v62, 0 }
 0x55b   :  { %v1118_v63 = vpop.permute.xlu0 %1117 }
 0x55c   :  { %v1135_v2 = vsel %vm1134_vm10, %v1132_v0, %v1118_v63 }
 0x55f   :  { %v1104_v3 = vpop.permute.xlu0 %1103  ;;  %v1126_v4 = vpop.permute.xlu1 %1125 }
 0x560   :  { %v1138_v5 = vsel %vm1137_vm11, %v1135_v2, %v1126_v4 }
 0x561   :  { %v1141_v6 = vsel %vm1140_vm12, %v1138_v5, 0.0 }
 0x562   :  { %1143 = vrot.lane.b32.xlu0 %v1141_v6, %s7103_s17 }
 0x563   :  { %v1112_v7 = vpop.permute.xlu1 %1111  ;;  %v1120_v8 = vpop.permute.xlu0 %1119 }
 0x564   :  { %v1133_v9 = vsel %vm1131_vm9, %v1104_v3, %v1112_v7  ;;  %v1175_v3 = vand.u32 4, %v454_v14  ;;  %v1176_v7 = vand.u32 4, %v455_v26 }
 0x565   :  { %v1136_v11 = vsel %vm1134_vm10, %v1133_v9, %v1120_v8 }
 0x566   :  { %vm7603_vm3 = vcmp.ne.s32.totalorder %v1175_v3, 0  ;;  %vm7610_vm5 = vcmp.ne.s32.totalorder %v1176_v7, 0 }
 0x567   :  { %v1128_v10 = vpop.permute.xlu1 %1127 }
 0x568   :  { %v1139_v12 = vsel %vm1137_vm11, %v1136_v11, %v1128_v10 }
 0x569   :  { %v1142_v13 = vsel %vm1140_vm12, %v1139_v12, 0.0 }
 0x56a   :  { %1145 = vrot.lane.b32.xlu1 %v1142_v13, %s7103_s17 }
 0x5d4   :  { %v1144_v29 = vpop.permute.xlu0 %1143 }
 0x5d5   :  { %v1155_v30 = vsel %vm7574_vm13, %v1144_v29, %v1141_v6 }
 0x5d6   :  { %1157 = vrot.lane.b32.xlu0 %v1155_v30, %s7104_s18 }
 0x5dc   :  { %v1146_v37 = vpop.permute.xlu1 %1145 }
 0x5dd   :  { %v1156_v17 = vsel %vm7582_vm14, %v1146_v37, %v1142_v13 }
 0x5de   :  { %1159 = vrot.lane.b32.xlu1 %v1156_v17, %s7104_s18 }
 0x648   :  { %v1158_v39 = vpop.permute.xlu0 %1157 }
 0x649   :  { %v1169_v61 = vsel %vm7589_vm15, %v1158_v39, %v1155_v30 }
 0x64a   :  { %1171 = vrot.lane.b32.xlu0 %v1169_v61, %s7116_s22 }
 0x650   :  { %v1160_v0 = vpop.permute.xlu1 %1159 }
 0x651   :  { %v1170_v2 = vsel %vm7596_vm2, %v1160_v0, %v1156_v17 }
 0x652   :  { %1173 = vrot.lane.b32.xlu1 %v1170_v2, %s7116_s22 }
 0x6bc   :  { %v1172_v5 = vpop.permute.xlu0 %1171 }
 0x6bd   :  { %v1183_v6 = vsel %vm7603_vm3, %v1172_v5, %v1169_v61 }
 0x6be   :  { %1185 = vrot.lane.b32.xlu0 %v1183_v6, %s7117_s23 }
 0x6c4   :  { %v1174_v9 = vpop.permute.xlu1 %1173 }
 0x6c5   :  { %v1184_v11 = vsel %vm7610_vm5, %v1174_v9, %v1170_v2 }
 0x6c6   :  { %1310 = vrot.lane.b32.xlu0 %v1184_v11, %s7118_s24  ;;  %v1200_v10 = vadd.f32 %v7529_v43, %v1184_v11 }
 0x6c8   :  { %v1202_v12 = vmul.f32 0.25, %v1200_v10 }
 0x6ca   :  { %1431 = vrot.lane.b32.xlu0 %v1184_v11, %s7119_s25  ;;  %v1206_v13 = vsel %vm356_vm0, %v1202_v12, -inf }
 0x6ce   :  { %1550 = vrot.lane.b32.xlu0 %v1184_v11, %s8925_s26 }
 0x6ed   :  { %1207 = vmax.xlane.f32.xlu0 %v1206_v13 }
 0x730   :  { %v1186_v14 = vpop.permute.xlu0 %1185 }
 0x731   :  { %1308 = vrot.lane.b32.xlu1 %v1186_v14, %s7118_s24  ;;  %v1199_v26 = vadd.f32 %v1186_v14, %v7531_v44 }
 0x733   :  { %v1201_v34 = vmul.f32 0.25, %v1199_v26 }
 0x735   :  { %1429 = vrot.lane.b32.xlu1 %v1186_v14, %s7119_s25  ;;  %v1203_v17 = vsel %vm356_vm0, %v1201_v34, -inf }
 0x738   :  { %v1311_v16 = vpop.permute.xlu0 %1310 }
 0x739   :  { %1548 = vrot.lane.b32.xlu1 %v1186_v14, %s8925_s26  ;;  %v1315_v30 = vadd.f32 %v7537_v46, %v1311_v16 }
 0x73b   :  { %v1317_v37 = vmul.f32 0.25, %v1315_v30 }
 0x73c   :  { %v1432_v29 = vpop.permute.xlu0 %1431 }
 0x73d   :  { %v1436_v43 = vadd.f32 %v7543_v48, %v1432_v29  ;;  %v1321_v62 = vsel %vm356_vm0, %v1317_v37, -inf }
 0x73f   :  { %v1438_v39 = vmul.f32 0.25, %v1436_v43 }
 0x740   :  { %v1551_v38 = vpop.permute.xlu0 %1550 }
 0x741   :  { %v1555_v61 = vadd.f32 %v7549_v59, %v1551_v38  ;;  %v1442_v44 = vsel %vm356_vm0, %v1438_v39, -inf }
 0x743   :  { %v1557_v0 = vmul.f32 0.25, %v1555_v61 }
 0x745   :  { %v1561_v46 = vsel %vm356_vm0, %v1557_v0, -inf }
 0x75d   :  { %1204 = vmax.xlane.f32.xlu1 %v1203_v17 }
 0x761   :  { %1322 = vmax.xlane.f32.xlu1 %v1321_v62 }
 0x765   :  { %1443 = vmax.xlane.f32.xlu1 %v1442_v44 }
 0x769   :  { %1562 = vmax.xlane.f32.xlu1 %v1561_v46 }
 0x776   :  { %v1208_v2 = vpop.xlane.xlu0 %1207 }
 0x777   :  { %v1210_v3 = vsub.f32 %v1202_v12, %v1208_v2 }
 0x779   :  { %v1213_v48 = vmul.f32 1.442695, %v1210_v3 }
 0x77b   :  { %6922 = vpow2.f32 %v1213_v48 }
 0x788   :  { %v7632_v5 = vpop.eup %6922 }
 0x789   :  { %v1218_v6 = vsel %vm356_vm0, %v7632_v5, 0.0 }
 0x78a   :  { %1219 = vadd.xlane.f32.xlu1 %v1218_v6 }
 0x79b   :  { %1342 = vrot.lane.b32.xlu1 %v7401_v1, %s7109_s7 }
 0x79f   :  { %1463 = vrot.lane.b32.xlu1 %v7491_v36, %s7107_s15 }
 0x7a3   :  { %v1309_v59 = vpop.permute.xlu1 %1308 }
 0x7a4   :  { %v1314_v7 = vadd.f32 %v1309_v59, %v7539_v47 }
 0x7a6   :  { %v1316_v9 = vmul.f32 0.25, %v1314_v7 }
 0x7a7   :  { %v1430_v11 = vpop.permute.xlu1 %1429 }
 0x7a8   :  { %v1435_v10 = vadd.f32 %v1430_v11, %v7545_v58  ;;  %v1318_v12 = vsel %vm356_vm0, %v1316_v9, -inf }
 0x7a9   :  { %1319 = vmax.xlane.f32.xlu0 %v1318_v12 }
 0x7aa   :  { %v1437_v13 = vmul.f32 0.25, %v1435_v10 }
 0x7ab   :  { %v1549_v14 = vpop.permute.xlu1 %1548 }
 0x7ac   :  { %v1554_v16 = vadd.f32 %v1549_v14, %v7551_v60  ;;  %v1439_v26 = vsel %vm356_vm0, %v1437_v13, -inf }
 0x7ad   :  { %1440 = vmax.xlane.f32.xlu0 %v1439_v26 }
 0x7ae   :  { %v1556_v29 = vmul.f32 0.25, %v1554_v16 }
 0x7b0   :  { %v1558_v30 = vsel %vm356_vm0, %v1556_v29, -inf }
 0x7b1   :  { %1559 = vmax.xlane.f32.xlu0 %v1558_v30 }
 0x7c7   :  { %1344 = vrot.lane.b32.xlu0 %v7491_v36, %s7109_s7 }
 0x7cb   :  { %1461 = vrot.lane.b32.xlu0 %v7401_v1, %s7107_s15 }
 0x7e6   :  { %v1205_v47 = vpop.xlane.xlu1 %1204 }
 0x7e7   :  { %v1209_v58 = vsub.f32 %v1201_v34, %v1205_v47 }
 0x7e9   :  { %v1211_v43 = vmul.f32 1.442695, %v1209_v58 }
 0x7ea   :  { %v1323_v17 = vpop.xlane.xlu1 %1322 }
 0x7eb   :  { %6924 = vpow2.f32 %v1211_v43  ;;  %v1325_v38 = vsub.f32 %v1317_v37, %v1323_v17 }
 0x7ed   :  { %v1328_v60 = vmul.f32 1.442695, %v1325_v38 }
 0x7ee   :  { %v1444_v61 = vpop.xlane.xlu1 %1443 }
 0x7ef   :  { %6926 = vpow2.f32 %v1328_v60  ;;  %v1446_v62 = vsub.f32 %v1438_v39, %v1444_v61 }
 0x7f1   :  { %v1449_v44 = vmul.f32 1.442695, %v1446_v62 }
 0x7f2   :  { %v1563_v46 = vpop.xlane.xlu1 %1562 }
 0x7f3   :  { %6928 = vpow2.f32 %v1449_v44  ;;  %v1565_v2 = vsub.f32 %v1557_v0, %v1563_v46 }
 0x7f5   :  { %v1568_v3 = vmul.f32 1.442695, %v1565_v2 }
 0x7f7   :  { %6930 = vpow2.f32 %v1568_v3 }
 0x7f8   :  { %v7650_v48 = vpop.eup %6924 }
 0x7f9   :  { %v1215_v6 = vsel %vm356_vm0, %v7650_v48, 0.0 }
 0x7fa   :  { %1216 = vadd.xlane.f32.xlu0 %v1215_v6 }
 0x7fc   :  { %v7654_v34 = vpop.eup %6926 }
 0x7fd   :  { %v1333_v37 = vsel %vm356_vm0, %v7654_v34, 0.0 }
 0x7fe   :  { %1334 = vadd.xlane.f32.xlu1 %v1333_v37 }
 0x800   :  { %v7658_v59 = vpop.eup %6928 }
 0x801   :  { %v1454_v39 = vsel %vm356_vm0, %v7658_v59, 0.0 }
 0x802   :  { %1455 = vadd.xlane.f32.xlu1 %v1454_v39 }
 0x804   :  { %v7662_v0 = vpop.eup %6930 }
 0x805   :  { %v1573_v7 = vsel %vm356_vm0, %v7662_v0, 0.0 }
 0x806   :  { %1574 = vadd.xlane.f32.xlu1 %v1573_v7 }
 0x813   :  { %v1220_v60 = vpop.xlane.xlu1 %1219 }
 0x817   :  { %1582 = vrot.lane.b32.xlu1 %v7491_v36, %s7108_s6 }
 0x81b   :  { %1701 = vrot.lane.b32.xlu1 %v7527_v42, %s7106_s12 }
 0x81f   :  { %1699 = vrot.lane.b32.xlu1 %v7521_v40, %s7106_s12 }
 0x823   :  { %1786 = vrot.lane.b32.xlu1 %v7521_v40, %s7109_s7 }
 0x827   :  { %1883 = vrot.lane.b32.xlu1 %v7527_v42, %s7111_s14 }
 0x82b   :  { %1881 = vrot.lane.b32.xlu1 %v7521_v40, %s7111_s14 }
 0x82f   :  { %1877 = vrot.lane.b32.xlu1 %v7521_v40, %s7107_s15 }
 0x832   :  { %v1320_v11 = vpop.xlane.xlu0 %1319 }
 0x833   :  { %v1324_v36 = vsub.f32 %v1316_v9, %v1320_v11  ;;  %1968 = vrot.lane.b32.xlu1 %v7521_v40, %s7108_s6 }
 0x835   :  { %v1326_v10 = vmul.f32 1.442695, %v1324_v36 }
 0x836   :  { %v1441_v12 = vpop.xlane.xlu0 %1440 }
 0x837   :  { %6932 = vpow2.f32 %v1326_v10  ;;  %v1445_v14 = vsub.f32 %v1437_v13, %v1441_v12 }
 0x839   :  { %v1447_v16 = vmul.f32 1.442695, %v1445_v14 }
 0x83a   :  { %v1560_v26 = vpop.xlane.xlu0 %1559 }
 0x83b   :  { %6934 = vpow2.f32 %v1447_v16  ;;  %v1564_v30 = vsub.f32 %v1556_v29, %v1560_v26 }
 0x83d   :  { %v1566_v47 = vmul.f32 1.442695, %v1564_v30 }
 0x83e   :  { %v1345_v58 = vpop.permute.xlu0 %1344 }
 0x83f   :  { %6936 = vpow2.f32 %v1566_v47  ;;  %6454 = vmatprep.subr.mxu0 %v1345_v58 }
 0x840   :  { %6938 = vrcp.f32 %v1220_v60 }
 0x842   :  { %v7708_v61 = vpop.permute.xlu0 %1461 }
 0x844   :  { %v7682_v43 = vpop.eup %6932 }
 0x845   :  { %v1330_v9 = vsel %vm356_vm0, %v7682_v43, 0.0 }
 0x846   :  { %1331 = vadd.xlane.f32.xlu0 %v1330_v9 }
 0x848   :  { %v7686_v17 = vpop.eup %6934 }
 0x849   :  { %v1451_v38 = vsel %vm356_vm0, %v7686_v17, 0.0 }
 0x84a   :  { %1452 = vadd.xlane.f32.xlu0 %v1451_v38 }
 0x84c   :  { %v7690_v13 = vpop.eup %6936 }
 0x84d   :  { %v1570_v29 = vsel %vm356_vm0, %v7690_v13, 0.0  ;;  %v6939_v6 = vpop.eup %6938 }
 0x84e   :  { %1571 = vadd.xlane.f32.xlu0 %v1570_v29  ;;  %v1224_v7 = vmul.f32 %v6939_v6, %v7632_v5 }
 0x864   :  { %1580 = vrot.lane.b32.xlu0 %v7401_v1, %s7108_s6  ;;  %v1343_v1 = vpop.permute.xlu1 %1342 }
 0x868   :  { %1792 = vrot.lane.b32.xlu0 %v7527_v42, %s7110_s13  ;;  %v1464_v62 = vpop.permute.xlu1 %1463 }
 0x86c   :  { %1790 = vrot.lane.b32.xlu0 %v7521_v40, %s7110_s13 }
 0x870   :  { %1788 = vrot.lane.b32.xlu0 %v7527_v42, %s7109_s7 }
 0x874   :  { %1974 = vrot.lane.b32.xlu0 %v7527_v42, %s7112_s16 }
 0x878   :  { %1972 = vrot.lane.b32.xlu0 %v7521_v40, %s7112_s16 }
 0x87c   :  { %1879 = vrot.lane.b32.xlu0 %v7527_v42, %s7107_s15 }
 0x880   :  { %1970 = vrot.lane.b32.xlu0 %v7527_v42, %s7108_s6 }
 0x883   :  { %v1217_v44 = vpop.xlane.xlu0 %1216 }
 0x884   :  { %6940 = vrcp.f32 %v1217_v44 }
 0x887   :  { %v1335_v46 = vpop.xlane.xlu1 %1334 }
 0x888   :  { %6942 = vrcp.f32 %v1335_v46 }
 0x88b   :  { %v1456_v2 = vpop.xlane.xlu1 %1455 }
 0x88f   :  { %v1575_v3 = vpop.xlane.xlu1 %1574 }
 0x891   :  { %v6941_v37 = vpop.eup %6940 }
 0x892   :  { %v1223_v40 = vmul.f32 %v6941_v37, %v7650_v48 }
 0x893   :  { %v7713_v39 = vpop.permute.xlu1 %1582 }
 0x894   :  { %6451 = vmatprep.mubr.msk.f32.mxu0 %vm356_vm0, %v1223_v40 }
 0x895   :  { %6452 = vmatmul.mubr.msk.f32.vlgmr.msra.gmra.mxu0 %vm356_vm0, %v1224_v7  ;;  %v6943_v30 = vpop.eup %6942 }
 0x896   :  { %6455 = vmatpush3.msra.mxu0 %v1345_v58  ;;  %v1339_v38 = vmul.f32 %v6943_v30, %v7654_v34 }
 0x897   :  { %6456 = vmatprep.subr.mxu0 %v1343_v1  ;;  %v1702_v11 = vpop.permute.xlu1 %1701 }
 0x898   :  { %6457 = vmatpush3.msra.mxu0 %v1343_v1  ;;  %6483 = vmatprep.subr.msk.mxu1 %vm356_vm0, %v1702_v11 }
 0x899   :  { %6461 = vmatprep.subr.mxu0 %v1464_v62  ;;  %6484 = vmatpush3.xpose.msk.msra.mxu1 %vm356_vm0, %v1702_v11 }
 0x89b   :  { %v1700_v36 = vpop.permute.xlu1 %1699 }
 0x89c   :  { %6485 = vmatprep.subr.msk.mxu1 %vm356_vm0, %v1700_v36 }
 0x89d   :  { %6486 = vmatpush3.xpose.msk.msra.mxu1 %vm356_vm0, %v1700_v36 }
 0x89e   :  { %6505 = vmatprep.subr.msk.mxu1 %vm356_vm0, %v7396_v57 }
 0x89f   :  { %v1787_v5 = vpop.permute.xlu1 %1786 }
 0x8a0   :  { %6488 = vmatmul.mubr.msk.f32.vlgmr.msra.gmra.mxu1 %vm356_vm0, %v7527_v42 }
 0x8a1   :  { %6506 = vmatpush3.xpose.msk.msra.mxu1 %vm356_vm0, %v7396_v57 }
 0x8a2   :  { %6507 = vmatprep.subr.msk.mxu1 %vm356_vm0, %v7442_v20 }
 0x8a3   :  { %v1884_v48 = vpop.permute.xlu1 %1883 }
 0x8a5   :  { %6508 = vmatpush3.xpose.msk.msra.mxu1 %vm356_vm0, %v7442_v20 }
 0x8a6   :  { %6509 = vmatprep.subr.msk.mxu1 %vm356_vm0, %v7454_v22 }
 0x8a7   :  { %v1882_v10 = vpop.permute.xlu1 %1881 }
 0x8a9   :  { %6510 = vmatpush3.xpose.msk.msra.mxu1 %vm356_vm0, %v7454_v22 }
 0x8aa   :  { %6511 = vmatprep.subr.msk.mxu1 %vm356_vm0, %v7465_v24 }
 0x8ab   :  { %v1878_v42 = vpop.permute.xlu1 %1877 }
 0x8ac   :  { %6517 = vmatprep.mubr.msk.f32.mxu1 %vm356_vm0, %v1878_v42 }
 0x8ad   :  { %6512 = vmatpush3.xpose.msk.msra.mxu1 %vm356_vm0, %v7465_v24 }
 0x8ae   :  { %6513 = vmatprep.subr.msk.mxu1 %vm356_vm0, %v1884_v48 }
 0x8b1   :  { %6514 = vmatpush3.xpose.msk.msra.mxu1 %vm356_vm0, %v1884_v48 }
 0x8b2   :  { %6515 = vmatprep.subr.msk.mxu1 %vm356_vm0, %v1882_v10 }
 0x8b5   :  { %6516 = vmatpush3.xpose.msk.msra.mxu1 %vm356_vm0, %v1882_v10 }
 0x8b6   :  { %6535 = vmatprep.subr.mxu1 %v7533_v45 }
 0x8cf   :  { %v1332_v12 = vpop.xlane.xlu0 %1331 }
 0x8d0   :  { %6944 = vrcp.f32 %v1332_v12 }
 0x8d1   :  { %6946 = vrcp.f32 %v1456_v2 }
 0x8d3   :  { %v1453_v14 = vpop.xlane.xlu0 %1452 }
 0x8d4   :  { %6948 = vrcp.f32 %v1453_v14 }
 0x8d5   :  { %6950 = vrcp.f32 %v1575_v3 }
 0x8d7   :  { %v1572_v16 = vpop.xlane.xlu0 %1571 }
 0x8d8   :  { %6952 = vrcp.f32 %v1572_v16 }
 0x8db   :  { %v1581_v26 = vpop.permute.xlu0 %1580 }
 0x8dd   :  { %v6945_v47 = vpop.eup %6944 }
 0x8de   :  { %v1338_v58 = vmul.f32 %v6945_v47, %v7682_v43  ;;  %v6947_v29 = vpop.eup %6946 }
 0x8df   :  { %v1793_v9 = vpop.permute.xlu0 %1792  ;;  %v1460_v46 = vmul.f32 %v6947_v29, %v7658_v59 }
 0x8e0   :  { %6458 = vmatprep.mubr.msk.f32.mxu0 %vm356_vm0, %v1338_v58 }
 0x8e1   :  { %v6949_v60 = vpop.eup %6948  ;;  %6459 = vmatmul.mubr.msk.f32.vlgmr.msra.gmra.mxu0 %vm356_vm0, %v1339_v38 }
 0x8e2   :  { %6462 = vmatpush3.msra.mxu0 %v1464_v62  ;;  %v1459_v1 = vmul.f32 %v6949_v60, %v7686_v17  ;;  %v6951_v2 = vpop.eup %6950 }
 0x8e3   :  { %6463 = vmatprep.subr.mxu0 %v7708_v61  ;;  %v1791_v44 = vpop.permute.xlu0 %1790  ;;  %v1579_v62 = vmul.f32 %v6951_v2, %v7662_v0 }
 0x8e4   :  { %6464 = vmatpush3.msra.mxu0 %v7708_v61  ;;  %6465 = vmatprep.mubr.msk.f32.mxu0 %vm356_vm0, %v1459_v1  ;;  %v1969_v61 = vpop.permute.xlu1 %1968 }
 0x8e5   :  { %v6953_v34 = vpop.eup %6952  ;;  %6468 = vmatprep.subr.mxu0 %v7713_v39  ;;  %6466 = vmatmul.mubr.msk.f32.vlgmr.msra.gmra.mxu0 %vm356_vm0, %v1460_v46 }
 0x8e6   :  { %6469 = vmatpush3.msra.mxu0 %v7713_v39  ;;  %v1578_v43 = vmul.f32 %v6953_v34, %v7690_v13 }
 0x8e7   :  { %6470 = vmatprep.subr.mxu0 %v1581_v26  ;;  %v1789_v17 = vpop.permute.xlu0 %1788 }
 0x8e8   :  { %6471 = vmatpush3.msra.mxu0 %v1581_v26  ;;  %6472 = vmatprep.mubr.msk.f32.mxu0 %vm356_vm0, %v1578_v43 }
 0x8e9   :  { %6490 = vmatprep.subr.msk.mxu0 %vm356_vm0, %v7356_v51  ;;  %6473 = vmatmul.mubr.msk.f32.vlgmr.msra.gmra.mxu0 %vm356_vm0, %v1579_v62 }
 0x8ea   :  { %6491 = vmatpush3.xpose.msk.msra.mxu0 %vm356_vm0, %v7356_v51  ;;  %6502 = vmatprep.mubr.msk.f32.mxu0 %vm356_vm0, %v1787_v5 }
 0x8eb   :  { %6492 = vmatprep.subr.msk.mxu0 %vm356_vm0, %v7366_v52  ;;  %v1975_v59 = vpop.permute.xlu0 %1974 }
 0x8ee   :  { %6493 = vmatpush3.xpose.msk.msra.mxu0 %vm356_vm0, %v7366_v52 }
 0x8ef   :  { %6494 = vmatprep.subr.msk.mxu0 %vm356_vm0, %v7378_v54  ;;  %v1973_v0 = vpop.permute.xlu0 %1972 }
 0x8f2   :  { %6495 = vmatpush3.xpose.msk.msra.mxu0 %vm356_vm0, %v7378_v54 }
 0x8f3   :  { %6496 = vmatprep.subr.msk.mxu0 %vm356_vm0, %v7390_v56  ;;  %v1880_v13 = vpop.permute.xlu0 %1879 }
 0x8f4   :  { %6518 = vmatmul.mubr.msk.f32.vlgmr.msra.gmra.mxu1 %vm356_vm0, %v1880_v13 }
 0x8f5   :  { %6536 = vmatpush3.msra.mxu1 %v7533_v45 }
 0x8f6   :  { %6497 = vmatpush3.xpose.msk.msra.mxu0 %vm356_vm0, %v7390_v56  ;;  %6537 = vmatprep.subr.mxu1 %v7525_v41 }
 0x8f7   :  { %6498 = vmatprep.subr.msk.mxu0 %vm356_vm0, %v1793_v9  ;;  %6538 = vmatpush3.msra.mxu1 %v7525_v41  ;;  %v1971_v3 = vpop.permute.xlu0 %1970 }
 0x8fa   :  { %6499 = vmatpush3.xpose.msk.msra.mxu0 %vm356_vm0, %v1793_v9 }
 0x8fb   :  { %6500 = vmatprep.subr.msk.mxu0 %vm356_vm0, %v1791_v44 }
 0x8fe   :  { %6501 = vmatpush3.xpose.msk.msra.mxu0 %vm356_vm0, %v1791_v44 }
 0x8ff   :  { %6520 = vmatprep.subr.msk.mxu0 %vm356_vm0, %v7434_v15 }
 0x901   :  { %6503 = vmatmul.mubr.msk.f32.vlgmr.msra.gmra.mxu0 %vm356_vm0, %v1789_v17 }
 0x902   :  { %6521 = vmatpush3.xpose.msk.msra.mxu0 %vm356_vm0, %v7434_v15  ;;  %6532 = vmatprep.mubr.msk.f32.mxu0 %vm356_vm0, %v1969_v61 }
 0x903   :  { %6522 = vmatprep.subr.msk.mxu0 %vm356_vm0, %v7444_v21 }
 0x906   :  { %6523 = vmatpush3.xpose.msk.msra.mxu0 %vm356_vm0, %v7444_v21 }
 0x907   :  { %6524 = vmatprep.subr.msk.mxu0 %vm356_vm0, %v7467_v25 }
 0x90a   :  { %6525 = vmatpush3.xpose.msk.msra.mxu0 %vm356_vm0, %v7467_v25 }
 0x90b   :  { %6526 = vmatprep.subr.msk.mxu0 %vm356_vm0, %v7477_v27 }
 0x90e   :  { %6527 = vmatpush3.xpose.msk.msra.mxu0 %vm356_vm0, %v7477_v27 }
 0x90f   :  { %6528 = vmatprep.subr.msk.mxu0 %vm356_vm0, %v1975_v59 }
 0x912   :  { %6529 = vmatpush3.xpose.msk.msra.mxu0 %vm356_vm0, %v1975_v59 }
 0x913   :  { %6530 = vmatprep.subr.msk.mxu0 %vm356_vm0, %v1973_v0 }
 0x916   :  { %6531 = vmatpush3.xpose.msk.msra.mxu0 %vm356_vm0, %v1973_v0 }
 0x919   :  { %6533 = vmatmul.mubr.msk.f32.vlgmr.msra.gmra.mxu0 %vm356_vm0, %v1971_v3 }
 0x955   :  { %v7814_v40 = vpop.f32.mrf.mxu0 }
 0x957   :  { %v7816_v39 = vpop.f32.mrf.mxu0 }
 0x960   :  { %v6489_v6 = vpop.f32.mrf.mxu1 }
 0x962   :  { %v7810_v37 = vpop.f32.mrf.mxu1 }
 0x963   :  { %2061 = vrot.lane.b32.xlu1 %v7810_v37, %s7109_s7 }
 0x9a1   :  { %v7818_v7 = vpop.f32.mrf.mxu0 }
 0x9a3   :  { %v7820_v11 = vpop.f32.mrf.mxu0 }
 0x9a5   :  { %v7822_v36 = vpop.f32.mrf.mxu0 }
 0x9a7   :  { %v7828_v10 = vpop.f32.mrf.mxu0 }
 0x9a9   :  { %v7832_v42 = vpop.f32.mrf.mxu0 }
 0x9ab   :  { %v7835_v12 = vpop.f32.mrf.mxu0 }
 0x9b4   :  { %v7824_v5 = vpop.f32.mrf.mxu1 }
 0x9b6   :  { %v7826_v48 = vpop.f32.mrf.mxu1 }
 0x9b7   :  { %2077 = vrot.lane.b32.xlu1 %v7826_v48, %s7114_s20 }
 0x9bb   :  { %2063 = vrot.lane.b32.xlu1 %v6489_v6, %s7109_s7 }
 0x9bf   :  { %2079 = vrot.lane.b32.xlu1 %v7824_v5, %s7114_s20 }
 0x9c1   :  { %v6504_v14 = vpop.f32.mrf.mxu0 }
 0x9c3   :  { %v7839_v16 = vpop.f32.mrf.mxu0 }
 0x9c4   :  { %2069 = vrot.lane.b32.xlu0 %v7839_v16, %s7113_s19 }
 0x9d5   :  { %v2062_v47 = vpop.permute.xlu1 %2061 }
 0x9d9   :  { %v7843_v26 = vpop.f32.mrf.mxu0 }
 0x9db   :  { %v7845_v30 = vpop.f32.mrf.mxu0 }
 0x9dc   :  { %2085 = vrot.lane.b32.xlu0 %v7845_v30, %s7115_s21 }
 0x9e0   :  { %2071 = vrot.lane.b32.xlu0 %v6504_v14, %s7113_s19 }
 0x9e4   :  { %2087 = vrot.lane.b32.xlu0 %v7843_v26, %s7115_s21 }
 0xa29   :  { %v2078_v9 = vpop.permute.xlu1 %2077 }
 0xa2d   :  { %v2064_v1 = vpop.permute.xlu1 %2063 }
 0xa31   :  { %v2080_v43 = vpop.permute.xlu1 %2079 }
 0xa36   :  { %v2070_v58 = vpop.permute.xlu0 %2069 }
 0xa37   :  { %v2091_v38 = vsel %vm1131_vm9, %v2062_v47, %v2070_v58 }
 0xa38   :  { %v2093_v60 = vsel %vm1134_vm10, %v2091_v38, %v2078_v9 }
 0xa4e   :  { %v2086_v29 = vpop.permute.xlu0 %2085 }
 0xa4f   :  { %v2095_v44 = vsel %vm1137_vm11, %v2093_v60, %v2086_v29 }
 0xa50   :  { %v2097_v46 = vsel %vm1140_vm12, %v2095_v44, 0.0 }
 0xa51   :  { %2099 = vrot.lane.b32.xlu1 %v2097_v46, %s7103_s17 }
 0xa52   :  { %v2072_v2 = vpop.permute.xlu0 %2071 }
 0xa53   :  { %v2092_v34 = vsel %vm1131_vm9, %v2064_v1, %v2072_v2 }
 0xa54   :  { %v2094_v62 = vsel %vm1134_vm10, %v2092_v34, %v2080_v43 }
 0xa56   :  { %v2088_v17 = vpop.permute.xlu0 %2087 }
 0xa57   :  { %v2096_v59 = vsel %vm1137_vm11, %v2094_v62, %v2088_v17 }
 0xa58   :  { %v2098_v0 = vsel %vm1140_vm12, %v2096_v59, 0.0 }
 0xa59   :  { %2101 = vrot.lane.b32.xlu0 %v2098_v0, %s7103_s17 }
 0xac3   :  { %v2100_v13 = vpop.permute.xlu1 %2099 }
 0xac4   :  { %v2103_v61 = vsel %vm7574_vm13, %v2100_v13, %v2097_v46 }
 0xac5   :  { %2105 = vrot.lane.b32.xlu1 %v2103_v61, %s7104_s18 }
 0xacb   :  { %v2102_v3 = vpop.permute.xlu0 %2101 }
 0xacc   :  { %v2104_v47 = vsel %vm7582_vm14, %v2102_v3, %v2098_v0 }
 0xacd   :  { %2107 = vrot.lane.b32.xlu0 %v2104_v47, %s7104_s18 }
 0xb37   :  { %v2106_v58 = vpop.permute.xlu1 %2105 }
 0xb38   :  { %v2109_v9 = vsel %vm7589_vm15, %v2106_v58, %v2103_v61 }
 0xb39   :  { %2111 = vrot.lane.b32.xlu1 %v2109_v9, %s7116_s22 }
 0xb3f   :  { %v2108_v38 = vpop.permute.xlu0 %2107 }
 0xb40   :  { %v2110_v29 = vsel %vm7596_vm2, %v2108_v38, %v2104_v47 }
 0xb41   :  { %2113 = vrot.lane.b32.xlu0 %v2110_v29, %s7116_s22 }
 0xbab   :  { %v2112_v60 = vpop.permute.xlu1 %2111 }
 0xbac   :  { %v2115_v1 = vsel %vm7603_vm3, %v2112_v60, %v2109_v9 }
 0xbad   :  { %2117 = vrot.lane.b32.xlu1 %v2115_v1, %s7117_s23 }
 0xbb3   :  { %v2114_v44 = vpop.permute.xlu0 %2113 }
 0xbb4   :  { %v2116_v46 = vsel %vm7610_vm5, %v2114_v44, %v2110_v29 }
 0xbb5   :  { %2234 = vrot.lane.b32.xlu1 %v2116_v46, %s7118_s24  ;;  %v2124_v2 = vadd.f32 %v6489_v6, %v2116_v46 }
 0xbb7   :  { %v2126_v34 = vmul.f32 0.25, %v2124_v2 }
 0xbb9   :  { %2355 = vrot.lane.b32.xlu1 %v2116_v46, %s7119_s25  ;;  %v2130_v43 = vsel %vm356_vm0, %v2126_v34, -inf }
 0xbbd   :  { %2474 = vrot.lane.b32.xlu1 %v2116_v46, %s8925_s26 }
 0xbe1   :  { %2131 = vmax.xlane.f32.xlu1 %v2130_v43 }
 0xc1f   :  { %v2118_v17 = vpop.permute.xlu1 %2117 }
 0xc20   :  { %2232 = vrot.lane.b32.xlu0 %v2118_v17, %s7118_s24  ;;  %v2123_v13 = vadd.f32 %v2118_v17, %v7810_v37 }
 0xc22   :  { %v2125_v3 = vmul.f32 0.25, %v2123_v13 }
 0xc24   :  { %2353 = vrot.lane.b32.xlu0 %v2118_v17, %s7119_s25  ;;  %v2127_v6 = vsel %vm356_vm0, %v2125_v3, -inf }
 0xc27   :  { %v2235_v62 = vpop.permute.xlu1 %2234 }
 0xc28   :  { %2472 = vrot.lane.b32.xlu0 %v2118_v17, %s8925_s26  ;;  %v2239_v59 = vadd.f32 %v6504_v14, %v2235_v62 }
 0xc2a   :  { %v2241_v0 = vmul.f32 0.25, %v2239_v59 }
 0xc2b   :  { %v2356_v47 = vpop.permute.xlu1 %2355 }
 0xc2c   :  { %v2245_v61 = vsel %vm356_vm0, %v2241_v0, -inf  ;;  %v2360_v1 = vadd.f32 %v7824_v5, %v2356_v47 }
 0xc2e   :  { %v2362_v46 = vmul.f32 0.25, %v2360_v1 }
 0xc2f   :  { %v2475_v58 = vpop.permute.xlu1 %2474 }
 0xc30   :  { %v2479_v2 = vadd.f32 %v7843_v26, %v2475_v58 }
 0xc47   :  { %2246 = vmax.xlane.f32.xlu0 %v2245_v61  ;;  %v2366_v61 = vsel %vm356_vm0, %v2362_v46, -inf }
 0xc4b   :  { %2128 = vmax.xlane.f32.xlu0 %v2127_v6 }
 0xc6a   :  { %v2132_v9 = vpop.xlane.xlu1 %2131 }
 0xc6b   :  { %v2134_v38 = vsub.f32 %v2126_v34, %v2132_v9  ;;  %v2481_v34 = vmul.f32 0.25, %v2479_v2 }
 0xc6d   :  { %v2137_v29 = vmul.f32 1.442695, %v2134_v38  ;;  %v2485_v26 = vsel %vm356_vm0, %v2481_v34, -inf }
 0xc6f   :  { %6954 = vpow2.f32 %v2137_v29 }
 0xc92   :  { %v2233_v60 = vpop.permute.xlu0 %2232 }
 0xc93   :  { %v2238_v14 = vadd.f32 %v2233_v60, %v7839_v16 }
 0xc95   :  { %v2240_v44 = vmul.f32 0.25, %v2238_v14 }
 0xc96   :  { %v2354_v37 = vpop.permute.xlu0 %2353 }
 0xc97   :  { %v2359_v43 = vadd.f32 %v2354_v37, %v7826_v48  ;;  %v2242_v17 = vsel %vm356_vm0, %v2240_v44, -inf  ;;  %v7899_v48 = vpop.eup %6954 }
 0xc98   :  { %2243 = vmax.xlane.f32.xlu0 %v2242_v17  ;;  %v2142_v47 = vsel %vm356_vm0, %v7899_v48, 0.0 }
 0xc99   :  { %v2361_v62 = vmul.f32 0.25, %v2359_v43 }
 0xc9a   :  { %v2473_v59 = vpop.permute.xlu0 %2472 }
 0xc9b   :  { %v2478_v13 = vadd.f32 %v2473_v59, %v7845_v30  ;;  %v2363_v5 = vsel %vm356_vm0, %v2361_v62, -inf }
 0xc9c   :  { %2364 = vmax.xlane.f32.xlu1 %v2363_v5  ;;  %2367 = vmax.xlane.f32.xlu0 %v2366_v61 }
 0xc9d   :  { %v2480_v16 = vmul.f32 0.25, %v2478_v13 }
 0xc9f   :  { %v2482_v6 = vsel %vm356_vm0, %v2480_v16, -inf }
 0xca0   :  { %2483 = vmax.xlane.f32.xlu1 %v2482_v6  ;;  %2486 = vmax.xlane.f32.xlu0 %v2485_v26 }
 0xca4   :  { %2143 = vadd.xlane.f32.xlu0 %v2142_v47 }
 0xcb1   :  { %2268 = vrot.lane.b32.xlu1 %v7533_v45, %s7109_s7 }
 0xcb5   :  { %2387 = vrot.lane.b32.xlu1 %v7533_v45, %s7107_s15 }
 0xcb9   :  { %2506 = vrot.lane.b32.xlu1 %v7533_v45, %s7108_s6 }
 0xcba   :  { %2266 = vrot.lane.b32.xlu0 %v7525_v41, %s7109_s7 }
 0xcd0   :  { %v2247_v30 = vpop.xlane.xlu0 %2246 }
 0xcd1   :  { %v2249_v58 = vsub.f32 %v2241_v0, %v2247_v30 }
 0xcd3   :  { %v2252_v9 = vmul.f32 1.442695, %v2249_v58 }
 0xcd4   :  { %v2129_v38 = vpop.xlane.xlu0 %2128 }
 0xcd5   :  { %6956 = vpow2.f32 %v2252_v9  ;;  %v2133_v29 = vsub.f32 %v2125_v3, %v2129_v38 }
 0xcd7   :  { %v2135_v60 = vmul.f32 1.442695, %v2133_v29 }
 0xcd9   :  { %6958 = vpow2.f32 %v2135_v60 }
 0xce2   :  { %v7911_v1 = vpop.eup %6956 }
 0xce3   :  { %v2257_v14 = vsel %vm356_vm0, %v7911_v1, 0.0 }
 0xce4   :  { %2258 = vadd.xlane.f32.xlu0 %v2257_v14 }
 0xce6   :  { %v6959_v37 = vpop.eup %6958 }
 0xce7   :  { %v2139_v45 = vsel %vm356_vm0, %v6959_v37, 0.0 }
 0xce8   :  { %2140 = vadd.xlane.f32.xlu1 %v2139_v45 }
 0xd21   :  { %v2244_v2 = vpop.xlane.xlu0 %2243 }
 0xd22   :  { %v2248_v43 = vsub.f32 %v2240_v44, %v2244_v2 }
 0xd24   :  { %v2250_v17 = vmul.f32 1.442695, %v2248_v43 }
 0xd25   :  { %v2368_v0 = vpop.xlane.xlu0 %2367  ;;  %v2365_v59 = vpop.xlane.xlu1 %2364 }
 0xd26   :  { %6960 = vpow2.f32 %v2250_v17  ;;  %v2370_v13 = vsub.f32 %v2362_v46, %v2368_v0  ;;  %v2369_v3 = vsub.f32 %v2361_v62, %v2365_v59 }
 0xd28   :  { %v2373_v5 = vmul.f32 1.442695, %v2370_v13  ;;  %v2371_v61 = vmul.f32 1.442695, %v2369_v3 }
 0xd29   :  { %v2487_v6 = vpop.xlane.xlu0 %2486  ;;  %v2484_v26 = vpop.xlane.xlu1 %2483 }
 0xd2a   :  { %6962 = vpow2.f32 %v2373_v5  ;;  %v2489_v47 = vsub.f32 %v2481_v34, %v2487_v6  ;;  %v2488_v30 = vsub.f32 %v2480_v16, %v2484_v26 }
 0xd2b   :  { %6964 = vpow2.f32 %v2371_v61 }
 0xd2c   :  { %v2492_v58 = vmul.f32 1.442695, %v2489_v47  ;;  %v2490_v9 = vmul.f32 1.442695, %v2488_v30 }
 0xd2d   :  { %v2144_v38 = vpop.xlane.xlu0 %2143  ;;  %v2269_v29 = vpop.permute.xlu1 %2268 }
 0xd2e   :  { %6966 = vpow2.f32 %v2492_v58  ;;  %6542 = vmatprep.subr.mxu0 %v2269_v29 }
 0xd2f   :  { %6968 = vpow2.f32 %v2490_v9  ;;  %6543 = vmatpush3.msra.mxu0 %v2269_v29 }
 0xd30   :  { %6970 = vrcp.f32 %v2144_v38 }
 0xd31   :  { %v2267_v44 = vpop.permute.xlu0 %2266  ;;  %v2388_v60 = vpop.permute.xlu1 %2387 }
 0xd32   :  { %6544 = vmatprep.subr.mxu0 %v2267_v44  ;;  %6549 = vmatprep.subr.mxu1 %v2388_v60 }
 0xd33   :  { %v6961_v46 = vpop.eup %6960  ;;  %6545 = vmatpush3.msra.mxu0 %v2267_v44 }
 0xd34   :  { %v2254_v62 = vsel %vm356_vm0, %v6961_v46, 0.0 }
 0xd35   :  { %2255 = vadd.xlane.f32.xlu1 %v2254_v62  ;;  %v2507_v34 = vpop.permute.xlu1 %2506 }
 0xd36   :  { %6556 = vmatprep.subr.mxu0 %v2507_v34 }
 0xd37   :  { %v6963_v16 = vpop.eup %6962 }
 0xd38   :  { %v6965_v14 = vpop.eup %6964  ;;  %v2378_v45 = vsel %vm356_vm0, %v6963_v16, 0.0 }
 0xd39   :  { %2379 = vadd.xlane.f32.xlu0 %v2378_v45  ;;  %v2375_v2 = vsel %vm356_vm0, %v6965_v14, 0.0 }
 0xd3a   :  { %2376 = vadd.xlane.f32.xlu1 %v2375_v2 }
 0xd3b   :  { %v7919_v43 = vpop.eup %6966 }
 0xd3c   :  { %v7921_v17 = vpop.eup %6968  ;;  %v2497_v0 = vsel %vm356_vm0, %v7919_v43, 0.0 }
 0xd3d   :  { %2498 = vadd.xlane.f32.xlu0 %v2497_v0  ;;  %v2494_v59 = vsel %vm356_vm0, %v7921_v17, 0.0  ;;  %v6971_v13 = vpop.eup %6970 }
 0xd3e   :  { %2495 = vadd.xlane.f32.xlu1 %v2494_v59 }
 0xd4f   :  { %2504 = vrot.lane.b32.xlu1 %v7525_v41, %s7108_s6 }
 0xd53   :  { %1671 = vrot.lane.b32.xlu1 %v7818_v7, %s7112_s16  ;;  %2385 = vrot.lane.b32.xlu0 %v7525_v41, %s7107_s15 }
 0xd57   :  { %1679 = vrot.lane.b32.xlu1 %v7822_v36, %s7111_s14  ;;  %1669 = vrot.lane.b32.xlu0 %v7820_v11, %s7112_s16  ;;  %v2148_v36 = vmul.f32 %v6971_v13, %v7899_v48  ;;  %v2628_v48 = vld [vmem:[%s8920_s3 + $0xe0] sm:$0xff] }
 0xd5b   :  { %1687 = vrot.lane.b32.xlu1 %v7832_v42, %s7110_s13  ;;  %1677 = vrot.lane.b32.xlu0 %v7828_v10, %s7111_s14 }
 0xd5f   :  { %1685 = vrot.lane.b32.xlu0 %v7835_v12, %s7110_s13 }
 0xd6d   :  { %v2259_v11 = vpop.xlane.xlu0 %2258 }
 0xd71   :  { %v2141_v7 = vpop.xlane.xlu1 %2140 }
 0xd72   :  { %6972 = vrcp.f32 %v2141_v7  ;;  %v2626_v7 = vld [vmem:[%s8920_s3 + $0xd0] sm:$0xff] }
 0xd73   :  { %6974 = vrcp.f32 %v2259_v11 }
 0xd7f   :  { %v6973_v41 = vpop.eup %6972 }
 0xd80   :  { %v2147_v3 = vmul.f32 %v6973_v41, %v6959_v37  ;;  %v6975_v6 = vpop.eup %6974  ;;  %v2623_v41 = vld [vmem:[%s8920_s3 + $0xb8] sm:$0xff] }
 0xd81   :  { %v2263_v58 = vmul.f32 %v6975_v6, %v7911_v1  ;;  %v2627_v1 = vld [vmem:[%s8920_s3 + $0xd8] sm:$0xff]  ;;  %v3101_v6 = vld [vmem:[%s8923_s2 + $0x50] sm:$0xff] }
 0xd82   :  { %6539 = vmatprep.mubr.msk.f32.mxu1 %vm356_vm0, %v2147_v3  ;;  %v2622_v3 = vld [vmem:[%s8920_s3 + $0xb0] sm:$0xff] }
 0xd83   :  { %6540 = vmatmul.mubr.msk.f32.vlgmr.msra.gmra.mxu1 %vm356_vm0, %v2148_v36  ;;  %v2621_v36 = vld [vmem:[%s8920_s3 + $0xa8] sm:$0xff] }
 0xd84   :  { %6550 = vmatpush3.msra.mxu1 %v2388_v60 }
 0xdbe   :  { %v2256_v42 = vpop.xlane.xlu1 %2255 }
 0xdbf   :  { %6976 = vrcp.f32 %v2256_v42 }
 0xdc2   :  { %v2380_v10 = vpop.xlane.xlu0 %2379 }
 0xdc3   :  { %6978 = vrcp.f32 %v2380_v10  ;;  %v2377_v12 = vpop.xlane.xlu1 %2376  ;;  %v3106_v10 = vld [vmem:[%s8923_s2 + $0x78] sm:$0xff] }
 0xdc4   :  { %6980 = vrcp.f32 %v2377_v12 }
 0xdc6   :  { %v2499_v5 = vpop.xlane.xlu0 %2498 }
 0xdc7   :  { %6982 = vrcp.f32 %v2499_v5  ;;  %v2496_v61 = vpop.xlane.xlu1 %2495  ;;  %v3105_v5 = vld [vmem:[%s8923_s2 + $0x70] sm:$0xff] }
 0xdc8   :  { %6984 = vrcp.f32 %v2496_v61 }
 0xdca   :  { %v2386_v37 = vpop.permute.xlu0 %2385 }
 0xdcb   :  { %6551 = vmatprep.subr.mxu1 %v2386_v37  ;;  %v2505_v9 = vpop.permute.xlu1 %2504 }
 0xdcc   :  { %v6977_v26 = vpop.eup %6976  ;;  %6552 = vmatpush3.msra.mxu1 %v2386_v37  ;;  %v3104_v37 = vld [vmem:[%s8923_s2 + $0x68] sm:$0xff] }
 0xdcd   :  { %v2262_v47 = vmul.f32 %v6977_v26, %v6961_v46  ;;  %6563 = vmatprep.subr.mxu1 %v2628_v48  ;;  %v3100_v26 = vld [vmem:[%s8923_s2 + $0x48] sm:$0xff] }
 0xdce   :  { %v1670_v30 = vpop.permute.xlu0 %1669 }
 0xdcf   :  { %6546 = vmatprep.mubr.msk.f32.mxu0 %vm356_vm0, %v2262_v47  ;;  %v1691_v2 = vsel %vm356_vm0, %v7816_v39, %v1670_v30  ;;  %v1672_v0 = vpop.permute.xlu1 %1671  ;;  %v2625_v39 = vld [vmem:[%s8920_s3 + $0xc8] sm:$0xff]  ;;  %v3099_v47 = vld [vmem:[%s8923_s2 + $0x40] sm:$0xff] }
 0xdd0   :  { %v6979_v38 = vpop.eup %6978  ;;  %6547 = vmatmul.mubr.msk.f32.vlgmr.msra.gmra.mxu0 %vm356_vm0, %v2263_v58  ;;  %v1692_v42 = vsel %vm356_vm0, %v7814_v40, %v1672_v0  ;;  %v3103_v40 = vld [vmem:[%s8923_s2 + $0x60] sm:$0xff] }
 0xdd1   :  { %v6981_v29 = vpop.eup %6980  ;;  %6557 = vmatpush3.msra.mxu0 %v2507_v34  ;;  %v2384_v44 = vmul.f32 %v6979_v38, %v6963_v16 }
 0xdd2   :  { %6558 = vmatprep.subr.mxu0 %v2505_v9  ;;  %v1678_v60 = vpop.permute.xlu0 %1677  ;;  %v2383_v62 = vmul.f32 %v6981_v29, %v6965_v14 }
 0xdd3   :  { %6559 = vmatpush3.msra.mxu0 %v2505_v9  ;;  %v1693_v16 = vsel %vm458_vm4, %v1691_v2, %v1678_v60 }
 0xdd4   :  { %v6983_v45 = vpop.eup %6982  ;;  %6553 = vmatprep.mubr.msk.f32.mxu1 %vm356_vm0, %v2383_v62 }
 0xdd5   :  { %v6985_v46 = vpop.eup %6984  ;;  %6554 = vmatmul.mubr.msk.f32.vlgmr.msra.gmra.mxu1 %vm356_vm0, %v2384_v44  ;;  %v2503_v34 = vmul.f32 %v6983_v45, %v7919_v43  ;;  %v2624_v43 = vld [vmem:[%s8920_s3 + $0xc0] sm:$0xff] }
 0xdd6   :  { %6564 = vmatpush3.msra.mxu1 %v2628_v48  ;;  %v1686_v14 = vpop.permute.xlu0 %1685  ;;  %v2502_v59 = vmul.f32 %v6985_v46, %v7921_v17  ;;  %v1680_v17 = vpop.permute.xlu1 %1679  ;;  %v3102_v48 = vld [vmem:[%s8923_s2 + $0x58] sm:$0xff] }
 0xdd7   :  { %6565 = vmatprep.subr.mxu1 %v2627_v1  ;;  %v1695_v13 = vsel %vm189_vm8, %v1693_v16, %v1686_v14  ;;  %v1694_v12 = vsel %vm458_vm4, %v1692_v42, %v1680_v17 }
 0xdd8   :  { %6566 = vmatpush3.msra.mxu1 %v2627_v1  ;;  %6560 = vmatprep.mubr.msk.f32.mxu0 %vm356_vm0, %v2502_v59 }
 0xdd9   :  { %6567 = vmatprep.subr.mxu1 %v2626_v7  ;;  %6561 = vmatmul.mubr.msk.f32.vlgmr.msra.gmra.mxu0 %vm356_vm0, %v2503_v34 }
 0xdda   :  { %6568 = vmatpush3.msra.mxu1 %v2626_v7  ;;  %6579 = vmatprep.mubr.msk.f32.mxu1 %vm2629_vm6, %v1695_v13  ;;  %v1688_v11 = vpop.permute.xlu1 %1687 }
 0xddb   :  { %6569 = vmatprep.subr.mxu1 %v2625_v39  ;;  %v1696_v61 = vsel %vm189_vm8, %v1694_v12, %v1688_v11 }
 0xddc   :  { %6570 = vmatpush3.msra.mxu1 %v2625_v39 }
 0xddd   :  { %6571 = vmatprep.subr.mxu1 %v2624_v43 }
 0xdde   :  { %6572 = vmatpush3.msra.mxu1 %v2624_v43 }
 0xddf   :  { %6573 = vmatprep.subr.mxu1 %v2623_v41 }
 0xde0   :  { %6574 = vmatpush3.msra.mxu1 %v2623_v41 }
 0xde1   :  { %6575 = vmatprep.subr.mxu1 %v2622_v3 }
 0xde2   :  { %6576 = vmatpush3.msra.mxu1 %v2622_v3 }
 0xde3   :  { %6577 = vmatprep.subr.mxu1 %v2621_v36 }
 0xde4   :  { %6578 = vmatpush3.msra.mxu1 %v2621_v36 }
 0xde5   :  { %6580 = vmatmul.mubr.msk.f32.vlgmr.msra.gmra.mxu1 %vm2629_vm6, %v1696_v61  ;;  %3143 = vmatprep.subr.mxu1 %v3106_v10 }
 0xde6   :  { %3144 = vmatpush1.msra.mxu1 %v3105_v5 }
 0xde7   :  { %3145 = vmatprep.subr.mxu1 %v3104_v37 }
 0xde8   :  { %3146 = vmatpush1.msra.mxu1 %v3103_v40 }
 0xde9   :  { %3147 = vmatprep.subr.mxu1 %v3102_v48 }
 0xdea   :  { %3148 = vmatpush1.msra.mxu1 %v3101_v6  ;;  %v2804_v6 = vld [vmem:[%s8920_s3 + $0x100] sm:$0xff] }
 0xdeb   :  { %3149 = vmatprep.subr.mxu1 %v3100_v26  ;;  %v2803_v26 = vld [vmem:[%s8920_s3 + $0xf8] sm:$0xff]  ;;  %6585 = vmatprep.subr.mxu0 %v2804_v6 }
 0xdec   :  { %3150 = vmatpush1.msra.mxu1 %v3099_v47  ;;  %6586 = vmatpush3.msra.mxu0 %v2804_v6  ;;  %v2802_v47 = vld [vmem:[%s8920_s3 + $0xf0] sm:$0xff] }
 0xded   :  { %6621 = vmatprep.subr.msk.mxu1 %vm356_vm0, %v7348_v49  ;;  %6587 = vmatprep.subr.mxu0 %v2803_v26 }
 0xdee   :  { %6588 = vmatpush3.msra.mxu0 %v2803_v26 }
 0xdef   :  { %6589 = vmatprep.subr.mxu0 %v2802_v47 }
 0xdf0   :  { %6590 = vmatpush3.msra.mxu0 %v2802_v47 }
 0xe43   :  { %v6541_v30 = vpop.f32.mrf.mxu1 }
 0xe45   :  { %v2221_v38 = vpop.f32.mrf.mxu1 }
 0xe90   :  { %v6548_v58 = vpop.f32.mrf.mxu0 }
 0xe91   :  { %2595 = vrot.lane.b32.xlu1 %v6548_v58, %s7112_s16  ;;  %v2918_v58 = vld [vmem:[%s8920_s3 + $0x140] sm:$0xff] }
 0xe92   :  { %v2344_v9 = vpop.f32.mrf.mxu0 }
 0xe93   :  { %2593 = vrot.lane.b32.xlu0 %v2344_v9, %s7112_s16 }
 0xe95   :  { %v6555_v29 = vpop.f32.mrf.mxu1 }
 0xe96   :  { %2603 = vrot.lane.b32.xlu1 %v6555_v29, %s7111_s14 }
 0xe97   :  { %v2463_v44 = vpop.f32.mrf.mxu1 }
 0xe98   :  { %2601 = vrot.lane.b32.xlu0 %v2463_v44, %s7111_s14 }
 0xe99   :  { %v6562_v60 = vpop.f32.mrf.mxu0 }
 0xe9a   :  { %2611 = vrot.lane.b32.xlu1 %v6562_v60, %s7110_s13 }
 0xe9b   :  { %v2582_v62 = vpop.f32.mrf.mxu0 }
 0xe9c   :  { %2609 = vrot.lane.b32.xlu0 %v2582_v62, %s7110_s13 }
 0xea5   :  { %v6581_v45 = vpop.f32.mrf.mxu1 }
 0xea6   :  { %v8025_v2 = vadd.f32 %v6581_v45, %v7244_v31 }
 0xea7   :  { %v2708_v1 = vpop.f32.mrf.mxu1 }
 0xea8   :  { %v8022_v46 = vadd.f32 %v2708_v1, %v7240_v28  ;;  %v2736_v34 = vsel %vm458_vm4, %v8025_v2, 0.0 }
 0xeaa   :  { %v2733_v0 = vsel %vm458_vm4, %v8022_v46, 0.0 }
 0xebb   :  { %2734 = vadd.xlane.f32.xlu0 %v2733_v0 }
 0xebe   :  { %2737 = vadd.xlane.f32.xlu1 %v2736_v34 }
 0xf03   :  { %v2596_v16 = vpop.permute.xlu1 %2595 }
 0xf04   :  { %v2616_v28 = vsel %vm356_vm0, %v6541_v30, %v2596_v16  ;;  %v2801_v30 = vld [vmem:[%s8920_s3 + $0xe8] sm:$0xff] }
 0xf05   :  { %v2594_v14 = vpop.permute.xlu0 %2593  ;;  %6591 = vmatprep.subr.mxu0 %v2801_v30 }
 0xf06   :  { %v2615_v13 = vsel %vm356_vm0, %v2221_v38, %v2594_v14  ;;  %6592 = vmatpush3.msra.mxu0 %v2801_v30 }
 0xf07   :  { %6599 = vmatprep.subr.mxu0 %v2918_v58 }
 0xf08   :  { %v2604_v59 = vpop.permute.xlu1 %2603 }
 0xf09   :  { %v2618_v17 = vsel %vm458_vm4, %v2616_v28, %v2604_v59 }
 0xf0a   :  { %v2602_v7 = vpop.permute.xlu0 %2601 }
 0xf0b   :  { %v2617_v31 = vsel %vm458_vm4, %v2615_v13, %v2602_v7  ;;  %v8077_v7 = vld [vmem:[%s8922_s1 + $0xe] ss:$0 sm:$0xff] }
 0xf0c   :  { %v2612_v39 = vpop.permute.xlu1 %2611 }
 0xf0d   :  { %v2620_v3 = vsel %vm189_vm8, %v2618_v17, %v2612_v39 }
 0xf0e   :  { %v2610_v43 = vpop.permute.xlu0 %2609 }
 0xf0f   :  { %v2619_v41 = vsel %vm189_vm8, %v2617_v31, %v2610_v43 }
 0xf10   :  { %6582 = vmatprep.mubr.msk.f32.mxu1 %vm2629_vm6, %v2619_v41  ;;  %v2917_v41 = vld [vmem:[%s8920_s3 + $0x138] sm:$0xff] }
 0xf11   :  { %6583 = vmatmul.mubr.msk.f32.gmra.mxu1 %vm2629_vm6, %v2620_v3  ;;  %v2916_v3 = vld [vmem:[%s8920_s3 + $0x130] sm:$0xff] }
 0xf12   :  { %3183 = vmatprep.mubr.f32.mxu1 %v7105_v19 }
 0xf44   :  { %v2735_v36 = vpop.xlane.xlu0 %2734 }
 0xf45   :  { %v2745_v11 = vmul.f32 0.03125, %v2735_v36  ;;  %v2915_v36 = vld [vmem:[%s8920_s3 + $0x128] sm:$0xff] }
 0xf47   :  { %v2749_v42 = vsub.f32 %v8022_v46, %v2745_v11  ;;  %v2738_v10 = vpop.xlane.xlu1 %2737  ;;  %v2914_v11 = vld [vmem:[%s8920_s3 + $0x120] sm:$0xff] }
 0xf48   :  { %v2746_v12 = vmul.f32 0.03125, %v2738_v10  ;;  %v2912_v10 = vld [vmem:[%s8920_s3 + $0x110] sm:$0xff] }
 0xf49   :  { %v2753_v5 = vmul.f32 %v2749_v42, %v2749_v42 }
 0xf4a   :  { %v2750_v61 = vsub.f32 %v8025_v2, %v2746_v12  ;;  %v2911_v12 = vld [vmem:[%s8920_s3 + $0x108] sm:$0xff] }
 0xf4b   :  { %v2757_v37 = vsel %vm458_vm4, %v2753_v5, 0.0 }
 0xf4c   :  { %2758 = vadd.xlane.f32.xlu0 %v2757_v37  ;;  %v2754_v40 = vmul.f32 %v2750_v61, %v2750_v61 }
 0xf4e   :  { %v2760_v48 = vsel %vm458_vm4, %v2754_v40, 0.0 }
 0xf50   :  { %2761 = vadd.xlane.f32.xlu0 %v2760_v48 }
 0xfd1   :  { %v6584_v9 = vpop.f32.mrf.mxu1 }
 0xfd2   :  { %v8060_v38 = vadd.f32 %v6584_v9, %v7246_v32 }
 0xfd3   :  { %v2718_v29 = vpop.f32.mrf.mxu1 }
 0xfd4   :  { %v8063_v44 = vadd.f32 %v2718_v29, %v7248_v33  ;;  %v2742_v60 = vsel %vm458_vm4, %v8060_v38, 0.0  ;;  %v8072_v33 = vld [vmem:[%s8922_s1 + $0xd] ss:$0 sm:$0xff] }
 0xfd5   :  { %v2759_v62 = vpop.xlane.xlu0 %2758  ;;  %2743 = vadd.xlane.f32.xlu0 %v2742_v60 }
 0xfd6   :  { %v2769_v45 = vmul.f32 0.03125, %v2759_v62  ;;  %v2739_v1 = vsel %vm458_vm4, %v8063_v44, 0.0 }
 0xfd7   :  { %2740 = vadd.xlane.f32.xlu1 %v2739_v1 }
 0xfd8   :  { %v2773_v0 = vadd.f32 1e-05, %v2769_v45 }
 0xfd9   :  { %v2762_v34 = vpop.xlane.xlu0 %2761 }
 0xfda   :  { %6986 = vrsqrt.f32 %v2773_v0  ;;  %v2770_v16 = vmul.f32 0.03125, %v2762_v34 }
 0xfdc   :  { %v2774_v32 = vadd.f32 1e-05, %v2770_v16 }
 0xfde   :  { %6988 = vrsqrt.f32 %v2774_v32 }
 0xfe7   :  { %v6987_v14 = vpop.eup %6986 }
 0xfe8   :  { %v2781_v59 = vmul.f32 %v6987_v14, %v2749_v42  ;;  %v2913_v42 = vld [vmem:[%s8920_s3 + $0x118] sm:$0xff] }
 0xfea   :  { %v2789_v13 = vmul.f32 %v8072_v33, %v2781_v59 }
 0xfeb   :  { %v6989_v39 = vpop.eup %6988 }
 0xfec   :  { %v2797_v28 = vadd.f32 %v8077_v7, %v2789_v13  ;;  %v2782_v31 = vmul.f32 %v6989_v39, %v2750_v61  ;;  %v5922_v13 = vld [vmem:[%s8922_s1 + $0xf] ss:$0 sm:$0xff] }
 0xfee   :  { %6593 = vmatprep.mubr.msk.f32.mxu0 %vm458_vm4, %v2797_v28  ;;  %v2790_v43 = vmul.f32 %v8072_v33, %v2782_v31 }
 0xff0   :  { %v2798_v17 = vadd.f32 %v8077_v7, %v2790_v43 }
 0xff2   :  { %6594 = vmatmul.mubr.msk.f32.vlgmr.msra.gmra.mxu0 %vm458_vm4, %v2798_v17 }
 0xff3   :  { %6600 = vmatpush3.msra.mxu0 %v2918_v58 }
 0xff4   :  { %6601 = vmatprep.subr.mxu0 %v2917_v41 }
 0xff5   :  { %6602 = vmatpush3.msra.mxu0 %v2917_v41 }
 0xff6   :  { %6603 = vmatprep.subr.mxu0 %v2916_v3 }
 0xff7   :  { %6604 = vmatpush3.msra.mxu0 %v2916_v3 }
 0xff8   :  { %6605 = vmatprep.subr.mxu0 %v2915_v36 }
 0xff9   :  { %6606 = vmatpush3.msra.mxu0 %v2915_v36 }
 0xffa   :  { %6607 = vmatprep.subr.mxu0 %v2914_v11 }
 0xffb   :  { %6608 = vmatpush3.msra.mxu0 %v2914_v11 }
 0xffc   :  { %6609 = vmatprep.subr.mxu0 %v2913_v42 }
 0xffd   :  { %6610 = vmatpush3.msra.mxu0 %v2913_v42 }
 0xffe   :  { %6611 = vmatprep.subr.mxu0 %v2912_v10 }
 0xfff   :  { %6612 = vmatpush3.msra.mxu0 %v2912_v10 }
0x1000   :  { %6613 = vmatprep.subr.mxu0 %v2911_v12 }
0x1001   :  { %6614 = vmatpush3.msra.mxu0 %v2911_v12  ;;  %v5931_v12 = vld [vmem:[%s8922_s1 + $0x10] ss:$0 sm:$0xff] }
0x1002   :  { %6636 = vmatprep.subr.msk.mxu0 %vm356_vm0, %v7356_v51 }
0x105e   :  { %v2744_v5 = vpop.xlane.xlu0 %2743 }
0x105f   :  { %v2748_v61 = vmul.f32 0.03125, %v2744_v5 }
0x1060   :  { %v2741_v37 = vpop.xlane.xlu1 %2740 }
0x1061   :  { %v2752_v40 = vsub.f32 %v8060_v38, %v2748_v61  ;;  %v2747_v48 = vmul.f32 0.03125, %v2741_v37 }
0x1063   :  { %v2751_v6 = vsub.f32 %v8063_v44, %v2747_v48  ;;  %v2756_v26 = vmul.f32 %v2752_v40, %v2752_v40 }
0x1065   :  { %v2766_v47 = vsel %vm458_vm4, %v2756_v26, 0.0  ;;  %v2755_v30 = vmul.f32 %v2751_v6, %v2751_v6 }
0x1066   :  { %2767 = vadd.xlane.f32.xlu0 %v2766_v47 }
0x1067   :  { %v2763_v58 = vsel %vm458_vm4, %v2755_v30, 0.0 }
0x1068   :  { %2764 = vadd.xlane.f32.xlu1 %v2763_v58 }
0x10b2   :  { %v6595_v0 = vpop.f32.mrf.mxu0 }
0x10b3   :  { %v2894_v17 = vadd.f32 %v6595_v0, %v5922_v13 }
0x10b4   :  { %v2888_v14 = vpop.f32.mrf.mxu0 }
0x10b5   :  { %v2889_v28 = vadd.f32 %v5922_v13, %v2888_v14  ;;  %v2908_v36 = vmax.f32 %v2894_v17, 0.0 }
0x10b7   :  { %v2907_v3 = vmax.f32 %v2889_v28, 0.0 }
0x10ef   :  { %v2768_v9 = vpop.xlane.xlu0 %2767 }
0x10f0   :  { %v2772_v29 = vmul.f32 0.03125, %v2768_v9 }
0x10f1   :  { %v2765_v60 = vpop.xlane.xlu1 %2764 }
0x10f2   :  { %v2776_v62 = vadd.f32 1e-05, %v2772_v29  ;;  %v2771_v45 = vmul.f32 0.03125, %v2765_v60 }
0x10f4   :  { %6990 = vrsqrt.f32 %v2776_v62  ;;  %v2775_v1 = vadd.f32 1e-05, %v2771_v45 }
0x10f6   :  { %6992 = vrsqrt.f32 %v2775_v1 }
0x1101   :  { %v6991_v34 = vpop.eup %6990 }
0x1102   :  { %v2784_v16 = vmul.f32 %v6991_v34, %v2752_v40 }
0x1103   :  { %v6993_v32 = vpop.eup %6992 }
0x1104   :  { %v2783_v59 = vmul.f32 %v6993_v32, %v2751_v6  ;;  %v2792_v39 = vmul.f32 %v8072_v33, %v2784_v16 }
0x1106   :  { %v2791_v31 = vmul.f32 %v8072_v33, %v2783_v59  ;;  %v2800_v41 = vadd.f32 %v8077_v7, %v2792_v39 }
0x1108   :  { %v2799_v43 = vadd.f32 %v8077_v7, %v2791_v31 }
0x110a   :  { %6596 = vmatprep.mubr.msk.f32.mxu0 %vm458_vm4, %v2799_v43 }
0x110b   :  { %6597 = vmatmul.mubr.msk.f32.gmra.mxu0 %vm458_vm4, %v2800_v41 }
0x110c   :  { %6615 = vmatprep.mubr.msk.f32.mxu0 %vm2629_vm6, %v2907_v3 }
0x110f   :  { %6616 = vmatmul.mubr.msk.f32.vlgmr.msra.gmra.mxu0 %vm2629_vm6, %v2908_v36 }
0x1110   :  { %6637 = vmatpush3.xpose.msk.msra.mxu0 %vm356_vm0, %v7356_v51 }
0x1111   :  { %6638 = vmatprep.subr.msk.mxu0 %vm356_vm0, %v7366_v52 }
0x1114   :  { %6639 = vmatpush3.xpose.msk.msra.mxu0 %vm356_vm0, %v7366_v52 }
0x1115   :  { %6640 = vmatprep.subr.msk.mxu0 %vm356_vm0, %v7378_v54 }
0x1118   :  { %6641 = vmatpush3.xpose.msk.msra.mxu0 %vm356_vm0, %v7378_v54 }
0x1119   :  { %6642 = vmatprep.subr.msk.mxu0 %vm356_vm0, %v7390_v56 }
0x111c   :  { %6643 = vmatpush3.xpose.msk.msra.mxu0 %vm356_vm0, %v7390_v56 }
0x11cb   :  { %v6598_v33 = vpop.f32.mrf.mxu0 }
0x11cc   :  { %v2904_v7 = vadd.f32 %v6598_v33, %v5922_v13 }
0x11cd   :  { %v2898_v11 = vpop.f32.mrf.mxu0 }
0x11ce   :  { %v2899_v42 = vadd.f32 %v5922_v13, %v2898_v11  ;;  %v2910_v37 = vmax.f32 %v2904_v7, 0.0  ;;  %v5932_v11 = vld [vmem:[%s8922_s1 + $0x11] ss:$0 sm:$0xff] }
0x11cf   :  { %v6617_v10 = vpop.f32.mrf.mxu0 }
0x11d0   :  { %v2909_v5 = vmax.f32 %v2899_v42, 0.0  ;;  %v3017_v61 = vadd.f32 %v6617_v10, %v8025_v2  ;;  %v5933_v10 = vld [vmem:[%s8922_s1 + $0x12] ss:$0 sm:$0xff] }
0x11d1   :  { %v2997_v40 = vpop.f32.mrf.mxu0 }
0x11d2   :  { %v8141_v48 = vadd.f32 %v5931_v12, %v3017_v61  ;;  %v3016_v6 = vadd.f32 %v2997_v40, %v8022_v46  ;;  %6618 = vmatprep.mubr.msk.f32.mxu0 %vm2629_vm6, %v2909_v5 }
0x11d3   :  { %6619 = vmatmul.mubr.msk.f32.gmra.mxu0 %vm2629_vm6, %v2910_v37 }
0x11d4   :  { %v8146_v26 = vadd.f32 %v5931_v12, %v3016_v6  ;;  %v3034_v47 = vsel %vm458_vm4, %v8141_v48, 0.0 }
0x11d5   :  { %3035 = vadd.xlane.f32.xlu0 %v3034_v47 }
0x11d6   :  { %v3031_v30 = vsel %vm458_vm4, %v8146_v26, 0.0 }
0x11d7   :  { %3032 = vadd.xlane.f32.xlu1 %v3031_v30 }
0x125e   :  { %v3036_v2 = vpop.xlane.xlu0 %3035 }
0x125f   :  { %v3044_v58 = vmul.f32 0.03125, %v3036_v2 }
0x1260   :  { %v3033_v9 = vpop.xlane.xlu1 %3032 }
0x1261   :  { %v3048_v29 = vsub.f32 %v8141_v48, %v3044_v58  ;;  %v3043_v46 = vmul.f32 0.03125, %v3033_v9 }
0x1263   :  { %v3047_v60 = vsub.f32 %v8146_v26, %v3043_v46  ;;  %v3052_v62 = vmul.f32 %v3048_v29, %v3048_v29 }
0x1265   :  { %v3058_v45 = vsel %vm458_vm4, %v3052_v62, 0.0  ;;  %v3051_v1 = vmul.f32 %v3047_v60, %v3047_v60 }
0x1266   :  { %3059 = vadd.xlane.f32.xlu0 %v3058_v45 }
0x1267   :  { %v3055_v0 = vsel %vm458_vm4, %v3051_v1, 0.0 }
0x1268   :  { %3056 = vadd.xlane.f32.xlu1 %v3055_v0 }
0x1293   :  { %v6620_v34 = vpop.f32.mrf.mxu0 }
0x1294   :  { %v3019_v16 = vadd.f32 %v6620_v34, %v8060_v38 }
0x1295   :  { %v3007_v32 = vpop.f32.mrf.mxu0 }
0x1296   :  { %v8157_v14 = vadd.f32 %v5931_v12, %v3019_v16  ;;  %v3018_v59 = vadd.f32 %v3007_v32, %v8063_v44 }
0x1298   :  { %v8160_v13 = vadd.f32 %v5931_v12, %v3018_v59  ;;  %v3040_v39 = vsel %vm458_vm4, %v8157_v14, 0.0 }
0x1299   :  { %3041 = vadd.xlane.f32.xlu0 %v3040_v39 }
0x129a   :  { %v3037_v28 = vsel %vm458_vm4, %v8160_v13, 0.0 }
0x129b   :  { %3038 = vadd.xlane.f32.xlu1 %v3037_v28 }
0x12ef   :  { %v3060_v31 = vpop.xlane.xlu0 %3059 }
0x12f0   :  { %v3068_v43 = vmul.f32 0.03125, %v3060_v31 }
0x12f1   :  { %v3057_v17 = vpop.xlane.xlu1 %3056 }
0x12f2   :  { %v3072_v41 = vadd.f32 1e-05, %v3068_v43  ;;  %v3067_v38 = vmul.f32 0.03125, %v3057_v17 }
0x12f4   :  { %6994 = vrsqrt.f32 %v3072_v41  ;;  %v3071_v3 = vadd.f32 1e-05, %v3067_v38 }
0x12f6   :  { %6996 = vrsqrt.f32 %v3071_v3 }
0x1301   :  { %v6995_v36 = vpop.eup %6994 }
0x1302   :  { %v3080_v7 = vmul.f32 %v6995_v36, %v3048_v29 }
0x1303   :  { %v6997_v44 = vpop.eup %6996 }
0x1304   :  { %v3079_v33 = vmul.f32 %v6997_v44, %v3047_v60  ;;  %v3088_v5 = vmul.f32 %v5932_v11, %v3080_v7 }
0x1306   :  { %v3087_v42 = vmul.f32 %v5932_v11, %v3079_v33  ;;  %v3096_v61 = vadd.f32 %v5933_v10, %v3088_v5 }
0x1308   :  { %v3095_v12 = vadd.f32 %v5933_v10, %v3087_v42 }
0x130a   :  { %5934 = vmatmul.mubr.msk.f32.vlgmr.msra.gmra.mxu1 %vm458_vm4, %v3095_v12 }
0x130b   :  { %6622 = vmatpush3.xpose.msk.msra.mxu1 %vm356_vm0, %v7348_v49  ;;  %3189 = vmatprep.mubr.f32.mxu1 %v7105_v19 }
0x130c   :  { %6623 = vmatprep.subr.msk.mxu1 %vm356_vm0, %v7354_v50 }
0x130e   :  { %5935 = vmatmul.mubr.msk.f32.gmra.mxu1 %vm458_vm4, %v3096_v61 }
0x130f   :  { %6624 = vmatpush3.xpose.msk.msra.mxu1 %vm356_vm0, %v7354_v50  ;;  %3195 = vmatprep.mubr.f32.mxu1 %v7105_v19 }
0x1310   :  { %6625 = vmatprep.subr.msk.mxu1 %vm356_vm0, %v7372_v53 }
0x1313   :  { %6626 = vmatpush3.xpose.msk.msra.mxu1 %vm356_vm0, %v7372_v53 }
0x1314   :  { %6627 = vmatprep.subr.msk.mxu1 %vm356_vm0, %v7384_v55 }
0x1317   :  { %6628 = vmatpush3.xpose.msk.msra.mxu1 %vm356_vm0, %v7384_v55 }
0x1322   :  { %v3042_v37 = vpop.xlane.xlu0 %3041 }
0x1323   :  { %v3046_v40 = vmul.f32 0.03125, %v3042_v37 }
0x1324   :  { %v3039_v6 = vpop.xlane.xlu1 %3038 }
0x1325   :  { %v3050_v47 = vsub.f32 %v8157_v14, %v3046_v40  ;;  %v3045_v30 = vmul.f32 0.03125, %v3039_v6 }
0x1327   :  { %v3049_v2 = vsub.f32 %v8160_v13, %v3045_v30  ;;  %v3054_v58 = vmul.f32 %v3050_v47, %v3050_v47 }
0x1329   :  { %v3064_v9 = vsel %vm458_vm4, %v3054_v58, 0.0  ;;  %v3053_v29 = vmul.f32 %v3049_v2, %v3049_v2 }
0x132a   :  { %3065 = vadd.xlane.f32.xlu0 %v3064_v9 }
0x132b   :  { %v3061_v46 = vsel %vm458_vm4, %v3053_v29, 0.0 }
0x132c   :  { %3062 = vadd.xlane.f32.xlu1 %v3061_v46 }
0x13b3   :  { %v3066_v60 = vpop.xlane.xlu0 %3065 }
0x13b4   :  { %v3070_v62 = vmul.f32 0.03125, %v3066_v60 }
0x13b5   :  { %v3063_v45 = vpop.xlane.xlu1 %3062 }
0x13b6   :  { %v3074_v1 = vadd.f32 1e-05, %v3070_v62  ;;  %v3069_v0 = vmul.f32 0.03125, %v3063_v45 }
0x13b8   :  { %6998 = vrsqrt.f32 %v3074_v1  ;;  %v3073_v34 = vadd.f32 1e-05, %v3069_v0 }
0x13ba   :  { %7000 = vrsqrt.f32 %v3073_v34 }
0x13c5   :  { %v6999_v16 = vpop.eup %6998 }
0x13c6   :  { %v3082_v39 = vmul.f32 %v6999_v16, %v3050_v47 }
0x13c7   :  { %v7001_v32 = vpop.eup %7000 }
0x13c8   :  { %v3081_v59 = vmul.f32 %v7001_v32, %v3049_v2  ;;  %v3090_v41 = vmul.f32 %v5932_v11, %v3082_v39 }
0x13ca   :  { %v3185_v28 = vpop.f32.mrf.mxu1  ;;  %v3089_v31 = vmul.f32 %v5932_v11, %v3081_v59  ;;  %v3098_v3 = vadd.f32 %v5933_v10, %v3090_v41 }
0x13cc   :  { %v8194_v43 = vpop.f32.mrf.mxu1  ;;  %v3097_v17 = vadd.f32 %v5933_v10, %v3089_v31 }
0x13ce   :  { %v3191_v38 = vpop.f32.mrf.mxu1  ;;  %5936 = vmatmul.mubr.msk.f32.gmra.mxu1 %vm458_vm4, %v3097_v17 }
0x13cf   :  { %3303 = vrot.lane.b32.xlu0 %v3191_v38, %s7110_s13  ;;  %3212 = vrot.lane.b32.xlu1 %v3191_v38, %s7106_s12 }
0x13d0   :  { %3201 = vmatprep.mubr.f32.mxu1 %v7105_v19  ;;  %v8263_v40 = vpop.f32.mrf.mxu1 }
0x13d2   :  { %5937 = vmatmul.mubr.msk.f32.gmra.mxu1 %vm458_vm4, %v3098_v3 }
0x13d3   :  { %3297 = vrot.lane.b32.xlu0 %v3185_v28, %s7109_s7  ;;  %3210 = vrot.lane.b32.xlu1 %v3185_v28, %s7106_s12 }
0x13d4   :  { %6633 = vmatprep.mubr.msk.f32.mxu1 %vm356_vm0, %v3185_v28 }
0x13d7   :  { %3392 = vrot.lane.b32.xlu0 %v3185_v28, %s7111_s14  ;;  %3301 = vrot.lane.b32.xlu1 %v3185_v28, %s7110_s13 }
0x13db   :  { %3394 = vrot.lane.b32.xlu0 %v3191_v38, %s7111_s14  ;;  %3299 = vrot.lane.b32.xlu1 %v3191_v38, %s7109_s7 }
0x13df   :  { %3388 = vrot.lane.b32.xlu0 %v3185_v28, %s7107_s15  ;;  %3483 = vrot.lane.b32.xlu1 %v3185_v28, %s7112_s16 }
0x13e3   :  { %3479 = vrot.lane.b32.xlu0 %v3185_v28, %s7108_s6  ;;  %3485 = vrot.lane.b32.xlu1 %v3191_v38, %s7112_s16 }
0x13e7   :  { %3390 = vrot.lane.b32.xlu1 %v3191_v38, %s7107_s15 }
0x13eb   :  { %3481 = vrot.lane.b32.xlu1 %v3191_v38, %s7108_s6 }
0x1441   :  { %v3304_v19 = vpop.permute.xlu0 %3303  ;;  %v3213_v36 = vpop.permute.xlu1 %3212 }
0x1442   :  { %6629 = vmatprep.subr.msk.mxu1 %vm356_vm0, %v3213_v36  ;;  %6644 = vmatprep.subr.msk.mxu0 %vm356_vm0, %v3304_v19 }
0x1443   :  { %6630 = vmatpush3.xpose.msk.msra.mxu1 %vm356_vm0, %v3213_v36  ;;  %6645 = vmatpush3.xpose.msk.msra.mxu0 %vm356_vm0, %v3304_v19 }
0x1445   :  { %v3298_v44 = vpop.permute.xlu0 %3297  ;;  %v3211_v33 = vpop.permute.xlu1 %3210 }
0x1446   :  { %6631 = vmatprep.subr.msk.mxu1 %vm356_vm0, %v3211_v33  ;;  %6648 = vmatprep.mubr.msk.f32.mxu0 %vm356_vm0, %v3298_v44 }
0x1447   :  { %6632 = vmatpush3.xpose.msk.msra.mxu1 %vm356_vm0, %v3211_v33 }
0x1448   :  { %6651 = vmatprep.subr.msk.mxu1 %vm356_vm0, %v7396_v57 }
0x1449   :  { %v3393_v7 = vpop.permute.xlu0 %3392  ;;  %v3302_v11 = vpop.permute.xlu1 %3301 }
0x144a   :  { %6634 = vmatmul.mubr.msk.f32.vlgmr.msra.gmra.mxu1 %vm356_vm0, %v3191_v38  ;;  %6646 = vmatprep.subr.msk.mxu0 %vm356_vm0, %v3302_v11 }
0x144b   :  { %6647 = vmatpush3.xpose.msk.msra.mxu0 %vm356_vm0, %v3302_v11  ;;  %6652 = vmatpush3.xpose.msk.msra.mxu1 %vm356_vm0, %v7396_v57 }
0x144c   :  { %6653 = vmatprep.subr.msk.mxu1 %vm356_vm0, %v7442_v20  ;;  %6666 = vmatprep.subr.msk.mxu0 %vm356_vm0, %v7434_v15 }
0x144d   :  { %v3395_v42 = vpop.permute.xlu0 %3394  ;;  %v3300_v10 = vpop.permute.xlu1 %3299 }
0x144e   :  { %6649 = vmatmul.mubr.msk.f32.vlgmr.msra.gmra.mxu0 %vm356_vm0, %v3300_v10 }
0x144f   :  { %6654 = vmatpush3.xpose.msk.msra.mxu1 %vm356_vm0, %v7442_v20  ;;  %6667 = vmatpush3.xpose.msk.msra.mxu0 %vm356_vm0, %v7434_v15 }
0x1450   :  { %6655 = vmatprep.subr.msk.mxu1 %vm356_vm0, %v7454_v22  ;;  %6668 = vmatprep.subr.msk.mxu0 %vm356_vm0, %v7444_v21 }
0x1451   :  { %v3389_v12 = vpop.permute.xlu0 %3388  ;;  %v3484_v5 = vpop.permute.xlu1 %3483 }
0x1452   :  { %6663 = vmatprep.mubr.msk.f32.mxu1 %vm356_vm0, %v3389_v12 }
0x1453   :  { %6656 = vmatpush3.xpose.msk.msra.mxu1 %vm356_vm0, %v7454_v22  ;;  %6669 = vmatpush3.xpose.msk.msra.mxu0 %vm356_vm0, %v7444_v21 }
0x1454   :  { %6657 = vmatprep.subr.msk.mxu1 %vm356_vm0, %v7465_v24  ;;  %6670 = vmatprep.subr.msk.mxu0 %vm356_vm0, %v7467_v25 }
0x1455   :  { %v3480_v61 = vpop.permute.xlu0 %3479  ;;  %v3486_v37 = vpop.permute.xlu1 %3485 }
0x1456   :  { %6678 = vmatprep.mubr.msk.f32.mxu0 %vm356_vm0, %v3480_v61 }
0x1457   :  { %6658 = vmatpush3.xpose.msk.msra.mxu1 %vm356_vm0, %v7465_v24  ;;  %6671 = vmatpush3.xpose.msk.msra.mxu0 %vm356_vm0, %v7467_v25 }
0x1458   :  { %6659 = vmatprep.subr.msk.mxu1 %vm356_vm0, %v3395_v42  ;;  %6672 = vmatprep.subr.msk.mxu0 %vm356_vm0, %v7477_v27 }
0x1459   :  { %v3391_v6 = vpop.permute.xlu1 %3390 }
0x145b   :  { %6660 = vmatpush3.xpose.msk.msra.mxu1 %vm356_vm0, %v3395_v42  ;;  %6673 = vmatpush3.xpose.msk.msra.mxu0 %vm356_vm0, %v7477_v27 }
0x145c   :  { %6661 = vmatprep.subr.msk.mxu1 %vm356_vm0, %v3393_v7  ;;  %6674 = vmatprep.subr.msk.mxu0 %vm356_vm0, %v3486_v37 }
0x145d   :  { %v3482_v47 = vpop.permute.xlu1 %3481 }
0x145f   :  { %6662 = vmatpush3.xpose.msk.msra.mxu1 %vm356_vm0, %v3393_v7  ;;  %6675 = vmatpush3.xpose.msk.msra.mxu0 %vm356_vm0, %v3486_v37 }
0x1460   :  { %6676 = vmatprep.subr.msk.mxu0 %vm356_vm0, %v3484_v5  ;;  %6681 = vmatprep.subr.mxu1 %v8263_v40 }
0x1462   :  { %6664 = vmatmul.mubr.msk.f32.vlgmr.msra.gmra.mxu1 %vm356_vm0, %v3391_v6 }
0x1463   :  { %6677 = vmatpush3.xpose.msk.msra.mxu0 %vm356_vm0, %v3484_v5  ;;  %6682 = vmatpush3.msra.mxu1 %v8263_v40 }
0x1464   :  { %6683 = vmatprep.subr.mxu1 %v8194_v43 }
0x1465   :  { %6684 = vmatpush3.msra.mxu1 %v8194_v43 }
0x1466   :  { %6679 = vmatmul.mubr.msk.f32.vlgmr.msra.gmra.mxu0 %vm356_vm0, %v3482_v47 }
0x148e   :  { %v8275_v30 = vpop.f32.mrf.mxu1 }
0x1490   :  { %v8277_v2 = vpop.f32.mrf.mxu1 }
0x1492   :  { %v8279_v58 = vpop.f32.mrf.mxu1 }
0x1494   :  { %v8281_v9 = vpop.f32.mrf.mxu1 }
0x150a   :  { %v6635_v29 = vpop.f32.mrf.mxu1 }
0x150c   :  { %v8283_v46 = vpop.f32.mrf.mxu1 }
0x150d   :  { %3572 = vrot.lane.b32.xlu0 %v8283_v46, %s7109_s7 }
0x150e   :  { %v6650_v60 = vpop.f32.mrf.mxu0 }
0x1510   :  { %v8287_v62 = vpop.f32.mrf.mxu0 }
0x1511   :  { %3580 = vrot.lane.b32.xlu1 %v8287_v62, %s7113_s19 }
0x1522   :  { %v6665_v45 = vpop.f32.mrf.mxu1 }
0x1524   :  { %v8291_v1 = vpop.f32.mrf.mxu1 }
0x1525   :  { %3588 = vrot.lane.b32.xlu0 %v8291_v1, %s7114_s20 }
0x1526   :  { %v8295_v0 = vpop.f32.mrf.mxu0 }
0x1528   :  { %v8297_v34 = vpop.f32.mrf.mxu0 }
0x1529   :  { %3574 = vrot.lane.b32.xlu0 %v6635_v29, %s7109_s7  ;;  %3596 = vrot.lane.b32.xlu1 %v8297_v34, %s7115_s21 }
0x152d   :  { %3590 = vrot.lane.b32.xlu0 %v6665_v45, %s7114_s20  ;;  %3582 = vrot.lane.b32.xlu1 %v6650_v60, %s7113_s19 }
0x1531   :  { %3598 = vrot.lane.b32.xlu1 %v8295_v0, %s7115_s21 }
0x157f   :  { %v3573_v16 = vpop.permute.xlu0 %3572 }
0x1583   :  { %v3581_v32 = vpop.permute.xlu1 %3580 }
0x1584   :  { %v3602_v39 = vsel %vm1131_vm9, %v3573_v16, %v3581_v32 }
0x1597   :  { %v3589_v59 = vpop.permute.xlu0 %3588 }
0x1598   :  { %v3604_v28 = vsel %vm1134_vm10, %v3602_v39, %v3589_v59 }
0x159b   :  { %v3575_v31 = vpop.permute.xlu0 %3574  ;;  %v3597_v17 = vpop.permute.xlu1 %3596 }
0x159c   :  { %v3606_v41 = vsel %vm1137_vm11, %v3604_v28, %v3597_v17 }
0x159d   :  { %v3608_v38 = vsel %vm1140_vm12, %v3606_v41, 0.0 }
0x159e   :  { %3610 = vrot.lane.b32.xlu0 %v3608_v38, %s7103_s17 }
0x159f   :  { %v3583_v3 = vpop.permute.xlu1 %3582  ;;  %v3591_v19 = vpop.permute.xlu0 %3590 }
0x15a0   :  { %v3603_v36 = vsel %vm1131_vm9, %v3575_v31, %v3583_v3 }
0x15a1   :  { %v3605_v44 = vsel %vm1134_vm10, %v3603_v36, %v3591_v19 }
0x15a3   :  { %v3599_v33 = vpop.permute.xlu1 %3598 }
0x15a4   :  { %v3607_v7 = vsel %vm1137_vm11, %v3605_v44, %v3599_v33 }
0x15a5   :  { %v3609_v11 = vsel %vm1140_vm12, %v3607_v7, 0.0 }
0x15a6   :  { %3612 = vrot.lane.b32.xlu1 %v3609_v11, %s7103_s17 }
0x1610   :  { %v3611_v42 = vpop.permute.xlu0 %3610 }
0x1611   :  { %v3614_v10 = vsel %vm7574_vm13, %v3611_v42, %v3608_v38 }
0x1612   :  { %3616 = vrot.lane.b32.xlu0 %v3614_v10, %s7104_s18 }
0x1618   :  { %v3613_v12 = vpop.permute.xlu1 %3612 }
0x1619   :  { %v3615_v5 = vsel %vm7582_vm14, %v3613_v12, %v3609_v11 }
0x161a   :  { %3618 = vrot.lane.b32.xlu1 %v3615_v5, %s7104_s18 }
0x1684   :  { %v3617_v61 = vpop.permute.xlu0 %3616 }
0x1685   :  { %v3620_v37 = vsel %vm7589_vm15, %v3617_v61, %v3614_v10 }
0x1686   :  { %3622 = vrot.lane.b32.xlu0 %v3620_v37, %s7116_s22 }
0x168c   :  { %v3619_v6 = vpop.permute.xlu1 %3618 }
0x168d   :  { %v3621_v47 = vsel %vm7596_vm2, %v3619_v6, %v3615_v5 }
0x168e   :  { %3624 = vrot.lane.b32.xlu1 %v3621_v47, %s7116_s22 }
0x16f8   :  { %v3623_v16 = vpop.permute.xlu0 %3622 }
0x16f9   :  { %v3626_v32 = vsel %vm7603_vm3, %v3623_v16, %v3620_v37 }
0x16fa   :  { %3628 = vrot.lane.b32.xlu0 %v3626_v32, %s7117_s23 }
0x1700   :  { %v3625_v59 = vpop.permute.xlu1 %3624 }
0x1701   :  { %v3627_v39 = vsel %vm7610_vm5, %v3625_v59, %v3621_v47 }
0x1702   :  { %3745 = vrot.lane.b32.xlu0 %v3627_v39, %s7118_s24  ;;  %v3635_v28 = vadd.f32 %v6635_v29, %v3627_v39 }
0x1704   :  { %v3637_v31 = vmul.f32 0.25, %v3635_v28 }
0x1706   :  { %3866 = vrot.lane.b32.xlu0 %v3627_v39, %s7119_s25  ;;  %v3641_v17 = vsel %vm356_vm0, %v3637_v31, -inf }
0x170a   :  { %3985 = vrot.lane.b32.xlu0 %v3627_v39, %s8939_s8 }
0x1729   :  { %3642 = vmax.xlane.f32.xlu0 %v3641_v17 }
0x176c   :  { %v3629_v41 = vpop.permute.xlu0 %3628 }
0x176d   :  { %3743 = vrot.lane.b32.xlu1 %v3629_v41, %s7118_s24  ;;  %v3634_v44 = vadd.f32 %v3629_v41, %v8283_v46 }
0x176f   :  { %v3636_v7 = vmul.f32 0.25, %v3634_v44 }
0x1771   :  { %3864 = vrot.lane.b32.xlu1 %v3629_v41, %s7119_s25  ;;  %v3638_v12 = vsel %vm356_vm0, %v3636_v7, -inf }
0x1774   :  { %v3746_v38 = vpop.permute.xlu0 %3745 }
0x1775   :  { %3983 = vrot.lane.b32.xlu1 %v3629_v41, %s8939_s8  ;;  %v3750_v3 = vadd.f32 %v6650_v60, %v3746_v38 }
0x1777   :  { %v3752_v36 = vmul.f32 0.25, %v3750_v3 }
0x1778   :  { %v3867_v19 = vpop.permute.xlu0 %3866 }
0x1779   :  { %v3871_v33 = vadd.f32 %v6665_v45, %v3867_v19  ;;  %v3756_v29 = vsel %vm356_vm0, %v3752_v36, -inf }
0x177b   :  { %v3873_v42 = vmul.f32 0.25, %v3871_v33 }
0x177c   :  { %v3986_v11 = vpop.permute.xlu0 %3985 }
0x177d   :  { %v3990_v10 = vadd.f32 %v8295_v0, %v3986_v11  ;;  %v3877_v61 = vsel %vm356_vm0, %v3873_v42, -inf }
0x177f   :  { %v3992_v5 = vmul.f32 0.25, %v3990_v10 }
0x1781   :  { %v3996_v60 = vsel %vm356_vm0, %v3992_v5, -inf }
0x1799   :  { %3757 = vmax.xlane.f32.xlu1 %v3756_v29 }
0x179d   :  { %3639 = vmax.xlane.f32.xlu1 %v3638_v12 }
0x17a1   :  { %3878 = vmax.xlane.f32.xlu1 %v3877_v61 }
0x17a5   :  { %3997 = vmax.xlane.f32.xlu1 %v3996_v60 }
0x17b2   :  { %v3643_v46 = vpop.xlane.xlu0 %3642 }
0x17b3   :  { %v3645_v45 = vsub.f32 %v3637_v31, %v3643_v46 }
0x17b5   :  { %v3648_v37 = vmul.f32 1.442695, %v3645_v45 }
0x17b7   :  { %7002 = vpow2.f32 %v3648_v37 }
0x17c4   :  { %v8346_v6 = vpop.eup %7002 }
0x17c5   :  { %v3653_v47 = vsel %vm356_vm0, %v8346_v6, 0.0 }
0x17c6   :  { %3654 = vadd.xlane.f32.xlu1 %v3653_v47 }
0x17d7   :  { %3777 = vrot.lane.b32.xlu1 %v8194_v43, %s7109_s7 }
0x17db   :  { %3898 = vrot.lane.b32.xlu1 %v8263_v40, %s7107_s15 }
0x17df   :  { %v3744_v0 = vpop.permute.xlu1 %3743 }
0x17e0   :  { %v3749_v16 = vadd.f32 %v3744_v0, %v8287_v62 }
0x17e2   :  { %v3751_v32 = vmul.f32 0.25, %v3749_v16 }
0x17e3   :  { %v3865_v59 = vpop.permute.xlu1 %3864 }
0x17e4   :  { %v3870_v39 = vadd.f32 %v3865_v59, %v8291_v1  ;;  %v3753_v28 = vsel %vm356_vm0, %v3751_v32, -inf }
0x17e5   :  { %3754 = vmax.xlane.f32.xlu0 %v3753_v28 }
0x17e6   :  { %v3872_v31 = vmul.f32 0.25, %v3870_v39 }
0x17e7   :  { %v3984_v17 = vpop.permute.xlu1 %3983 }
0x17e8   :  { %v3989_v41 = vadd.f32 %v3984_v17, %v8297_v34  ;;  %v3874_v38 = vsel %vm356_vm0, %v3872_v31, -inf }
0x17e9   :  { %3875 = vmax.xlane.f32.xlu0 %v3874_v38 }
0x17ea   :  { %v3991_v3 = vmul.f32 0.25, %v3989_v41 }
0x17ec   :  { %v3993_v19 = vsel %vm356_vm0, %v3991_v3, -inf }
0x17ed   :  { %3994 = vmax.xlane.f32.xlu0 %v3993_v19 }
0x1803   :  { %3779 = vrot.lane.b32.xlu0 %v8263_v40, %s7109_s7 }
0x1807   :  { %4017 = vrot.lane.b32.xlu0 %v8263_v40, %s7108_s6 }
0x1822   :  { %v3758_v62 = vpop.xlane.xlu1 %3757 }
0x1823   :  { %v3760_v1 = vsub.f32 %v3752_v36, %v3758_v62 }
0x1825   :  { %v3763_v44 = vmul.f32 1.442695, %v3760_v1 }
0x1826   :  { %v3640_v33 = vpop.xlane.xlu1 %3639 }
0x1827   :  { %7004 = vpow2.f32 %v3763_v44  ;;  %v3644_v29 = vsub.f32 %v3636_v7, %v3640_v33 }
0x1829   :  { %v3646_v34 = vmul.f32 1.442695, %v3644_v29 }
0x182a   :  { %v3879_v11 = vpop.xlane.xlu1 %3878 }
0x182b   :  { %7006 = vpow2.f32 %v3646_v34  ;;  %v3881_v10 = vsub.f32 %v3873_v42, %v3879_v11 }
0x182d   :  { %v3884_v12 = vmul.f32 1.442695, %v3881_v10 }
0x182e   :  { %v3998_v61 = vpop.xlane.xlu1 %3997 }
0x182f   :  { %7008 = vpow2.f32 %v3884_v12  ;;  %v4000_v60 = vsub.f32 %v3992_v5, %v3998_v61 }
0x1831   :  { %v4003_v46 = vmul.f32 1.442695, %v4000_v60 }
0x1833   :  { %7010 = vpow2.f32 %v4003_v46 }
0x1834   :  { %v8364_v45 = vpop.eup %7004 }
0x1835   :  { %v3768_v40 = vsel %vm356_vm0, %v8364_v45, 0.0 }
0x1836   :  { %3769 = vadd.xlane.f32.xlu1 %v3768_v40 }
0x1838   :  { %v8368_v36 = vpop.eup %7006 }
0x1839   :  { %v3650_v7 = vsel %vm356_vm0, %v8368_v36, 0.0 }
0x183a   :  { %3651 = vadd.xlane.f32.xlu0 %v3650_v7 }
0x183c   :  { %v8372_v37 = vpop.eup %7008 }
0x183d   :  { %v3889_v42 = vsel %vm356_vm0, %v8372_v37, 0.0 }
0x183e   :  { %3890 = vadd.xlane.f32.xlu1 %v3889_v42 }
0x1840   :  { %v8376_v5 = vpop.eup %7010 }
0x1841   :  { %v4008_v47 = vsel %vm356_vm0, %v8376_v5, 0.0 }
0x1842   :  { %4009 = vadd.xlane.f32.xlu1 %v4008_v47 }
0x184f   :  { %v3655_v0 = vpop.xlane.xlu1 %3654 }
0x1853   :  { %3896 = vrot.lane.b32.xlu1 %v8194_v43, %s7107_s15  ;;  %v3778_v16 = vpop.permute.xlu1 %3777 }
0x1857   :  { %4136 = vrot.lane.b32.xlu1 %v8279_v58, %s7106_s12  ;;  %v3899_v59 = vpop.permute.xlu1 %3898 }
0x1858   :  { %6695 = vmatprep.subr.mxu1 %v3899_v59 }
0x185b   :  { %4134 = vrot.lane.b32.xlu1 %v8275_v30, %s7106_s12 }
0x185f   :  { %4221 = vrot.lane.b32.xlu1 %v8275_v30, %s7109_s7 }
0x1863   :  { %4318 = vrot.lane.b32.xlu1 %v8279_v58, %s7111_s14 }
0x1867   :  { %4316 = vrot.lane.b32.xlu1 %v8275_v30, %s7111_s14 }
0x186b   :  { %4312 = vrot.lane.b32.xlu1 %v8275_v30, %s7107_s15 }
0x186e   :  { %v3755_v39 = vpop.xlane.xlu0 %3754 }
0x186f   :  { %v3759_v28 = vsub.f32 %v3751_v32, %v3755_v39  ;;  %4403 = vrot.lane.b32.xlu1 %v8275_v30, %s7108_s6 }
0x1871   :  { %v3761_v17 = vmul.f32 1.442695, %v3759_v28 }
0x1872   :  { %v3876_v41 = vpop.xlane.xlu0 %3875 }
0x1873   :  { %7012 = vpow2.f32 %v3761_v17  ;;  %v3880_v38 = vsub.f32 %v3872_v31, %v3876_v41 }
0x1875   :  { %v3882_v19 = vmul.f32 1.442695, %v3880_v38 }
0x1876   :  { %v3995_v62 = vpop.xlane.xlu0 %3994 }
0x1877   :  { %7014 = vpow2.f32 %v3882_v19  ;;  %v3999_v1 = vsub.f32 %v3991_v3, %v3995_v62 }
0x1879   :  { %v4001_v44 = vmul.f32 1.442695, %v3999_v1 }
0x187a   :  { %v3780_v33 = vpop.permute.xlu0 %3779 }
0x187b   :  { %7016 = vpow2.f32 %v4001_v44  ;;  %6688 = vmatprep.subr.mxu0 %v3780_v33 }
0x187c   :  { %6689 = vmatpush3.msra.mxu0 %v3780_v33  ;;  %7018 = vrcp.f32 %v3655_v0 }
0x187d   :  { %6690 = vmatprep.subr.mxu0 %v3778_v16 }
0x187e   :  { %v4018_v29 = vpop.permute.xlu0 %4017  ;;  %6691 = vmatpush3.msra.mxu0 %v3778_v16 }
0x187f   :  { %6702 = vmatprep.subr.mxu0 %v4018_v29 }
0x1880   :  { %v7013_v32 = vpop.eup %7012 }
0x1881   :  { %v3765_v34 = vsel %vm356_vm0, %v7013_v32, 0.0 }
0x1882   :  { %3766 = vadd.xlane.f32.xlu0 %v3765_v34 }
0x1884   :  { %v7015_v11 = vpop.eup %7014 }
0x1885   :  { %v3886_v31 = vsel %vm356_vm0, %v7015_v11, 0.0 }
0x1886   :  { %3887 = vadd.xlane.f32.xlu0 %v3886_v31 }
0x1888   :  { %v7017_v10 = vpop.eup %7016 }
0x1889   :  { %v4005_v3 = vsel %vm356_vm0, %v7017_v10, 0.0  ;;  %v7019_v60 = vpop.eup %7018 }
0x188a   :  { %4006 = vadd.xlane.f32.xlu0 %v4005_v3  ;;  %v3659_v42 = vmul.f32 %v7019_v60, %v8346_v6 }
0x18a0   :  { %4015 = vrot.lane.b32.xlu0 %v8194_v43, %s7108_s6 }
0x18a4   :  { %4227 = vrot.lane.b32.xlu0 %v8279_v58, %s7110_s13 }
0x18a8   :  { %4225 = vrot.lane.b32.xlu0 %v8275_v30, %s7110_s13 }
0x18ac   :  { %4223 = vrot.lane.b32.xlu0 %v8279_v58, %s7109_s7 }
0x18b0   :  { %4409 = vrot.lane.b32.xlu0 %v8279_v58, %s7112_s16 }
0x18b4   :  { %4407 = vrot.lane.b32.xlu0 %v8275_v30, %s7112_s16 }
0x18b8   :  { %4314 = vrot.lane.b32.xlu0 %v8279_v58, %s7107_s15 }
0x18bc   :  { %4405 = vrot.lane.b32.xlu0 %v8279_v58, %s7108_s6 }
0x18bf   :  { %v3770_v12 = vpop.xlane.xlu1 %3769 }
0x18c3   :  { %v3652_v43 = vpop.xlane.xlu0 %3651 }
0x18c4   :  { %7020 = vrcp.f32 %v3652_v43 }
0x18c5   :  { %7022 = vrcp.f32 %v3770_v12 }
0x18c7   :  { %v3891_v61 = vpop.xlane.xlu1 %3890 }
0x18cb   :  { %v4010_v46 = vpop.xlane.xlu1 %4009 }
0x18cf   :  { %v3897_v47 = vpop.permute.xlu1 %3896 }
0x18d1   :  { %v7021_v40 = vpop.eup %7020 }
0x18d2   :  { %v3658_v7 = vmul.f32 %v7021_v40, %v8368_v36  ;;  %v7023_v6 = vpop.eup %7022 }
0x18d3   :  { %v4137_v28 = vpop.permute.xlu1 %4136 }
0x18d4   :  { %6685 = vmatprep.mubr.msk.f32.mxu1 %vm356_vm0, %v3658_v7 }
0x18d5   :  { %6686 = vmatmul.mubr.msk.f32.vlgmr.msra.gmra.mxu1 %vm356_vm0, %v3659_v42 }
0x18d6   :  { %6696 = vmatpush3.msra.mxu1 %v3899_v59  ;;  %v3774_v59 = vmul.f32 %v7023_v6, %v8364_v45 }
0x18d7   :  { %6697 = vmatprep.subr.mxu1 %v3897_v47  ;;  %v4135_v33 = vpop.permute.xlu1 %4134 }
0x18d8   :  { %6698 = vmatpush3.msra.mxu1 %v3897_v47 }
0x18d9   :  { %6709 = vmatprep.subr.msk.mxu1 %vm356_vm0, %v7348_v49 }
0x190b   :  { %v3767_v0 = vpop.xlane.xlu0 %3766 }
0x190c   :  { %7024 = vrcp.f32 %v3767_v0 }
0x190d   :  { %7026 = vrcp.f32 %v3891_v61 }
0x190f   :  { %v3888_v16 = vpop.xlane.xlu0 %3887 }
0x1910   :  { %7028 = vrcp.f32 %v3888_v16 }
0x1911   :  { %7030 = vrcp.f32 %v4010_v46 }
0x1913   :  { %v4007_v36 = vpop.xlane.xlu0 %4006 }
0x1914   :  { %7032 = vrcp.f32 %v4007_v36 }
0x1917   :  { %v4016_v19 = vpop.permute.xlu0 %4015 }
0x1919   :  { %v7025_v39 = vpop.eup %7024 }
0x191a   :  { %v3773_v17 = vmul.f32 %v7025_v39, %v7013_v32  ;;  %v7027_v41 = vpop.eup %7026 }
0x191b   :  { %v3895_v1 = vmul.f32 %v7027_v41, %v8372_v37 }
0x191c   :  { %6692 = vmatprep.mubr.msk.f32.mxu0 %vm356_vm0, %v3773_v17 }
0x191d   :  { %v7029_v38 = vpop.eup %7028  ;;  %6693 = vmatmul.mubr.msk.f32.vlgmr.msra.gmra.mxu0 %vm356_vm0, %v3774_v59 }
0x191e   :  { %6703 = vmatpush3.msra.mxu0 %v4018_v29  ;;  %v3894_v62 = vmul.f32 %v7029_v38, %v7015_v11  ;;  %v7031_v44 = vpop.eup %7030  ;;  %v4222_v29 = vpop.permute.xlu1 %4221 }
0x191f   :  { %6704 = vmatprep.subr.mxu0 %v4016_v19  ;;  %v4014_v37 = vmul.f32 %v7031_v44, %v8376_v5 }
0x1920   :  { %6705 = vmatpush3.msra.mxu0 %v4016_v19  ;;  %6699 = vmatprep.mubr.msk.f32.mxu1 %vm356_vm0, %v3894_v62 }
0x1921   :  { %v7033_v32 = vpop.eup %7032  ;;  %6724 = vmatprep.subr.msk.mxu0 %vm356_vm0, %v7356_v51  ;;  %6700 = vmatmul.mubr.msk.f32.vlgmr.msra.gmra.mxu1 %vm356_vm0, %v3895_v1 }
0x1922   :  { %6710 = vmatpush3.xpose.msk.msra.mxu1 %vm356_vm0, %v7348_v49  ;;  %6721 = vmatprep.mubr.msk.f32.mxu1 %vm356_vm0, %v8275_v30  ;;  %v4013_v45 = vmul.f32 %v7033_v32, %v7017_v10  ;;  %v4319_v49 = vpop.permute.xlu1 %4318 }
0x1923   :  { %6711 = vmatprep.subr.msk.mxu1 %vm356_vm0, %v7354_v50 }
0x1924   :  { %6706 = vmatprep.mubr.msk.f32.mxu0 %vm356_vm0, %v4013_v45 }
0x1925   :  { %6707 = vmatmul.mubr.msk.f32.vlgmr.msra.gmra.mxu0 %vm356_vm0, %v4014_v37 }
0x1926   :  { %6712 = vmatpush3.xpose.msk.msra.mxu1 %vm356_vm0, %v7354_v50  ;;  %6725 = vmatpush3.xpose.msk.msra.mxu0 %vm356_vm0, %v7356_v51  ;;  %v4228_v50 = vpop.permute.xlu0 %4227  ;;  %v4317_v51 = vpop.permute.xlu1 %4316 }
0x1927   :  { %6713 = vmatprep.subr.msk.mxu1 %vm356_vm0, %v7372_v53  ;;  %6726 = vmatprep.subr.msk.mxu0 %vm356_vm0, %v7366_v52 }
0x1928   :  { %6736 = vmatprep.mubr.msk.f32.mxu0 %vm356_vm0, %v4222_v29 }
0x192a   :  { %6714 = vmatpush3.xpose.msk.msra.mxu1 %vm356_vm0, %v7372_v53  ;;  %6727 = vmatpush3.xpose.msk.msra.mxu0 %vm356_vm0, %v7366_v52  ;;  %v4226_v52 = vpop.permute.xlu0 %4225  ;;  %v4313_v53 = vpop.permute.xlu1 %4312 }
0x192b   :  { %6715 = vmatprep.subr.msk.mxu1 %vm356_vm0, %v7384_v55  ;;  %6728 = vmatprep.subr.msk.mxu0 %vm356_vm0, %v7378_v54 }
0x192e   :  { %6716 = vmatpush3.xpose.msk.msra.mxu1 %vm356_vm0, %v7384_v55  ;;  %6729 = vmatpush3.xpose.msk.msra.mxu0 %vm356_vm0, %v7378_v54  ;;  %v4224_v54 = vpop.permute.xlu0 %4223  ;;  %v4404_v55 = vpop.permute.xlu1 %4403 }
0x192f   :  { %6717 = vmatprep.subr.msk.mxu1 %vm356_vm0, %v4137_v28  ;;  %6730 = vmatprep.subr.msk.mxu0 %vm356_vm0, %v7390_v56 }
0x1932   :  { %6718 = vmatpush3.xpose.msk.msra.mxu1 %vm356_vm0, %v4137_v28  ;;  %6731 = vmatpush3.xpose.msk.msra.mxu0 %vm356_vm0, %v7390_v56  ;;  %v4410_v56 = vpop.permute.xlu0 %4409 }
0x1933   :  { %6719 = vmatprep.subr.msk.mxu1 %vm356_vm0, %v4135_v33  ;;  %6732 = vmatprep.subr.msk.mxu0 %vm356_vm0, %v4228_v50 }
0x1936   :  { %6720 = vmatpush3.xpose.msk.msra.mxu1 %vm356_vm0, %v4135_v33  ;;  %6733 = vmatpush3.xpose.msk.msra.mxu0 %vm356_vm0, %v4228_v50 }
0x1937   :  { %6734 = vmatprep.subr.msk.mxu0 %vm356_vm0, %v4226_v52  ;;  %6739 = vmatprep.subr.msk.mxu1 %vm356_vm0, %v7396_v57 }
0x1939   :  { %6722 = vmatmul.mubr.msk.f32.vlgmr.msra.gmra.mxu1 %vm356_vm0, %v8279_v58 }
0x193a   :  { %6735 = vmatpush3.xpose.msk.msra.mxu0 %vm356_vm0, %v4226_v52  ;;  %6740 = vmatpush3.xpose.msk.msra.mxu1 %vm356_vm0, %v7396_v57  ;;  %v4408_v57 = vpop.permute.xlu0 %4407 }
0x193b   :  { %6751 = vmatprep.mubr.msk.f32.mxu1 %vm356_vm0, %v4313_v53  ;;  %6741 = vmatprep.subr.msk.mxu1 %vm356_vm0, %v7442_v20 }
0x193c   :  { %6754 = vmatprep.subr.msk.mxu0 %vm356_vm0, %v7434_v15 }
0x193d   :  { %6737 = vmatmul.mubr.msk.f32.vlgmr.msra.gmra.mxu0 %vm356_vm0, %v4224_v54 }
0x193e   :  { %6742 = vmatpush3.xpose.msk.msra.mxu1 %vm356_vm0, %v7442_v20  ;;  %6755 = vmatpush3.xpose.msk.msra.mxu0 %vm356_vm0, %v7434_v15  ;;  %v4315_v15 = vpop.permute.xlu0 %4314 }
0x193f   :  { %6766 = vmatprep.mubr.msk.f32.mxu0 %vm356_vm0, %v4404_v55  ;;  %6743 = vmatprep.subr.msk.mxu1 %vm356_vm0, %v7454_v22 }
0x1940   :  { %6756 = vmatprep.subr.msk.mxu0 %vm356_vm0, %v7444_v21 }
0x1942   :  { %6744 = vmatpush3.xpose.msk.msra.mxu1 %vm356_vm0, %v7454_v22  ;;  %6757 = vmatpush3.xpose.msk.msra.mxu0 %vm356_vm0, %v7444_v21  ;;  %v4406_v20 = vpop.permute.xlu0 %4405 }
0x1943   :  { %6745 = vmatprep.subr.msk.mxu1 %vm356_vm0, %v7465_v24  ;;  %6758 = vmatprep.subr.msk.mxu0 %vm356_vm0, %v7467_v25 }
0x1946   :  { %6746 = vmatpush3.xpose.msk.msra.mxu1 %vm356_vm0, %v7465_v24  ;;  %6759 = vmatpush3.xpose.msk.msra.mxu0 %vm356_vm0, %v7467_v25 }
0x1947   :  { %6747 = vmatprep.subr.msk.mxu1 %vm356_vm0, %v4319_v49  ;;  %6760 = vmatprep.subr.msk.mxu0 %vm356_vm0, %v7477_v27 }
0x194a   :  { %6748 = vmatpush3.xpose.msk.msra.mxu1 %vm356_vm0, %v4319_v49  ;;  %6761 = vmatpush3.xpose.msk.msra.mxu0 %vm356_vm0, %v7477_v27 }
0x194b   :  { %6749 = vmatprep.subr.msk.mxu1 %vm356_vm0, %v4317_v51  ;;  %6762 = vmatprep.subr.msk.mxu0 %vm356_vm0, %v4410_v56 }
0x194e   :  { %6750 = vmatpush3.xpose.msk.msra.mxu1 %vm356_vm0, %v4317_v51  ;;  %6763 = vmatpush3.xpose.msk.msra.mxu0 %vm356_vm0, %v4410_v56 }
0x194f   :  { %6764 = vmatprep.subr.msk.mxu0 %vm356_vm0, %v4408_v57  ;;  %6769 = vmatprep.subr.mxu1 %v8281_v9 }
0x1951   :  { %6752 = vmatmul.mubr.msk.f32.vlgmr.msra.gmra.mxu1 %vm356_vm0, %v4315_v15 }
0x1952   :  { %6765 = vmatpush3.xpose.msk.msra.mxu0 %vm356_vm0, %v4408_v57  ;;  %6770 = vmatpush3.msra.mxu1 %v8281_v9 }
0x1953   :  { %6771 = vmatprep.subr.mxu1 %v8277_v2 }
0x1954   :  { %6772 = vmatpush3.msra.mxu1 %v8277_v2 }
0x1955   :  { %6767 = vmatmul.mubr.msk.f32.vlgmr.msra.gmra.mxu0 %vm356_vm0, %v4406_v20 }
0x1995   :  { %v8522_v21 = vpop.f32.mrf.mxu1 }
0x1997   :  { %v8524_v22 = vpop.f32.mrf.mxu1 }
0x19dd   :  { %v8526_v24 = vpop.f32.mrf.mxu0 }
0x19df   :  { %v8530_v27 = vpop.f32.mrf.mxu0 }
0x19e1   :  { %v8528_v25 = vpop.f32.mrf.mxu1 }
0x19e3   :  { %v8532_v30 = vpop.f32.mrf.mxu1 }
0x19e5   :  { %v8534_v58 = vpop.f32.mrf.mxu0 }
0x19e7   :  { %v8536_v34 = vpop.f32.mrf.mxu0 }
0x19f9   :  { %v6723_v5 = vpop.f32.mrf.mxu1 }
0x19fb   :  { %v8538_v11 = vpop.f32.mrf.mxu1 }
0x19fc   :  { %4496 = vrot.lane.b32.xlu1 %v8538_v11, %s7109_s7 }
0x19fd   :  { %v6738_v31 = vpop.f32.mrf.mxu0 }
0x19ff   :  { %v8542_v10 = vpop.f32.mrf.mxu0 }
0x1a00   :  { %4504 = vrot.lane.b32.xlu0 %v8542_v10, %s7113_s19 }
0x1a11   :  { %v8546_v3 = vpop.f32.mrf.mxu1 }
0x1a13   :  { %v8548_v43 = vpop.f32.mrf.mxu1 }
0x1a14   :  { %4512 = vrot.lane.b32.xlu1 %v8548_v43, %s7114_s20 }
0x1a15   :  { %v8552_v12 = vpop.f32.mrf.mxu0 }
0x1a17   :  { %v8554_v61 = vpop.f32.mrf.mxu0 }
0x1a18   :  { %4498 = vrot.lane.b32.xlu1 %v6723_v5, %s7109_s7  ;;  %4520 = vrot.lane.b32.xlu0 %v8554_v61, %s7115_s21 }
0x1a1c   :  { %4514 = vrot.lane.b32.xlu1 %v8546_v3, %s7114_s20  ;;  %4506 = vrot.lane.b32.xlu0 %v6738_v31, %s7113_s19 }
0x1a20   :  { %4522 = vrot.lane.b32.xlu0 %v8552_v12, %s7115_s21  ;;  %s7121_s21 = smov 125  }
0x1a6e   :  { %v4497_v60 = vpop.permute.xlu1 %4496 }
0x1a72   :  { %v4505_v46 = vpop.permute.xlu0 %4504 }
0x1a73   :  { %v4526_v7 = vsel %vm1131_vm9, %v4497_v60, %v4505_v46 }
0x1a86   :  { %v4513_v40 = vpop.permute.xlu1 %4512 }
0x1a87   :  { %v4528_v42 = vsel %vm1134_vm10, %v4526_v7, %v4513_v40 }
0x1a8a   :  { %v4521_v47 = vpop.permute.xlu0 %4520  ;;  %v4499_v0 = vpop.permute.xlu1 %4498 }
0x1a8b   :  { %v4530_v16 = vsel %vm1137_vm11, %v4528_v42, %v4521_v47 }
0x1a8c   :  { %v4532_v36 = vsel %vm1140_vm12, %v4530_v16, 0.0 }
0x1a8d   :  { %4534 = vrot.lane.b32.xlu1 %v4532_v36, %s7103_s17 }
0x1a8e   :  { %v4507_v6 = vpop.permute.xlu0 %4506  ;;  %v4515_v28 = vpop.permute.xlu1 %4514 }
0x1a8f   :  { %v4527_v39 = vsel %vm1131_vm9, %v4499_v0, %v4507_v6 }
0x1a90   :  { %v4529_v17 = vsel %vm1134_vm10, %v4527_v39, %v4515_v28 }
0x1a92   :  { %v4523_v59 = vpop.permute.xlu0 %4522 }
0x1a93   :  { %v4531_v41 = vsel %vm1137_vm11, %v4529_v17, %v4523_v59 }
0x1a94   :  { %v4533_v38 = vsel %vm1140_vm12, %v4531_v41, 0.0 }
0x1a95   :  { %4536 = vrot.lane.b32.xlu0 %v4533_v38, %s7103_s17 }
0x1aff   :  { %v4535_v19 = vpop.permute.xlu1 %4534 }
0x1b00   :  { %v4538_v62 = vsel %vm7574_vm13, %v4535_v19, %v4532_v36 }
0x1b01   :  { %4540 = vrot.lane.b32.xlu1 %v4538_v62, %s7104_s18 }
0x1b07   :  { %v4537_v1 = vpop.permute.xlu0 %4536 }
0x1b08   :  { %v4539_v44 = vsel %vm7582_vm14, %v4537_v1, %v4533_v38 }
0x1b09   :  { %4542 = vrot.lane.b32.xlu0 %v4539_v44, %s7104_s18 }
0x1b73   :  { %v4541_v33 = vpop.permute.xlu1 %4540 }
0x1b74   :  { %v4544_v32 = vsel %vm7589_vm15, %v4541_v33, %v4538_v62 }
0x1b75   :  { %4546 = vrot.lane.b32.xlu1 %v4544_v32, %s7116_s22 }
0x1b7b   :  { %v4543_v45 = vpop.permute.xlu0 %4542 }
0x1b7c   :  { %v4545_v37 = vsel %vm7596_vm2, %v4543_v45, %v4539_v44 }
0x1b7d   :  { %4548 = vrot.lane.b32.xlu0 %v4545_v37, %s7116_s22 }
0x1be7   :  { %v4547_v23 = vpop.permute.xlu1 %4546 }
0x1be8   :  { %v4550_v29 = vsel %vm7603_vm3, %v4547_v23, %v4544_v32 }
0x1be9   :  { %4552 = vrot.lane.b32.xlu1 %v4550_v29, %s7117_s23 }
0x1bef   :  { %v4549_v35 = vpop.permute.xlu0 %4548 }
0x1bf0   :  { %v4551_v49 = vsel %vm7610_vm5, %v4549_v35, %v4545_v37 }
0x1bf1   :  { %4669 = vrot.lane.b32.xlu1 %v4551_v49, %s7118_s24  ;;  %v4559_v18 = vadd.f32 %v6723_v5, %v4551_v49 }
0x1bf3   :  { %v4561_v63 = vmul.f32 0.25, %v4559_v18 }
0x1bf5   :  { %4790 = vrot.lane.b32.xlu1 %v4551_v49, %s7119_s25  ;;  %v4565_v50 = vsel %vm356_vm0, %v4561_v63, -inf }
0x1bf9   :  { %4909 = vrot.lane.b32.xlu1 %v4551_v49, %s8939_s8 }
0x1c1d   :  { %4566 = vmax.xlane.f32.xlu1 %v4565_v50 }
0x1c5b   :  { %v4553_v51 = vpop.permute.xlu1 %4552 }
0x1c5c   :  { %4667 = vrot.lane.b32.xlu0 %v4553_v51, %s7118_s24  ;;  %v4558_v53 = vadd.f32 %v4553_v51, %v8538_v11 }
0x1c5e   :  { %v4560_v55 = vmul.f32 0.25, %v4558_v53 }
0x1c60   :  { %4788 = vrot.lane.b32.xlu0 %v4553_v51, %s7119_s25  ;;  %v4562_v56 = vsel %vm356_vm0, %v4560_v55, -inf }
0x1c63   :  { %v4670_v4 = vpop.permute.xlu1 %4669 }
0x1c64   :  { %4907 = vrot.lane.b32.xlu0 %v4553_v51, %s8939_s8  ;;  %v4674_v8 = vadd.f32 %v6738_v31, %v4670_v4 }
0x1c66   :  { %v4676_v52 = vmul.f32 0.25, %v4674_v8 }
0x1c67   :  { %v4791_v57 = vpop.permute.xlu1 %4790 }
0x1c68   :  { %v4680_v54 = vsel %vm356_vm0, %v4676_v52, -inf  ;;  %v4795_v40 = vadd.f32 %v8546_v3, %v4791_v57 }
0x1c6a   :  { %v4797_v42 = vmul.f32 0.25, %v4795_v40 }
0x1c6b   :  { %v4910_v15 = vpop.permute.xlu1 %4909 }
0x1c6c   :  { %v4914_v47 = vadd.f32 %v8552_v12, %v4910_v15  ;;  %v4801_v17 = vsel %vm356_vm0, %v4797_v42, -inf }
0x1c6e   :  { %v4916_v39 = vmul.f32 0.25, %v4914_v47 }
0x1c70   :  { %v4920_v12 = vsel %vm356_vm0, %v4916_v39, -inf }
0x1c83   :  { %4681 = vmax.xlane.f32.xlu0 %v4680_v54 }
0x1c87   :  { %4563 = vmax.xlane.f32.xlu0 %v4562_v56 }
0x1ca6   :  { %v4567_v20 = vpop.xlane.xlu1 %4566 }
0x1ca7   :  { %v4569_v5 = vsub.f32 %v4561_v63, %v4567_v20 }
0x1ca9   :  { %v4572_v60 = vmul.f32 1.442695, %v4569_v5 }
0x1cab   :  { %7034 = vpow2.f32 %v4572_v60 }
0x1cce   :  { %v4668_v46 = vpop.permute.xlu0 %4667 }
0x1ccf   :  { %v4673_v31 = vadd.f32 %v4668_v46, %v8542_v10 }
0x1cd1   :  { %v4675_v7 = vmul.f32 0.25, %v4673_v31 }
0x1cd2   :  { %v4789_v11 = vpop.permute.xlu0 %4788 }
0x1cd3   :  { %v4794_v0 = vadd.f32 %v4789_v11, %v8548_v43  ;;  %v4677_v16 = vsel %vm356_vm0, %v4675_v7, -inf  ;;  %v8611_v43 = vpop.eup %7034 }
0x1cd4   :  { %4678 = vmax.xlane.f32.xlu0 %v4677_v16  ;;  %v4577_v41 = vsel %vm356_vm0, %v8611_v43, 0.0 }
0x1cd5   :  { %v4796_v36 = vmul.f32 0.25, %v4794_v0 }
0x1cd6   :  { %v4908_v6 = vpop.permute.xlu0 %4907 }
0x1cd7   :  { %v4913_v28 = vadd.f32 %v4908_v6, %v8554_v61  ;;  %v4798_v3 = vsel %vm356_vm0, %v4796_v36, -inf }
0x1cd8   :  { %4799 = vmax.xlane.f32.xlu1 %v4798_v3  ;;  %4802 = vmax.xlane.f32.xlu0 %v4801_v17  ;;  %v5063_v17 = vld [vmem:[%s8920_s3 + $0x180] sm:$0xff] }
0x1cd9   :  { %v4915_v10 = vmul.f32 0.25, %v4913_v28 }
0x1cdb   :  { %v4917_v59 = vsel %vm356_vm0, %v4915_v10, -inf }
0x1cdc   :  { %4918 = vmax.xlane.f32.xlu1 %v4917_v59  ;;  %4921 = vmax.xlane.f32.xlu0 %v4920_v12 }
0x1ce0   :  { %4578 = vadd.xlane.f32.xlu0 %v4577_v41 }
0x1ced   :  { %4703 = vrot.lane.b32.xlu1 %v8281_v9, %s7109_s7 }
0x1cf1   :  { %4822 = vrot.lane.b32.xlu1 %v8281_v9, %s7107_s15 }
0x1cf5   :  { %4941 = vrot.lane.b32.xlu1 %v8281_v9, %s7108_s6 }
0x1cf6   :  { %4701 = vrot.lane.b32.xlu0 %v8277_v2, %s7109_s7 }
0x1d0c   :  { %v4682_v61 = vpop.xlane.xlu0 %4681 }
0x1d0d   :  { %v4684_v38 = vsub.f32 %v4676_v52, %v4682_v61 }
0x1d0f   :  { %v4687_v19 = vmul.f32 1.442695, %v4684_v38 }
0x1d10   :  { %v4564_v62 = vpop.xlane.xlu0 %4563 }
0x1d11   :  { %7036 = vpow2.f32 %v4687_v19  ;;  %v4568_v1 = vsub.f32 %v4560_v55, %v4564_v62 }
0x1d13   :  { %v4570_v44 = vmul.f32 1.442695, %v4568_v1 }
0x1d15   :  { %7038 = vpow2.f32 %v4570_v44 }
0x1d1e   :  { %v8623_v33 = vpop.eup %7036 }
0x1d1f   :  { %v4692_v32 = vsel %vm356_vm0, %v8623_v33, 0.0 }
0x1d20   :  { %4693 = vadd.xlane.f32.xlu0 %v4692_v32 }
0x1d22   :  { %v7039_v45 = vpop.eup %7038 }
0x1d23   :  { %v4574_v9 = vsel %vm356_vm0, %v7039_v45, 0.0 }
0x1d24   :  { %4575 = vadd.xlane.f32.xlu1 %v4574_v9 }
0x1d5d   :  { %v4679_v37 = vpop.xlane.xlu0 %4678 }
0x1d5e   :  { %v4683_v23 = vsub.f32 %v4675_v7, %v4679_v37 }
0x1d60   :  { %v4685_v29 = vmul.f32 1.442695, %v4683_v23 }
0x1d61   :  { %v4803_v35 = vpop.xlane.xlu0 %4802  ;;  %v4800_v49 = vpop.xlane.xlu1 %4799 }
0x1d62   :  { %7040 = vpow2.f32 %v4685_v29  ;;  %v4805_v18 = vsub.f32 %v4797_v42, %v4803_v35  ;;  %v4804_v63 = vsub.f32 %v4796_v36, %v4800_v49 }
0x1d64   :  { %v4808_v50 = vmul.f32 1.442695, %v4805_v18  ;;  %v4806_v51 = vmul.f32 1.442695, %v4804_v63  ;;  %v5061_v18 = vld [vmem:[%s8920_s3 + $0x170] sm:$0xff] }
0x1d65   :  { %v4922_v4 = vpop.xlane.xlu0 %4921  ;;  %v4919_v8 = vpop.xlane.xlu1 %4918 }
0x1d66   :  { %7042 = vpow2.f32 %v4808_v50  ;;  %v4924_v52 = vsub.f32 %v4916_v39, %v4922_v4  ;;  %v4923_v53 = vsub.f32 %v4915_v10, %v4919_v8  ;;  %v5059_v50 = vld [vmem:[%s8920_s3 + $0x160] sm:$0xff]  ;;  %v5058_v4 = vld [vmem:[%s8920_s3 + $0x158] sm:$0xff]  ;;  %v5057_v8 = vld [vmem:[%s8920_s3 + $0x150] sm:$0xff] }
0x1d67   :  { %7044 = vpow2.f32 %v4806_v51 }
0x1d68   :  { %v4927_v54 = vmul.f32 1.442695, %v4924_v52  ;;  %v4925_v55 = vmul.f32 1.442695, %v4923_v53  ;;  %v5056_v52 = vld [vmem:[%s8920_s3 + $0x148] sm:$0xff] }
0x1d69   :  { %v4579_v56 = vpop.xlane.xlu0 %4578  ;;  %v4704_v57 = vpop.permute.xlu1 %4703 }
0x1d6a   :  { %7046 = vpow2.f32 %v4927_v54  ;;  %6776 = vmatprep.subr.mxu0 %v4704_v57 }
0x1d6b   :  { %7048 = vpow2.f32 %v4925_v55  ;;  %6777 = vmatpush3.msra.mxu0 %v4704_v57 }
0x1d6c   :  { %7050 = vrcp.f32 %v4579_v56 }
0x1d6d   :  { %v4702_v15 = vpop.permute.xlu0 %4701  ;;  %v4823_v20 = vpop.permute.xlu1 %4822 }
0x1d6e   :  { %6778 = vmatprep.subr.mxu0 %v4702_v15  ;;  %6783 = vmatprep.subr.mxu1 %v4823_v20 }
0x1d6f   :  { %v7041_v5 = vpop.eup %7040  ;;  %6779 = vmatpush3.msra.mxu0 %v4702_v15 }
0x1d70   :  { %v4689_v60 = vsel %vm356_vm0, %v7041_v5, 0.0 }
0x1d71   :  { %4690 = vadd.xlane.f32.xlu1 %v4689_v60  ;;  %v4942_v46 = vpop.permute.xlu1 %4941 }
0x1d72   :  { %6790 = vmatprep.subr.mxu0 %v4942_v46 }
0x1d73   :  { %v7043_v40 = vpop.eup %7042 }
0x1d74   :  { %v7045_v31 = vpop.eup %7044  ;;  %v4813_v7 = vsel %vm356_vm0, %v7043_v40, 0.0 }
0x1d75   :  { %4814 = vadd.xlane.f32.xlu0 %v4813_v7  ;;  %v4810_v11 = vsel %vm356_vm0, %v7045_v31, 0.0 }
0x1d76   :  { %4811 = vadd.xlane.f32.xlu1 %v4810_v11 }
0x1d77   :  { %v8631_v42 = vpop.eup %7046 }
0x1d78   :  { %v8633_v47 = vpop.eup %7048  ;;  %v4932_v0 = vsel %vm356_vm0, %v8631_v42, 0.0 }
0x1d79   :  { %4933 = vadd.xlane.f32.xlu0 %v4932_v0  ;;  %v4929_v16 = vsel %vm356_vm0, %v8633_v47, 0.0  ;;  %v7051_v36 = vpop.eup %7050 }
0x1d7a   :  { %4930 = vadd.xlane.f32.xlu1 %v4929_v16 }
0x1d8b   :  { %4939 = vrot.lane.b32.xlu1 %v8277_v2, %s7108_s6 }
0x1d8f   :  { %4106 = vrot.lane.b32.xlu1 %v8526_v24, %s7112_s16  ;;  %4820 = vrot.lane.b32.xlu0 %v8277_v2, %s7107_s15 }
0x1d93   :  { %4114 = vrot.lane.b32.xlu1 %v8528_v25, %s7111_s14  ;;  %4104 = vrot.lane.b32.xlu0 %v8530_v27, %s7112_s16  ;;  %v4583_v25 = vmul.f32 %v7051_v36, %v8611_v43 }
0x1d97   :  { %4122 = vrot.lane.b32.xlu1 %v8534_v58, %s7110_s13  ;;  %4112 = vrot.lane.b32.xlu0 %v8532_v30, %s7111_s14 }
0x1d9b   :  { %4120 = vrot.lane.b32.xlu0 %v8536_v34, %s7110_s13 }
0x1da9   :  { %v4694_v27 = vpop.xlane.xlu0 %4693 }
0x1dad   :  { %v4576_v24 = vpop.xlane.xlu1 %4575 }
0x1dae   :  { %7052 = vrcp.f32 %v4576_v24 }
0x1daf   :  { %7054 = vrcp.f32 %v4694_v27 }
0x1dbb   :  { %v7053_v2 = vpop.eup %7052 }
0x1dbc   :  { %v4582_v6 = vmul.f32 %v7053_v2, %v7039_v45  ;;  %v7055_v10 = vpop.eup %7054 }
0x1dbd   :  { %v4698_v41 = vmul.f32 %v7055_v10, %v8623_v33  ;;  %v5062_v33 = vld [vmem:[%s8920_s3 + $0x178] sm:$0xff] }
0x1dbe   :  { %6773 = vmatprep.mubr.msk.f32.mxu1 %vm356_vm0, %v4582_v6 }
0x1dbf   :  { %6774 = vmatmul.mubr.msk.f32.vlgmr.msra.gmra.mxu1 %vm356_vm0, %v4583_v25 }
0x1dc0   :  { %6784 = vmatpush3.msra.mxu1 %v4823_v20 }
0x1dfa   :  { %v4691_v58 = vpop.xlane.xlu1 %4690 }
0x1dfb   :  { %7056 = vrcp.f32 %v4691_v58 }
0x1dfe   :  { %v4815_v30 = vpop.xlane.xlu0 %4814 }
0x1dff   :  { %7058 = vrcp.f32 %v4815_v30  ;;  %v4812_v34 = vpop.xlane.xlu1 %4811 }
0x1e00   :  { %7060 = vrcp.f32 %v4812_v34 }
0x1e02   :  { %v4934_v39 = vpop.xlane.xlu0 %4933 }
0x1e03   :  { %7062 = vrcp.f32 %v4934_v39  ;;  %v4931_v28 = vpop.xlane.xlu1 %4930 }
0x1e04   :  { %7064 = vrcp.f32 %v4931_v28 }
0x1e06   :  { %v4821_v3 = vpop.permute.xlu0 %4820 }
0x1e07   :  { %6785 = vmatprep.subr.mxu1 %v4821_v3  ;;  %v4940_v61 = vpop.permute.xlu1 %4939 }
0x1e08   :  { %v7057_v59 = vpop.eup %7056  ;;  %6786 = vmatpush3.msra.mxu1 %v4821_v3 }
0x1e09   :  { %v4697_v12 = vmul.f32 %v7057_v59, %v7041_v5  ;;  %6797 = vmatprep.subr.mxu1 %v5063_v17 }
0x1e0a   :  { %v4105_v43 = vpop.permute.xlu0 %4104 }
0x1e0b   :  { %6780 = vmatprep.mubr.msk.f32.mxu0 %vm356_vm0, %v4697_v12  ;;  %v4126_v9 = vsel %vm356_vm0, %v8524_v22, %v4105_v43  ;;  %v4107_v37 = vpop.permute.xlu1 %4106  ;;  %v5060_v22 = vld [vmem:[%s8920_s3 + $0x168] sm:$0xff] }
0x1e0c   :  { %v7059_v38 = vpop.eup %7058  ;;  %6781 = vmatmul.mubr.msk.f32.vlgmr.msra.gmra.mxu0 %vm356_vm0, %v4698_v41  ;;  %v4127_v54 = vsel %vm356_vm0, %v8522_v21, %v4107_v37 }
0x1e0d   :  { %v7061_v19 = vpop.eup %7060  ;;  %6791 = vmatpush3.msra.mxu0 %v4942_v46  ;;  %v4819_v62 = vmul.f32 %v7059_v38, %v7043_v40 }
0x1e0e   :  { %6792 = vmatprep.subr.mxu0 %v4940_v61  ;;  %v4113_v1 = vpop.permute.xlu0 %4112  ;;  %v4818_v44 = vmul.f32 %v7061_v19, %v7045_v31 }
0x1e0f   :  { %6793 = vmatpush3.msra.mxu0 %v4940_v61  ;;  %v4128_v29 = vsel %vm458_vm4, %v4126_v9, %v4113_v1  ;;  %v4115_v51 = vpop.permute.xlu1 %4114 }
0x1e10   :  { %v7063_v32 = vpop.eup %7062  ;;  %6787 = vmatprep.mubr.msk.f32.mxu1 %vm356_vm0, %v4818_v44  ;;  %v4129_v55 = vsel %vm458_vm4, %v4127_v54, %v4115_v51 }
0x1e11   :  { %v7065_v45 = vpop.eup %7064  ;;  %6788 = vmatmul.mubr.msk.f32.vlgmr.msra.gmra.mxu1 %vm356_vm0, %v4819_v62  ;;  %v4938_v23 = vmul.f32 %v7063_v32, %v8631_v42 }
0x1e12   :  { %6798 = vmatpush3.msra.mxu1 %v5063_v17  ;;  %v4121_v35 = vpop.permute.xlu0 %4120  ;;  %v4937_v49 = vmul.f32 %v7065_v45, %v8633_v47 }
0x1e13   :  { %6799 = vmatprep.subr.mxu1 %v5062_v33  ;;  %v4130_v63 = vsel %vm189_vm8, %v4128_v29, %v4121_v35  ;;  %v4123_v53 = vpop.permute.xlu1 %4122 }
0x1e14   :  { %6800 = vmatpush3.msra.mxu1 %v5062_v33  ;;  %6794 = vmatprep.mubr.msk.f32.mxu0 %vm356_vm0, %v4937_v49  ;;  %v4131_v56 = vsel %vm189_vm8, %v4129_v55, %v4123_v53  ;;  %v5238_v49 = vld [vmem:[%s8920_s3 + $0x1a0] sm:$0xff] }
0x1e15   :  { %6801 = vmatprep.subr.mxu1 %v5061_v18  ;;  %6795 = vmatmul.mubr.msk.f32.vlgmr.msra.gmra.mxu0 %vm356_vm0, %v4938_v23  ;;  %v8747_v23 = vld [vmem:[%s8922_s1 + $0x14] ss:$0 sm:$0xff] }
0x1e16   :  { %6802 = vmatpush3.msra.mxu1 %v5061_v18  ;;  %6813 = vmatprep.mubr.msk.f32.mxu1 %vm2629_vm6, %v4130_v63  ;;  %v5237_v18 = vld [vmem:[%s8920_s3 + $0x198] sm:$0xff]  ;;  %v5236_v63 = vld [vmem:[%s8920_s3 + $0x190] sm:$0xff] }
0x1e17   :  { %6803 = vmatprep.subr.mxu1 %v5060_v22  ;;  %6819 = vmatprep.subr.mxu0 %v5238_v49 }
0x1e18   :  { %6804 = vmatpush3.msra.mxu1 %v5060_v22  ;;  %6820 = vmatpush3.msra.mxu0 %v5238_v49  ;;  %v5235_v22 = vld [vmem:[%s8920_s3 + $0x188] sm:$0xff] }
0x1e19   :  { %6805 = vmatprep.subr.mxu1 %v5059_v50  ;;  %6821 = vmatprep.subr.mxu0 %v5237_v18 }
0x1e1a   :  { %6806 = vmatpush3.msra.mxu1 %v5059_v50  ;;  %6822 = vmatpush3.msra.mxu0 %v5237_v18 }
0x1e1b   :  { %6807 = vmatprep.subr.mxu1 %v5058_v4  ;;  %6823 = vmatprep.subr.mxu0 %v5236_v63 }
0x1e1c   :  { %6808 = vmatpush3.msra.mxu1 %v5058_v4  ;;  %6824 = vmatpush3.msra.mxu0 %v5236_v63 }
0x1e1d   :  { %6809 = vmatprep.subr.mxu1 %v5057_v8  ;;  %6825 = vmatprep.subr.mxu0 %v5235_v22 }
0x1e1e   :  { %6810 = vmatpush3.msra.mxu1 %v5057_v8  ;;  %6826 = vmatpush3.msra.mxu0 %v5235_v22 }
0x1e1f   :  { %6811 = vmatprep.subr.mxu1 %v5056_v52 }
0x1e20   :  { %6812 = vmatpush3.msra.mxu1 %v5056_v52 }
0x1e21   :  { %6814 = vmatmul.mubr.msk.f32.vlgmr.msra.gmra.mxu1 %vm2629_vm6, %v4131_v56 }
0x1e7f   :  { %v6775_v57 = vpop.f32.mrf.mxu1 }
0x1e81   :  { %v4656_v5 = vpop.f32.mrf.mxu1 }
0x1ecc   :  { %v6782_v15 = vpop.f32.mrf.mxu0 }
0x1ecd   :  { %5030 = vrot.lane.b32.xlu1 %v6782_v15, %s7112_s16 }
0x1ece   :  { %v4779_v20 = vpop.f32.mrf.mxu0 }
0x1ecf   :  { %5028 = vrot.lane.b32.xlu0 %v4779_v20, %s7112_s16 }
0x1ed1   :  { %v6789_v60 = vpop.f32.mrf.mxu1 }
0x1ed2   :  { %5038 = vrot.lane.b32.xlu1 %v6789_v60, %s7111_s14 }
0x1ed3   :  { %v4898_v21 = vpop.f32.mrf.mxu1 }
0x1ed4   :  { %5036 = vrot.lane.b32.xlu0 %v4898_v21, %s7111_s14 }
0x1ed5   :  { %v6796_v46 = vpop.f32.mrf.mxu0 }
0x1ed6   :  { %5046 = vrot.lane.b32.xlu1 %v6796_v46, %s7110_s13 }
0x1ed7   :  { %v5017_v40 = vpop.f32.mrf.mxu0 }
0x1ed8   :  { %5044 = vrot.lane.b32.xlu0 %v5017_v40, %s7110_s13 }
0x1ee1   :  { %v6815_v31 = vpop.f32.mrf.mxu1 }
0x1ee2   :  { %v8711_v42 = vadd.f32 %v6815_v31, %v8141_v48  ;;  %v5352_v31 = vld [vmem:[%s8920_s3 + $0x1e0] sm:$0xff] }
0x1ee3   :  { %v5142_v7 = vpop.f32.mrf.mxu1  ;;  %6833 = vmatprep.subr.mxu0 %v5352_v31 }
0x1ee4   :  { %v8708_v11 = vadd.f32 %v5142_v7, %v8146_v26  ;;  %v5170_v0 = vsel %vm458_vm4, %v8711_v42, 0.0  ;;  %v5351_v7 = vld [vmem:[%s8920_s3 + $0x1d8] sm:$0xff] }
0x1ee6   :  { %v5167_v47 = vsel %vm458_vm4, %v8708_v11, 0.0 }
0x1ef7   :  { %5168 = vadd.xlane.f32.xlu0 %v5167_v47  ;;  %v5350_v47 = vld [vmem:[%s8920_s3 + $0x1d0] sm:$0xff] }
0x1efa   :  { %5171 = vadd.xlane.f32.xlu1 %v5170_v0  ;;  %v5349_v0 = vld [vmem:[%s8920_s3 + $0x1c8] sm:$0xff] }
0x1f3f   :  { %v5031_v16 = vpop.permute.xlu1 %5030 }
0x1f40   :  { %v5051_v26 = vsel %vm356_vm0, %v6775_v57, %v5031_v16  ;;  %v5348_v16 = vld [vmem:[%s8920_s3 + $0x1c0] sm:$0xff] }
0x1f41   :  { %v5029_v24 = vpop.permute.xlu0 %5028 }
0x1f42   :  { %v5050_v6 = vsel %vm356_vm0, %v4656_v5, %v5029_v24  ;;  %v5347_v24 = vld [vmem:[%s8920_s3 + $0x1b8] sm:$0xff] }
0x1f44   :  { %v5039_v36 = vpop.permute.xlu1 %5038 }
0x1f45   :  { %v5053_v58 = vsel %vm458_vm4, %v5051_v26, %v5039_v36  ;;  %v5346_v36 = vld [vmem:[%s8920_s3 + $0x1b0] sm:$0xff] }
0x1f46   :  { %v5037_v2 = vpop.permute.xlu0 %5036 }
0x1f47   :  { %v5052_v48 = vsel %vm458_vm4, %v5050_v6, %v5037_v2  ;;  %v5345_v2 = vld [vmem:[%s8920_s3 + $0x1a8] sm:$0xff] }
0x1f48   :  { %v5047_v25 = vpop.permute.xlu1 %5046 }
0x1f49   :  { %v5055_v34 = vsel %vm189_vm8, %v5053_v58, %v5047_v25 }
0x1f4a   :  { %v5045_v27 = vpop.permute.xlu0 %5044 }
0x1f4b   :  { %v5054_v30 = vsel %vm189_vm8, %v5052_v48, %v5045_v27 }
0x1f4c   :  { %6816 = vmatprep.mubr.msk.f32.mxu1 %vm2629_vm6, %v5054_v30 }
0x1f4d   :  { %6817 = vmatmul.mubr.msk.f32.gmra.mxu1 %vm2629_vm6, %v5055_v34 }
0x1f80   :  { %v5169_v39 = vpop.xlane.xlu0 %5168 }
0x1f81   :  { %v5179_v28 = vmul.f32 0.03125, %v5169_v39 }
0x1f83   :  { %v5183_v3 = vsub.f32 %v8708_v11, %v5179_v28  ;;  %v5172_v59 = vpop.xlane.xlu1 %5171 }
0x1f84   :  { %v5180_v43 = vmul.f32 0.03125, %v5172_v59 }
0x1f85   :  { %v5187_v17 = vmul.f32 %v5183_v3, %v5183_v3 }
0x1f86   :  { %v5184_v19 = vsub.f32 %v8711_v42, %v5180_v43 }
0x1f87   :  { %v5191_v10 = vsel %vm458_vm4, %v5187_v17, 0.0 }
0x1f88   :  { %5192 = vadd.xlane.f32.xlu1 %v5191_v10  ;;  %v5188_v45 = vmul.f32 %v5184_v19, %v5184_v19 }
0x200d   :  { %v6818_v12 = vpop.f32.mrf.mxu1 }
0x200e   :  { %v8732_v62 = vadd.f32 %v6818_v12, %v8157_v14  ;;  %v8742_v14 = vld [vmem:[%s8922_s1 + $0x13] ss:$0 sm:$0xff]  ;;  %v6024_v12 = vld [vmem:[%s8922_s1 + $0x15] ss:$0 sm:$0xff] }
0x200f   :  { %v5152_v41 = vpop.f32.mrf.mxu1 }
0x2010   :  { %v8728_v61 = vadd.f32 %v5152_v41, %v8160_v13  ;;  %v5176_v33 = vsel %vm458_vm4, %v8732_v62, 0.0  ;;  %v5194_v13 = vsel %vm458_vm4, %v5188_v45, 0.0 }
0x2011   :  { %v5193_v38 = vpop.xlane.xlu1 %5192 }
0x2012   :  { %v5203_v1 = vmul.f32 0.03125, %v5193_v38  ;;  %v5173_v44 = vsel %vm458_vm4, %v8728_v61, 0.0 }
0x2013   :  { %5174 = vadd.xlane.f32.xlu0 %v5173_v44 }
0x2014   :  { %v5207_v32 = vadd.f32 1e-05, %v5203_v1 }
0x2016   :  { %7066 = vrsqrt.f32 %v5207_v32 }
0x2017   :  { %5177 = vadd.xlane.f32.xlu0 %v5176_v33 }
0x201b   :  { %5195 = vadd.xlane.f32.xlu0 %v5194_v13 }
0x2023   :  { %v7067_v9 = vpop.eup %7066 }
0x2024   :  { %v5215_v37 = vmul.f32 %v7067_v9, %v5183_v3 }
0x2026   :  { %v5223_v29 = vmul.f32 %v8742_v14, %v5215_v37 }
0x2028   :  { %v5231_v35 = vadd.f32 %v8747_v23, %v5223_v29 }
0x202a   :  { %6827 = vmatprep.mubr.msk.f32.mxu0 %vm458_vm4, %v5231_v35 }
0x209c   :  { %v5175_v50 = vpop.xlane.xlu0 %5174 }
0x209d   :  { %v5181_v51 = vmul.f32 0.03125, %v5175_v50 }
0x209f   :  { %v5185_v4 = vsub.f32 %v8728_v61, %v5181_v51 }
0x20a0   :  { %v5178_v8 = vpop.xlane.xlu0 %5177 }
0x20a1   :  { %v5182_v52 = vmul.f32 0.03125, %v5178_v8  ;;  %v5189_v53 = vmul.f32 %v5185_v4, %v5185_v4 }
0x20a3   :  { %v5186_v54 = vsub.f32 %v8732_v62, %v5182_v52  ;;  %v5197_v55 = vsel %vm458_vm4, %v5189_v53, 0.0 }
0x20a4   :  { %5198 = vadd.xlane.f32.xlu1 %v5197_v55  ;;  %v5196_v56 = vpop.xlane.xlu0 %5195 }
0x20a5   :  { %v5204_v57 = vmul.f32 0.03125, %v5196_v56  ;;  %v5190_v15 = vmul.f32 %v5186_v54, %v5186_v54 }
0x20a7   :  { %v5208_v20 = vadd.f32 1e-05, %v5204_v57  ;;  %v5200_v5 = vsel %vm458_vm4, %v5190_v15, 0.0 }
0x20a8   :  { %5201 = vadd.xlane.f32.xlu0 %v5200_v5 }
0x20a9   :  { %7068 = vrsqrt.f32 %v5208_v20 }
0x20b6   :  { %v7069_v60 = vpop.eup %7068 }
0x20b7   :  { %v5216_v21 = vmul.f32 %v7069_v60, %v5184_v19 }
0x20b9   :  { %v5224_v46 = vmul.f32 %v8742_v14, %v5216_v21 }
0x20bb   :  { %v5232_v40 = vadd.f32 %v8747_v23, %v5224_v46 }
0x20bd   :  { %6828 = vmatmul.mubr.msk.f32.vlgmr.msra.gmra.mxu0 %vm458_vm4, %v5232_v40  ;;  %v5535_v40 = vld [vmem:[%s8920_s3 + $0x68] sm:$0xff] }
0x20be   :  { %6834 = vmatpush3.msra.mxu0 %v5352_v31  ;;  %v5534_v31 = vld [vmem:[%s8920_s3 + $0x60] sm:$0xff] }
0x20bf   :  { %6835 = vmatprep.subr.mxu0 %v5351_v7 }
0x20c0   :  { %6836 = vmatpush3.msra.mxu0 %v5351_v7  ;;  %v5533_v7 = vld [vmem:[%s8920_s3 + $0x58] sm:$0xff] }
0x20c1   :  { %6837 = vmatprep.subr.mxu0 %v5350_v47 }
0x20c2   :  { %6838 = vmatpush3.msra.mxu0 %v5350_v47 }
0x20c3   :  { %6839 = vmatprep.subr.mxu0 %v5349_v0 }
0x20c4   :  { %6840 = vmatpush3.msra.mxu0 %v5349_v0 }
0x20c5   :  { %6841 = vmatprep.subr.mxu0 %v5348_v16 }
0x20c6   :  { %6842 = vmatpush3.msra.mxu0 %v5348_v16 }
0x20c7   :  { %6843 = vmatprep.subr.mxu0 %v5347_v24 }
0x20c8   :  { %6844 = vmatpush3.msra.mxu0 %v5347_v24 }
0x20c9   :  { %6845 = vmatprep.subr.mxu0 %v5346_v36 }
0x20ca   :  { %6846 = vmatpush3.msra.mxu0 %v5346_v36 }
0x20cb   :  { %6847 = vmatprep.subr.mxu0 %v5345_v2 }
0x20cc   :  { %6848 = vmatpush3.msra.mxu0 %v5345_v2 }
0x212d   :  { %v5199_v6 = vpop.xlane.xlu1 %5198 }
0x212e   :  { %v5205_v25 = vmul.f32 0.03125, %v5199_v6 }
0x2130   :  { %v5209_v26 = vadd.f32 1e-05, %v5205_v25 }
0x2131   :  { %v5202_v48 = vpop.xlane.xlu0 %5201 }
0x2132   :  { %7070 = vrsqrt.f32 %v5209_v26  ;;  %v5206_v27 = vmul.f32 0.03125, %v5202_v48 }
0x2134   :  { %v5210_v58 = vadd.f32 1e-05, %v5206_v27 }
0x2136   :  { %7072 = vrsqrt.f32 %v5210_v58 }
0x213f   :  { %v7071_v30 = vpop.eup %7070 }
0x2140   :  { %v5217_v34 = vmul.f32 %v7071_v30, %v5185_v4 }
0x2142   :  { %v5225_v39 = vmul.f32 %v8742_v14, %v5217_v34 }
0x2143   :  { %v7073_v28 = vpop.eup %7072 }
0x2144   :  { %v5233_v3 = vadd.f32 %v8747_v23, %v5225_v39  ;;  %v5218_v17 = vmul.f32 %v7073_v28, %v5186_v54 }
0x2146   :  { %6830 = vmatprep.mubr.msk.f32.mxu0 %vm458_vm4, %v5233_v3  ;;  %v5226_v10 = vmul.f32 %v8742_v14, %v5218_v17 }
0x2148   :  { %v5234_v59 = vadd.f32 %v8747_v23, %v5226_v10  ;;  %v6033_v23 = vld [vmem:[%s8922_s1 + $0x16] ss:$0 sm:$0xff]  ;;  %v6034_v10 = vld [vmem:[%s8922_s1 + $0x5] ss:$0 sm:$0xff] }
0x214a   :  { %6831 = vmatmul.mubr.msk.f32.gmra.mxu0 %vm458_vm4, %v5234_v59 }
0x217d   :  { %v6829_v43 = vpop.f32.mrf.mxu0 }
0x217e   :  { %v5328_v41 = vadd.f32 %v6829_v43, %v6024_v12 }
0x217f   :  { %v5322_v38 = vpop.f32.mrf.mxu0 }
0x2180   :  { %v5323_v19 = vadd.f32 %v6024_v12, %v5322_v38  ;;  %v5342_v44 = vmax.f32 %v5328_v41, 0.0  ;;  %v6035_v41 = vld [vmem:[%s8922_s1 + $0x6] ss:$0 sm:$0xff] }
0x2182   :  { %v5341_v1 = vmax.f32 %v5323_v19, 0.0  ;;  %v7098_v19 = vld [vmem:[%s8922_s1 + $0x9] sm:$0x1] }
0x2184   :  { %6849 = vmatprep.mubr.msk.f32.mxu0 %vm2629_vm6, %v5341_v1 }
0x2185   :  { %6850 = vmatmul.mubr.msk.f32.vlgmr.msra.gmra.mxu0 %vm2629_vm6, %v5342_v44 }
0x220a   :  { %v6832_v32 = vpop.f32.mrf.mxu0 }
0x220b   :  { %v5338_v33 = vadd.f32 %v6832_v32, %v6024_v12  ;;  %v5661_v32 = vld [vmem:[%s8920_s3 + $0xa0] sm:$0xff] }
0x220c   :  { %v5332_v45 = vpop.f32.mrf.mxu0 }
0x220d   :  { %v5333_v13 = vadd.f32 %v6024_v12, %v5332_v45  ;;  %v5344_v14 = vmax.f32 %v5338_v33, 0.0  ;;  %v5660_v33 = vld [vmem:[%s8920_s3 + $0x98] sm:$0xff]  ;;  %v5659_v45 = vld [vmem:[%s8920_s3 + $0x90] sm:$0xff] }
0x220f   :  { %v5343_v9 = vmax.f32 %v5333_v13, 0.0  ;;  %v5658_v13 = vld [vmem:[%s8920_s3 + $0x88] sm:$0xff] }
0x2211   :  { %6852 = vmatprep.mubr.msk.f32.mxu0 %vm2629_vm6, %v5343_v9  ;;  %v5657_v9 = vld [vmem:[%s8920_s3 + $0x80] sm:$0xff] }
0x2212   :  { %6853 = vmatmul.mubr.msk.f32.gmra.mxu0 %vm2629_vm6, %v5344_v14  ;;  %v5656_v14 = vld [vmem:[%s8920_s3 + $0x78] sm:$0xff] }
0x2245   :  { %v6851_v37 = vpop.f32.mrf.mxu0 }
0x2246   :  { %v5451_v29 = vadd.f32 %v6851_v37, %v8711_v42 }
0x2247   :  { %v5431_v35 = vpop.f32.mrf.mxu0 }
0x2248   :  { %v5460_v49 = vadd.f32 %v6033_v23, %v5451_v29  ;;  %v5450_v18 = vadd.f32 %v5431_v35, %v8708_v11 }
0x224a   :  { %v5459_v63 = vadd.f32 %v6033_v23, %v5450_v18  ;;  %v5468_v22 = vsel %vm458_vm4, %v5460_v49, 0.0 }
0x224b   :  { %5469 = vadd.xlane.f32.xlu0 %v5468_v22 }
0x224c   :  { %v5465_v50 = vsel %vm458_vm4, %v5459_v63, 0.0 }
0x224d   :  { %5466 = vadd.xlane.f32.xlu1 %v5465_v50 }
0x22d2   :  { %v6854_v51 = vpop.f32.mrf.mxu0 }
0x22d3   :  { %v5453_v4 = vadd.f32 %v6854_v51, %v8732_v62 }
0x22d4   :  { %v5470_v8 = vpop.xlane.xlu0 %5469  ;;  %v5441_v52 = vpop.f32.mrf.mxu0 }
0x22d5   :  { %v5462_v53 = vadd.f32 %v6033_v23, %v5453_v4  ;;  %v5478_v54 = vmul.f32 0.03125, %v5470_v8  ;;  %v5452_v42 = vadd.f32 %v5441_v52, %v8728_v61  ;;  %v5536_v61 = vld [vmem:[%s8920_s3 + $0x70] sm:$0xff] }
0x22d6   :  { %v5467_v55 = vpop.xlane.xlu1 %5466  ;;  %6855 = vmatprep.subr.mxu1 %v5536_v61 }
0x22d7   :  { %v5482_v56 = vsub.f32 %v5460_v49, %v5478_v54  ;;  %v5461_v57 = vadd.f32 %v6033_v23, %v5452_v42  ;;  %v5477_v11 = vmul.f32 0.03125, %v5467_v55  ;;  %v5474_v15 = vsel %vm458_vm4, %v5462_v53, 0.0  ;;  %6856 = vmatpush3.msra.mxu1 %v5536_v61  ;;  %v6036_v42 = vld [vmem:[%s8922_s1 + $0x7] ss:$0 sm:$0xff] }
0x22d8   :  { %5475 = vadd.xlane.f32.xlu0 %v5474_v15  ;;  %6857 = vmatprep.subr.mxu1 %v5535_v40 }
0x22d9   :  { %v5481_v20 = vsub.f32 %v5459_v63, %v5477_v11  ;;  %v5471_v5 = vsel %vm458_vm4, %v5461_v57, 0.0  ;;  %v5486_v60 = vmul.f32 %v5482_v56, %v5482_v56  ;;  %6858 = vmatpush3.msra.mxu1 %v5535_v40 }
0x22da   :  { %5472 = vadd.xlane.f32.xlu1 %v5471_v5  ;;  %6859 = vmatprep.subr.mxu1 %v5534_v31 }
0x22db   :  { %v5492_v62 = vsel %vm458_vm4, %v5486_v60, 0.0  ;;  %v5485_v21 = vmul.f32 %v5481_v20, %v5481_v20  ;;  %6860 = vmatpush3.msra.mxu1 %v5534_v31 }
0x22dc   :  { %5493 = vadd.xlane.f32.xlu0 %v5492_v62  ;;  %6861 = vmatprep.subr.mxu1 %v5533_v7 }
0x22dd   :  { %v5489_v46 = vsel %vm458_vm4, %v5485_v21, 0.0  ;;  %6862 = vmatpush3.msra.mxu1 %v5533_v7 }
0x22de   :  { %5490 = vadd.xlane.f32.xlu1 %v5489_v46  ;;  %6869 = vmatprep.subr.mxu1 %v5661_v32 }
0x2361   :  { %v5476_v47 = vpop.xlane.xlu0 %5475 }
0x2362   :  { %v5480_v0 = vmul.f32 0.03125, %v5476_v47 }
0x2363   :  { %v5473_v16 = vpop.xlane.xlu1 %5472 }
0x2364   :  { %v5484_v24 = vsub.f32 %v5462_v53, %v5480_v0  ;;  %v5479_v36 = vmul.f32 0.03125, %v5473_v16  ;;  %v6041_v16 = vld [vmem:[%s8922_s1 + $0x8] ss:$0 sm:$0xff] }
0x2365   :  { %v5494_v2 = vpop.xlane.xlu0 %5493 }
0x2366   :  { %v5483_v6 = vsub.f32 %v5461_v57, %v5479_v36  ;;  %v5502_v25 = vmul.f32 0.03125, %v5494_v2  ;;  %v5488_v26 = vmul.f32 %v5484_v24, %v5484_v24 }
0x2367   :  { %v5491_v48 = vpop.xlane.xlu1 %5490 }
0x2368   :  { %v5506_v27 = vadd.f32 1e-05, %v5502_v25  ;;  %v5501_v58 = vmul.f32 0.03125, %v5491_v48  ;;  %v5498_v30 = vsel %vm458_vm4, %v5488_v26, 0.0  ;;  %v5487_v34 = vmul.f32 %v5483_v6, %v5483_v6 }
0x2369   :  { %5499 = vadd.xlane.f32.xlu0 %v5498_v30 }
0x236a   :  { %7074 = vrsqrt.f32 %v5506_v27  ;;  %v5505_v39 = vadd.f32 1e-05, %v5501_v58  ;;  %v5495_v28 = vsel %vm458_vm4, %v5487_v34, 0.0  ;;  %v7100_v27 = vld [vmem:[%s8921_s0] sm:$0xff] }
0x236b   :  { %5496 = vadd.xlane.f32.xlu1 %v5495_v28 }
0x236c   :  { %7076 = vrsqrt.f32 %v5505_v39 }
0x2377   :  { %v7075_v3 = vpop.eup %7074 }
0x2378   :  { %v5514_v17 = vmul.f32 %v7075_v3, %v5482_v56 }
0x2379   :  { %v7077_v59 = vpop.eup %7076 }
0x237a   :  { %v5513_v12 = vmul.f32 %v7077_v59, %v5481_v20  ;;  %v5522_v43 = vmul.f32 %v6034_v10, %v5514_v17 }
0x237c   :  { %v5521_v38 = vmul.f32 %v6034_v10, %v5513_v12  ;;  %5643 = vrot.lane.b32.xlu1 %v7098_v19, %s7121_s21  ;;  %v5530_v44 = vadd.f32 %v6035_v41, %v5522_v43 }
0x237e   :  { %v5529_v1 = vadd.f32 %v6035_v41, %v5521_v38 }
0x2380   :  { %6863 = vmatprep.mubr.msk.f32.mxu1 %vm458_vm4, %v5529_v1 }
0x2381   :  { %6864 = vmatmul.mubr.msk.f32.vlgmr.msra.gmra.mxu1 %vm458_vm4, %v5530_v44  ;;  %v7102_v44 = vld [vmem:[%s8921_s0 + $0x10] sm:$0xff] }
0x2382   :  { %6870 = vmatpush3.msra.mxu1 %v5661_v32 }
0x2383   :  { %6871 = vmatprep.subr.mxu1 %v5660_v33 }
0x2384   :  { %6872 = vmatpush3.msra.mxu1 %v5660_v33 }
0x2385   :  { %6873 = vmatprep.subr.mxu1 %v5659_v45 }
0x2386   :  { %6874 = vmatpush3.msra.mxu1 %v5659_v45 }
0x2387   :  { %6875 = vmatprep.subr.mxu1 %v5658_v13 }
0x2388   :  { %6876 = vmatpush3.msra.mxu1 %v5658_v13 }
0x2389   :  { %6877 = vmatprep.subr.mxu1 %v5657_v9 }
0x238a   :  { %6878 = vmatpush3.msra.mxu1 %v5657_v9 }
0x238b   :  { %6879 = vmatprep.subr.mxu1 %v5656_v14 }
0x238c   :  { %6880 = vmatpush3.msra.mxu1 %v5656_v14 }
0x23f2   :  { %v5500_v37 = vpop.xlane.xlu0 %5499 }
0x23f3   :  { %v5504_v23 = vmul.f32 0.03125, %v5500_v37 }
0x23f4   :  { %v5497_v29 = vpop.xlane.xlu1 %5496 }
0x23f5   :  { %v5508_v35 = vadd.f32 1e-05, %v5504_v23  ;;  %v5503_v49 = vmul.f32 0.03125, %v5497_v29 }
0x23f7   :  { %7078 = vrsqrt.f32 %v5508_v35  ;;  %v5507_v18 = vadd.f32 1e-05, %v5503_v49 }
0x23f8   :  { %v5644_v63 = vpop.permute.xlu1 %5643 }
0x23f9   :  { %7080 = vrsqrt.f32 %v5507_v18  ;;  %6893 = vpush %v5644_v63 }
0x2404   :  { %v7079_v22 = vpop.eup %7078 }
0x2405   :  { %v5516_v50 = vmul.f32 %v7079_v22, %v5484_v24 }
0x2406   :  { %v7081_v51 = vpop.eup %7080 }
0x2407   :  { %v5515_v4 = vmul.f32 %v7081_v51, %v5483_v6  ;;  %v5524_v8 = vmul.f32 %v6034_v10, %v5516_v50  ;;  %v7099_v6 = vld [vmem:[%s8921_s0 + $0x8] sm:$0xff] }
0x2409   :  { %v5523_v52 = vmul.f32 %v6034_v10, %v5515_v4  ;;  %v5532_v54 = vadd.f32 %v6035_v41, %v5524_v8 }
0x240b   :  { %v5531_v53 = vadd.f32 %v6035_v41, %v5523_v52  ;;  %v7101_v41 = vld [vmem:[%s8921_s0 + $0x18] sm:$0xff] }
0x240d   :  { %6866 = vmatprep.mubr.msk.f32.mxu1 %vm458_vm4, %v5531_v53 }
0x240e   :  { %6867 = vmatmul.mubr.msk.f32.gmra.mxu1 %vm458_vm4, %v5532_v54 }
0x242a   :  { %s6894_s30 = spop %6893 }
0x242b   :  { %v5646_v57 = vstv %s6894_s30 }
0x2441   :  { %v6865_v55 = vpop.f32.mrf.mxu1 }
0x2442   :  { %v5626_v56 = vadd.f32 %v6865_v55, %v6036_v42 }
0x2443   :  { %v5620_v11 = vpop.f32.mrf.mxu1 }
0x2444   :  { %v5621_v15 = vadd.f32 %v6036_v42, %v5620_v11  ;;  %v5649_v20 = vmul.f32 %v5646_v57, %v5626_v56  ;;  %vm5640_vm0 = vcmp.ge.f32.partialorder %v5626_v56, 0.0 }
0x2446   :  { %vm5639_vm7 = vcmp.ge.f32.partialorder %v5621_v15, 0.0  ;;  %v5648_v5 = vmul.f32 %v5646_v57, %v5621_v15  ;;  %v5653_v62 = vsel %vm5640_vm0, %v5626_v56, %v5649_v20 }
0x2448   :  { %v5652_v60 = vsel %vm5639_vm7, %v5621_v15, %v5648_v5 }
0x2449   :  { %6881 = vmatprep.mubr.msk.f32.mxu1 %vm189_vm8, %v5652_v60 }
0x244a   :  { %6882 = vmatmul.mubr.msk.f32.vlgmr.msra.gmra.mxu1 %vm189_vm8, %v5653_v62 }
0x24ce   :  { %v6868_v21 = vpop.f32.mrf.mxu1 }
0x24cf   :  { %v5636_v46 = vadd.f32 %v6868_v21, %v6036_v42 }
0x24d0   :  { %v5630_v61 = vpop.f32.mrf.mxu1 }
0x24d1   :  { %v5631_v40 = vadd.f32 %v6036_v42, %v5630_v61  ;;  %v5651_v31 = vmul.f32 %v5646_v57, %v5636_v46  ;;  %vm5642_vm4 = vcmp.ge.f32.partialorder %v5636_v46, 0.0 }
0x24d3   :  { %vm5641_vm9 = vcmp.ge.f32.partialorder %v5631_v40, 0.0  ;;  %v5650_v7 = vmul.f32 %v5646_v57, %v5631_v40  ;;  %v5655_v0 = vsel %vm5642_vm4, %v5636_v46, %v5651_v31 }
0x24d5   :  { %v5654_v47 = vsel %vm5641_vm9, %v5631_v40, %v5650_v7 }
0x24d6   :  { %6884 = vmatprep.mubr.msk.f32.mxu1 %vm189_vm8, %v5654_v47 }
0x24d7   :  { %6885 = vmatmul.mubr.msk.f32.gmra.mxu1 %vm189_vm8, %v5655_v0  ;;  %vm5796_vm8 = vcmask 195744  }
0x250a   :  { %v6883_v24 = vpop.f32.mrf.mxu1 }
0x250b   :  { %v5751_v36 = vadd.f32 %v6883_v24, %v6041_v16 }
0x250c   :  { %v5745_v2 = vpop.f32.mrf.mxu1 }
0x250d   :  { %v5765_v25 = vadd.f32 %v7099_v6, %v5751_v36  ;;  %v6047_v26 = vmul.f32 -1.442695, %v5751_v36  ;;  %v5746_v48 = vadd.f32 %v6041_v16, %v5745_v2 }
0x250f   :  { %5769 = vst.msk [vmem:[%s8924_s4 + $0x8] sm:$0xff] %vm60_vm1, %v5765_v25  ;;  %7082 = vpow2.f32 %v6047_v26  ;;  %v5764_v58 = vadd.f32 %v7100_v27, %v5746_v48  ;;  %v6046_v30 = vmul.f32 -1.442695, %v5746_v48 }
0x2511   :  { %5768 = vst.msk [vmem:[%s8924_s4] sm:$0xff] %vm60_vm1, %v5764_v58  ;;  %7084 = vpow2.f32 %v6046_v30 }
0x251c   :  { %v7083_v34 = vpop.eup %7082 }
0x251d   :  { %v5785_v39 = vadd.f32 1.0, %v7083_v34 }
0x251e   :  { %v7085_v28 = vpop.eup %7084 }
0x251f   :  { %7086 = vrcp.f32 %v5785_v39  ;;  %v5784_v3 = vadd.f32 1.0, %v7085_v28 }
0x2521   :  { %7088 = vrcp.f32 %v5784_v3 }
0x252c   :  { %v7087_v17 = vpop.eup %7086 }
0x252d   :  { %5798 = vst.msk [vmem:[%s8924_s4 + $0x8] sm:$0xff] %vm5796_vm8, %v7087_v17 }
0x252e   :  { %v7089_v10 = vpop.eup %7088 }
0x252f   :  { %5797 = vst.msk [vmem:[%s8924_s4] sm:$0xff] %vm5796_vm8, %v7089_v10 }
0x2597   :  { %v6886_v59 = vpop.f32.mrf.mxu1 }
0x2598   :  { %v5761_v12 = vadd.f32 %v6886_v59, %v6041_v16 }
0x2599   :  { %v5755_v43 = vpop.f32.mrf.mxu1 }
0x259a   :  { %v5767_v38 = vadd.f32 %v7101_v41, %v5761_v12  ;;  %v6049_v19 = vmul.f32 -1.442695, %v5761_v12  ;;  %v5756_v1 = vadd.f32 %v6041_v16, %v5755_v43 }
0x259c   :  { %5771 = vst.msk [vmem:[%s8924_s4 + $0x18] sm:$0xff] %vm60_vm1, %v5767_v38  ;;  %7090 = vpow2.f32 %v6049_v19  ;;  %v5766_v32 = vadd.f32 %v7102_v44, %v5756_v1  ;;  %v6048_v33 = vmul.f32 -1.442695, %v5756_v1 }
0x259e   :  { %5770 = vst.msk [vmem:[%s8924_s4 + $0x10] sm:$0xff] %vm60_vm1, %v5766_v32  ;;  %7092 = vpow2.f32 %v6048_v33 }
0x25a9   :  { %v7091_v45 = vpop.eup %7090 }
0x25aa   :  { %v5787_v13 = vadd.f32 1.0, %v7091_v45 }
0x25ab   :  { %v7093_v9 = vpop.eup %7092 }
0x25ac   :  { %7094 = vrcp.f32 %v5787_v13  ;;  %v5786_v14 = vadd.f32 1.0, %v7093_v9 }
0x25ae   :  { %7096 = vrcp.f32 %v5786_v14 }
0x25b9   :  { %v7095_v37 = vpop.eup %7094 }
0x25ba   :  { %5800 = vst.msk [vmem:[%s8924_s4 + $0x18] sm:$0xff] %vm5796_vm8, %v7095_v37 }
0x25bb   :  { %v7097_v23 = vpop.eup %7096 }
0x25bc   :  { %5799 = vst.msk [vmem:[%s8924_s4 + $0x10] sm:$0xff] %vm5796_vm8, %v7097_v23 }

</bundles_post_ra>
